<compile_context>
chip_gen: v7x
topology: tpu7x:2x2x1
jax: 0.10.0
libtpu: 0.0.40
codegen_flags: <defaults>
</compile_context>

<pallas_src>
import jax
import jax.numpy as jnp
from jax.experimental import pallas as pl
from jax.experimental.pallas import tpu as pltpu


_SQRT_2_OVER_PI = 0.7978845608028654
_GELU_COEF = 0.044715


def _gelu_tanh(x):
    # tanh-form GELU: 0.5*x*(1 + tanh(sqrt(2/pi)*(x + 0.044715*x^3))).
    # tanh executes on the EUP (separate bundle slot), so the VALU only does
    # a handful of mul/adds per element instead of the erf polynomial chain.
    inner = (_SQRT_2_OVER_PI * x) * (1.0 + _GELU_COEF * x * x)
    return 0.5 * x * (1.0 + jnp.tanh(inner))


def _mlp_kernel(x_ref, w1_ref, b1_ref, w2_ref, b2_ref, o_ref):
    # x:(tm,K) f32   w1:(K,H) bf16   b1:(1,H) f32   w2:(H,N) bf16   b2:(1,N) f32
    x = x_ref[...].astype(jnp.bfloat16)          # in-kernel cast (no HBM pre-pass)
    h = jnp.dot(x, w1_ref[...],
                preferred_element_type=jnp.float32) + b1_ref[...]
    h = _gelu_tanh(h)                            # f32, VPU + EUP
    h = h.astype(jnp.bfloat16)                   # bf16 for the second MXU pass
    o = jnp.dot(h, w2_ref[...],
                preferred_element_type=jnp.float32) + b2_ref[...]
    o_ref[...] = o.astype(o_ref.dtype)


def _pick_block_m(m):
    # Target 256-512 rows per tile (amortize per-grid-step overhead), but keep
    # at least 2 row tiles so the "parallel" axis can use both v7x TensorCores.
    for bm in (512, 256, 128):
        if pl.cdiv(m, bm) >= 2:
            return bm
    return 128


def _vmem_limit_bytes():
    # Generation-aware budget: ~3/4 of per-core physical VMEM, capped at 96 MiB
    # (v5e/v6e: 128 MiB -> 96 MiB; v7x: 64 MiB -> 48 MiB). Conservative fallback.
    try:
        cap = pltpu.get_tpu_info().vmem_capacity_bytes
        return int(min(96 * 1024 * 1024, (3 * cap) // 4))
    except Exception:
        return 32 * 1024 * 1024


def mlp_forward(params, x, *, block_m=None):
    """Fused Mlp forward: GELU(x @ w1 + b1) @ w2 + b2.  x: (..., in_features)."""
    orig_shape = x.shape
    K = orig_shape[-1]
    x2d = x.reshape(-1, K)           # no pad / no dtype cast here (done in-kernel)
    M = x2d.shape[0]

    w1 = params["w1"].astype(jnp.bfloat16)               # (K, H), (in, out) layout
    w2 = params["w2"].astype(jnp.bfloat16)               # (H, N)
    H = w1.shape[1]
    N = w2.shape[1]
    b1 = params["b1"].reshape(1, H).astype(jnp.float32)
    b2 = params["b2"].reshape(1, N).astype(jnp.float32)

    if block_m is None:
        block_m = _pick_block_m(M)
    m_tiles = pl.cdiv(M, block_m)    # ragged last tile handled by Pallas masking

    # TODO(synk): at real transformer widths (e.g. C=1024, H=4096) mark the
    # resident w1/b1/w2/b2 specs single-buffered (pipeline_mode=pl.Buffered(1))
    # and/or add a reduction grid axis over H with a VMEM accumulator so the
    # weights fit v7x's 64 MiB VMEM; unnecessary at the demo widths (H=512).
    out = pl.pallas_call(
        _mlp_kernel,
        out_shape=jax.ShapeDtypeStruct((M, N), x.dtype),
        grid=(m_tiles,),
        in_specs=[
            pl.BlockSpec((block_m, K), lambda i: (i, 0)),   # x row tile (streamed)
            pl.BlockSpec((K, H), lambda i: (0, 0)),         # w1 (resident)
            pl.BlockSpec((1, H), lambda i: (0, 0)),         # b1
            pl.BlockSpec((H, N), lambda i: (0, 0)),         # w2 (resident)
            pl.BlockSpec((1, N), lambda i: (0, 0)),         # b2
        ],
        out_specs=pl.BlockSpec((block_m, N), lambda i: (i, 0)),
        compiler_params=pltpu.CompilerParams(
            dimension_semantics=("parallel",),
            vmem_limit_bytes=_vmem_limit_bytes(),
        ),
    )(x2d, w1, b1, w2, b2)

    return out.reshape(*orig_shape[:-1], N)


# -----------------------------------------------------------------------------
if __name__ == "__main__":
    key = jax.random.PRNGKey(0)
    kx, k1, k2, k3, k4 = jax.random.split(key, 5)

    # Token-shaped input, as used inside a transformer block:
    #   (B, T, in_features) = (8, 64, 128), hidden = 4 * 128 = 512, out = 128.
    # M = 512 rows -> block_m auto-picks 256 with 2 "parallel" tiles.
    B, T, C = 8, 64, 128
    Hdim = 4 * C

    x = jax.random.normal(kx, (B, T, C), jnp.float32)
    params = dict(
        # Linear weights stored pre-transposed to (in_features, out_features).
        w1=jax.random.normal(k1, (C, Hdim), jnp.float32) / jnp.sqrt(C),
        b1=0.02 * jax.random.normal(k2, (Hdim,), jnp.float32),
        w2=jax.random.normal(k3, (Hdim, C), jnp.float32) / jnp.sqrt(Hdim),
        b2=0.02 * jax.random.normal(k4, (C,), jnp.float32),
    )

    fwd = jax.jit(mlp_forward)
    out = fwd(params, x)
    jax.block_until_ready(out)

    # Reference with identical operand precision (bf16 matmul inputs, f32 acc).
    def ref(params, x, approximate):
        xb = x.reshape(-1, C).astype(jnp.bfloat16)
        h = jnp.dot(xb, params["w1"].astype(jnp.bfloat16),
                    preferred_element_type=jnp.float32) + params["b1"]
        h = jax.nn.gelu(h, approximate=approximate).astype(jnp.bfloat16)
        o = jnp.dot(h, params["w2"].astype(jnp.bfloat16),
                    preferred_element_type=jnp.float32) + params["b2"]
        return o.reshape(B, T, C)

    expected_tanh = ref(params, x, True)    # same (tanh) GELU form as the kernel
    expected_erf = ref(params, x, False)    # exact-erf nn.GELU() module semantics

    assert out.shape == (B, T, C)
    assert bool(jnp.all(jnp.isfinite(out)))
    err_tanh = float(jnp.max(jnp.abs(out - expected_tanh)))
    err_erf = float(jnp.max(jnp.abs(out - expected_erf)))
    assert err_tanh < 5e-3, f"max abs err vs tanh-GELU reference {err_tanh}"
    assert err_erf < 2e-2, f"max abs err vs exact-erf reference {err_erf}"
    print("KERNEL_OK")
</pallas_src>

<mosaic_0001>
module attributes {stable_mosaic.version = 11 : i64} {
  func.func @_mlp_kernel(%arg0: i32, %arg1: memref<256x128xf32, #tpu.memory_space<vmem>>, %arg2: memref<128x512xbf16, #tpu.memory_space<vmem>>, %arg3: memref<1x512xf32, #tpu.memory_space<vmem>>, %arg4: memref<512x128xbf16, #tpu.memory_space<vmem>>, %arg5: memref<1x128xf32, #tpu.memory_space<vmem>>, %arg6: memref<256x128xf32, #tpu.memory_space<vmem>>) attributes {dimension_semantics = [#tpu.dimension_semantics<parallel>], iteration_bounds = array<i64: 2>, scalar_prefetch = 0 : i64, scratch_operands = 0 : i64, tpu.core_type = #tpu.core_type<tc>, window_params = [{transform_indices = @transform_0, window_bounds = array<i64: 256, 128>}, {pipeline_mode = #tpu.pipeline_mode<synchronous>, transform_indices = @transform_1, window_bounds = array<i64: 128, 512>}, {pipeline_mode = #tpu.pipeline_mode<synchronous>, transform_indices = @transform_2, window_bounds = array<i64: 1, 512>}, {pipeline_mode = #tpu.pipeline_mode<synchronous>, transform_indices = @transform_3, window_bounds = array<i64: 512, 128>}, {pipeline_mode = #tpu.pipeline_mode<synchronous>, transform_indices = @transform_4, window_bounds = array<i64: 1, 128>}, {transform_indices = @transform_5, window_bounds = array<i64: 256, 128>}]} {
    %c0 = arith.constant 0 : index
    %c0_0 = arith.constant 0 : index
    %0 = vector.load %arg1[%c0, %c0_0] : memref<256x128xf32, #tpu.memory_space<vmem>>, vector<256x128xf32>
    %1 = arith.truncf %0 : vector<256x128xf32> to vector<256x128xbf16>
    %c0_1 = arith.constant 0 : index
    %c0_2 = arith.constant 0 : index
    %2 = vector.load %arg2[%c0_1, %c0_2] : memref<128x512xbf16, #tpu.memory_space<vmem>>, vector<128x512xbf16>
    %cst = arith.constant dense<0.000000e+00> : vector<256x512xf32>
    %3 = tpu.matmul %1, %2, %cst {dimension_numbers = #tpu.dot_dimension_numbers<[1], [0], [0], [1], [0, 0, 1, 1], [], []>} : vector<256x128xbf16>, vector<128x512xbf16>, vector<256x512xf32> -> vector<256x512xf32>
    %c0_3 = arith.constant 0 : index
    %c0_4 = arith.constant 0 : index
    %4 = vector.load %arg3[%c0_3, %c0_4] : memref<1x512xf32, #tpu.memory_space<vmem>>, vector<1x512xf32>
    %5 = vector.broadcast %4 : vector<1x512xf32> to vector<256x512xf32>
    %6 = arith.addf %3, %5 : vector<256x512xf32>
    %cst_5 = arith.constant 0.797884583 : f32
    %7 = vector.broadcast %cst_5 : f32 to vector<256x512xf32>
    %8 = arith.mulf %7, %6 : vector<256x512xf32>
    %cst_6 = arith.constant 4.471500e-02 : f32
    %9 = vector.broadcast %cst_6 : f32 to vector<256x512xf32>
    %10 = arith.mulf %9, %6 : vector<256x512xf32>
    %11 = arith.mulf %10, %6 : vector<256x512xf32>
    %cst_7 = arith.constant 1.000000e+00 : f32
    %12 = vector.broadcast %cst_7 : f32 to vector<256x512xf32>
    %13 = arith.addf %12, %11 : vector<256x512xf32>
    %14 = arith.mulf %8, %13 : vector<256x512xf32>
    %cst_8 = arith.constant 5.000000e-01 : f32
    %15 = vector.broadcast %cst_8 : f32 to vector<256x512xf32>
    %16 = arith.mulf %15, %6 : vector<256x512xf32>
    %17 = math.tanh %14 : vector<256x512xf32>
    %cst_9 = arith.constant 1.000000e+00 : f32
    %18 = vector.broadcast %cst_9 : f32 to vector<256x512xf32>
    %19 = arith.addf %18, %17 : vector<256x512xf32>
    %20 = arith.mulf %16, %19 : vector<256x512xf32>
    %21 = arith.truncf %20 : vector<256x512xf32> to vector<256x512xbf16>
    %c0_10 = arith.constant 0 : index
    %c0_11 = arith.constant 0 : index
    %22 = vector.load %arg4[%c0_10, %c0_11] : memref<512x128xbf16, #tpu.memory_space<vmem>>, vector<512x128xbf16>
    %cst_12 = arith.constant dense<0.000000e+00> : vector<256x128xf32>
    %23 = tpu.matmul %21, %22, %cst_12 {dimension_numbers = #tpu.dot_dimension_numbers<[1], [0], [0], [1], [0, 0, 1, 1], [], []>} : vector<256x512xbf16>, vector<512x128xbf16>, vector<256x128xf32> -> vector<256x128xf32>
    %c0_13 = arith.constant 0 : index
    %c0_14 = arith.constant 0 : index
    %24 = vector.load %arg5[%c0_13, %c0_14] : memref<1x128xf32, #tpu.memory_space<vmem>>, vector<1x128xf32>
    %25 = vector.broadcast %24 : vector<1x128xf32> to vector<256x128xf32>
    %26 = arith.addf %23, %25 : vector<256x128xf32>
    %c0_15 = arith.constant 0 : index
    %c0_16 = arith.constant 0 : index
    %27 = vector.load %arg6[%c0_15, %c0_16] : memref<256x128xf32, #tpu.memory_space<vmem>>, vector<256x128xf32>
    tpu.vector_store %arg6[%c0_15, %c0_16], %26 {strides = array<i32>} : memref<256x128xf32, #tpu.memory_space<vmem>>, vector<256x128xf32>,
    return
  }
  func.func @transform_0(%arg0: i32) -> (i32, i32) {
    %c0_i32 = arith.constant 0 : i32
    %c0_i32_0 = arith.constant 0 : i32
    return %arg0, %c0_i32 : i32, i32
  }
  func.func @transform_1(%arg0: i32) -> (i32, i32) {
    %c0_i32 = arith.constant 0 : i32
    %c0_i32_0 = arith.constant 0 : i32
    %c0_i32_1 = arith.constant 0 : i32
    return %c0_i32, %c0_i32_0 : i32, i32
  }
  func.func @transform_2(%arg0: i32) -> (i32, i32) {
    %c0_i32 = arith.constant 0 : i32
    %c0_i32_0 = arith.constant 0 : i32
    %c0_i32_1 = arith.constant 0 : i32
    return %c0_i32, %c0_i32_0 : i32, i32
  }
  func.func @transform_3(%arg0: i32) -> (i32, i32) {
    %c0_i32 = arith.constant 0 : i32
    %c0_i32_0 = arith.constant 0 : i32
    %c0_i32_1 = arith.constant 0 : i32
    return %c0_i32, %c0_i32_0 : i32, i32
  }
  func.func @transform_4(%arg0: i32) -> (i32, i32) {
    %c0_i32 = arith.constant 0 : i32
    %c0_i32_0 = arith.constant 0 : i32
    %c0_i32_1 = arith.constant 0 : i32
    return %c0_i32, %c0_i32_0 : i32, i32
  }
  func.func @transform_5(%arg0: i32) -> (i32, i32) {
    %c0_i32 = arith.constant 0 : i32
    %c0_i32_0 = arith.constant 0 : i32
    return %arg0, %c0_i32 : i32, i32
  }
}

</mosaic_0001>

<bundles_post_ra>
// kernel: mlp_forward.1
= control target key start
LH: loop header
LB: loop body
LE: loop exit
PB: predicated region body
PF: predicated region fallthrough
CT: control target
= control target key end

     0   :  { %10 = vsyncpa [#allocation3], 0  ;;  %s5811_s0 = inlined_call_operand.vmem [shape: f32[512,128], index: 0, kind: input, shape index: {}]   ;;  %s5812_s1 = inlined_call_operand.vmem [shape: bf16[128,512], index: 1, kind: input, shape index: {}]   ;;  %s5813_s2 = inlined_call_operand.vmem [shape: f32[1,512], index: 2, kind: input, shape index: {}]   ;;  %s5814_s3 = inlined_call_operand.vmem [shape: bf16[512,128], index: 3, kind: input, shape index: {}]   ;;  %s5815_s4 = inlined_call_operand.vmem [shape: f32[1,128], index: 4, kind: input, shape index: {}]   ;;  %s5816_s5 = inlined_call_operand.hbm [shape: f32[512,128], index: 5, kind: output, shape index: {}]  }
   0x1   :  { %12 = vsyncpa [#allocation3 + $0x1], 0  ;;  %s3562_s18 = smov 0   ;;  %s3564_s19 = smov 0  }
   0x2   :  { %s3566_s20 = smov 0   ;;  %s3568_s21 = smov 0  }
   0x3 LB: > { %s3583_s22 = sadd.s32 4294967295, %s3526_s21   ;;  %s2784_s23 = sadd.s32 4294967294, %s3526_s21   ;;  %s3526_s21 = sphi %s3568_s21, %s6347_s21   ;;  %s3522_s20 = sphi %s3566_s20, %s6346_s20   ;;  %s3518_s19 = sphi %s3564_s19, %s6345_s19   ;;  %s3514_s18 = sphi %s3562_s18, %s6344_s18  }
   0x4   : > { %s3587_s24 = sadd.s32 1, %s3526_s21   ;;  %s135_s25 = sadd.s32 1, %s3522_s20 }
   0x5   : > { %s132_s26 = ssub.s32 %s3526_s21, %s3587_s24  ;;  %p145_p0 = scmp.ne.s32.totalorder %s3522_s20, %s3518_s19 }
   0x6   : > { %p133_p1 = scmp.eq.s32.totalorder %s132_s26, 0  ;;  %p146_p2 = scmp.eq.s32.totalorder %s3583_s22, 1 }
   0x7   : > { %p151_p3 = scmp.ne.s32.totalorder %s3518_s19, %s3514_s18  ;;  %p152_p4 = scmp.eq.s32.totalorder %s2784_s23, 1 }
   0x8   : > { %s3598_s27 = scalar_select %p133_p1, %s3522_s20, %s135_s25  }
   0x9   : > { %p3600_p5 = por %p146_p2, %p145_p0  ;;  %p3604_p6 = por %p152_p4, %p151_p3 }
   0xa   : > { %p2787_p7 = scmp.ge.s32.totalorder %s3526_s21, 1  ;;  %p191_p8 = scmp.lt.s32.totalorder %s3526_s21, 3 }
   0xc   : > { %p192_p9 = pnand %p2787_p7, %p191_p8 }
   0xe   : > { %195 = sbr.rel (%p192_p9) target bundleno = 852 (0x354), region = 40 }
  0x15   : > { %v3128_v0 = vld [vmem:[%s5812_s1 + $0x4] ss:$16 sps:$4 sm:$0xff]   ;;  %v3130_v1 = vld [vmem:[%s5812_s1 + $0xc] ss:$16 sps:$4 sm:$0xff]   ;;  %v3528_v2 = vmov 0   ;;  %s2789_s25 = sshll.u32 %s3583_s22, 5 }
  0x16   : > { %521 = vmatprep.mubr.bf16.mxu0 %v3528_v2  ;;  %714 = vmatprep.mubr.bf16.mxu1 %v3528_v2  ;;  %v3132_v3 = vld [vmem:[%s5812_s1] ss:$16 sps:$4 sm:$0xff]   ;;  %v3133_v4 = vld [vmem:[%s5812_s1 + $0x8] ss:$16 sps:$4 sm:$0xff]   ;;  %v3134_v5 = vld [vmem:[%s5812_s1 + $0x24] ss:$16 sps:$4 sm:$0xff]  }
  0x17   : > { %489 = vmatprep.subr.bf16.mxu0 %v3128_v0  ;;  %682 = vmatprep.subr.bf16.mxu1 %v3130_v1  ;;  %v3136_v6 = vld [vmem:[%s5812_s1 + $0x2c] ss:$16 sps:$4 sm:$0xff]   ;;  %v3138_v7 = vld [vmem:[%s5812_s1 + $0x20] ss:$16 sps:$4 sm:$0xff]   ;;  %v3139_v8 = vld [vmem:[%s5812_s1 + $0x28] ss:$16 sps:$4 sm:$0xff]  }
  0x18   : > { %490 = vmatpush1.bf16.msra.mxu0 %v3132_v3  ;;  %683 = vmatpush1.bf16.msra.mxu1 %v3133_v4  ;;  %v3140_v9 = vld [vmem:[%s5812_s1 + $0x44] ss:$16 sps:$4 sm:$0xff]   ;;  %v3142_v10 = vld [vmem:[%s5812_s1 + $0x4c] ss:$16 sps:$4 sm:$0xff]   ;;  %v3144_v11 = vld [vmem:[%s5812_s1 + $0x40] ss:$16 sps:$4 sm:$0xff]  }
  0x19   : > { %491 = vmatprep.subr.bf16.mxu0 %v3134_v5  ;;  %684 = vmatprep.subr.bf16.mxu1 %v3136_v6  ;;  %v3145_v12 = vld [vmem:[%s5812_s1 + $0x48] ss:$16 sps:$4 sm:$0xff]   ;;  %v3146_v13 = vld [vmem:[%s5812_s1 + $0x64] ss:$16 sps:$4 sm:$0xff]   ;;  %v3148_v14 = vld [vmem:[%s5812_s1 + $0x6c] ss:$16 sps:$4 sm:$0xff]  }
  0x1a   : > { %v3150_v15 = vld [vmem:[%s5812_s1 + $0x60] ss:$16 sps:$4 sm:$0xff]   ;;  %v3151_v16 = vld [vmem:[%s5812_s1 + $0x68] ss:$16 sps:$4 sm:$0xff]   ;;  %v3152_v17 = vld [vmem:[%s5812_s1 + $0x84] ss:$16 sps:$4 sm:$0xff]  }
  0x1b   : > { %v3154_v18 = vld [vmem:[%s5812_s1 + $0x8c] ss:$16 sps:$4 sm:$0xff]   ;;  %p220_p10 = scmp.lt.s32.totalorder %s2789_s25, 63  ;;  %v3156_v19 = vld [vmem:[%s5812_s1 + $0x80] ss:$16 sps:$4 sm:$0xff]   ;;  %s216_s16 = sand.u32 1, %s3518_s19  }
  0x1c   : > { %492 = vmatpush1.bf16.msra.mxu0 %v3138_v7  ;;  %685 = vmatpush1.bf16.msra.mxu1 %v3139_v8  ;;  %v3157_v20 = vld [vmem:[%s5812_s1 + $0x88] ss:$16 sps:$4 sm:$0xff]   ;;  %v3158_v21 = vld [vmem:[%s5812_s1 + $0xa4] ss:$16 sps:$4 sm:$0xff]   ;;  %v3160_v22 = vld [vmem:[%s5812_s1 + $0xac] ss:$16 sps:$4 sm:$0xff]  }
  0x1d   : > { %493 = vmatprep.subr.bf16.mxu0 %v3140_v9  ;;  %686 = vmatprep.subr.bf16.mxu1 %v3142_v10  ;;  %s6349_s25 = smov (!%p220_p10, %s2789_s25), 63  ;;  %v3162_v23 = vld [vmem:[%s5812_s1 + $0xa0] ss:$16 sps:$4 sm:$0xff]   ;;  %v3163_v24 = vld [vmem:[%s5812_s1 + $0xa8] ss:$16 sps:$4 sm:$0xff]   ;;  %s5624_s26 = sshll.u32 %s216_s16, 8 }
  0x1e   : > { %v3164_v25 = vld [vmem:[%s5812_s1 + $0xc4] ss:$16 sps:$4 sm:$0xff]   ;;  %v3166_v26 = vld [vmem:[%s5812_s1 + $0xcc] ss:$16 sps:$4 sm:$0xff]   ;;  %s2790_s11 = sshll.u32 %s6349_s25, 3  ;;  %s5644_s25 = scalar_lea.vmem [#allocation2], %s5624_s26 }
  0x1f   : > { %v3168_v27 = vld [vmem:[%s5812_s1 + $0xc0] ss:$16 sps:$4 sm:$0xff]   ;;  %v3169_v28 = vld [vmem:[%s5812_s1 + $0xc8] ss:$16 sps:$4 sm:$0xff]   ;;  %v3170_v29 = vld [vmem:[%s5812_s1 + $0xe4] ss:$16 sps:$4 sm:$0xff]   ;;  %s3706_s6 = scalar_lea.vmem %s5811_s0, %s2790_s11 }
  0x20   : > { %494 = vmatpush1.bf16.msra.mxu0 %v3144_v11  ;;  %687 = vmatpush1.bf16.msra.mxu1 %v3145_v12  ;;  %v3172_v30 = vld [vmem:[%s5812_s1 + $0xec] ss:$16 sps:$4 sm:$0xff]   ;;  %v3174_v31 = vld [vmem:[%s5812_s1 + $0xe0] ss:$16 sps:$4 sm:$0xff]   ;;  %v3175_v32 = vld [vmem:[%s5812_s1 + $0xe8] ss:$16 sps:$4 sm:$0xff]  }
  0x21   : > { %495 = vmatprep.subr.bf16.mxu0 %v3146_v13  ;;  %688 = vmatprep.subr.bf16.mxu1 %v3148_v14  ;;  %v227_v33 = vld [vmem:[%s3706_s6] sm:$0xff]  ;;  %v228_v34 = vld [vmem:[%s3706_s6 + $0x8] sm:$0xff]  ;;  %v229_v39 = vld [vmem:[%s3706_s6 + $0x10] sm:$0xff]  ;;  %s2861_s30 = sshll.u32 %s3583_s22, 12  ;;  %s2722_s7 = sshll.u32 %s5644_s25, 4  ;;  %s5764_s7 = int_to_ptr.vmem [resolvable:$true] %s2722_s7 }
  0x22   : > { %v259_v35 = vpack.c.bf16 %v228_v34, %v227_v33  ;;  %v3176_v36 = vld [vmem:[%s5814_s3 + $0x40] sm:$0xff]   ;;  %v230_v40 = vld [vmem:[%s3706_s6 + $0x18] sm:$0xff]  ;;  %v3180_v42 = vld [vmem:[%s5814_s3 + $0x48] sm:$0xff]   ;;  %s5762_s10 = scalar_lea.hbm %s5816_s5, %s2861_s30  ;;  %s5770_s22 = scalar_lea.sflag [#allocation3], %s216_s16 }
  0x23   : > { %v3177_v37 = vld [vmem:[%s5814_s3] sm:$0xff]   ;;  %v3181_v43 = vld [vmem:[%s5814_s3 + $0x8] sm:$0xff]   ;;  %v260_v45 = vpack.c.bf16 %v230_v40, %v229_v39  ;;  %v3184_v47 = vld [vmem:[%s5814_s3 + $0x50] sm:$0xff]   ;;  %s3464_s11 = scalar_lea.vmem %s5764_s7, 4096  ;;  %s3529_s12 = smov [#allocation2]  }
  0x24   : > { %496 = vmatpush1.bf16.msra.mxu0 %v3150_v15  ;;  %689 = vmatpush1.bf16.msra.mxu1 %v3151_v16  ;;  %v3178_v38 = vld [vmem:[%s5814_s3 + $0xc0] sm:$0xff]   ;;  %v3182_v44 = vld [vmem:[%s5814_s3 + $0xc8] sm:$0xff]   ;;  %v3185_v48 = vld [vmem:[%s5814_s3 + $0x10] sm:$0xff]   ;;  %p3465_p11 = scmp.ne.s32.totalorder %s5764_s7, %s3464_s11 }
  0x25   : > { %497 = vmatprep.subr.bf16.mxu0 %v3152_v17  ;;  %690 = vmatprep.subr.bf16.mxu1 %v3154_v18  ;;  %v3179_v41 = vld [vmem:[%s5814_s3 + $0x80] sm:$0xff]   ;;  %v3183_v46 = vld [vmem:[%s5814_s3 + $0x88] sm:$0xff]   ;;  %v3186_v51 = vld [vmem:[%s5814_s3 + $0xd0] sm:$0xff]  }
  0x26   : > { %v231_v49 = vld [vmem:[%s3706_s6 + $0x20] sm:$0xff]  ;;  %v232_v50 = vld [vmem:[%s3706_s6 + $0x28] sm:$0xff]  ;;  %v3187_v52 = vld [vmem:[%s5814_s3 + $0x90] sm:$0xff]   ;;  %p3466_p12 = pnand %p3465_p11, %p3600_p5 }
  0x27   : > { %v3188_v53 = vld [vmem:[%s5814_s3 + $0x58] sm:$0xff]   ;;  %v261_v56 = vpack.c.bf16 %v232_v50, %v231_v49  ;;  %v3192_v58 = vld [vmem:[%s5814_s3 + $0x60] sm:$0xff]   ;;  %v233_v60 = vld [vmem:[%s3706_s6 + $0x30] sm:$0xff]  ;;  %v309_v49 = vlaneseq }
  0x28   : > { %498 = vmatpush1.bf16.msra.mxu0 %v3156_v19  ;;  %691 = vmatpush1.bf16.msra.mxu1 %v3157_v20  ;;  %v3189_v54 = vld [vmem:[%s5814_s3 + $0x18] sm:$0xff]   ;;  %v3193_v59 = vld [vmem:[%s5814_s3 + $0x20] sm:$0xff]   ;;  %v3196_v0 = vld [vmem:[%s5814_s3 + $0x68] sm:$0xff]   ;;  %p3467_p13 = pneg %p3466_p12 }
  0x29   : > { %499 = vmatprep.subr.bf16.mxu0 %v3158_v21  ;;  %692 = vmatprep.subr.bf16.mxu1 %v3160_v22  ;;  %v3190_v55 = vld [vmem:[%s5814_s3 + $0xd8] sm:$0xff]   ;;  %v3194_v62 = vld [vmem:[%s5814_s3 + $0xe0] sm:$0xff]   ;;  %v3197_v1 = vld [vmem:[%s5814_s3 + $0x28] sm:$0xff]   ;;  %v310_v50 = vshrl.u32 %v309_v49, 7 }
  0x2a   : > { %v3191_v57 = vld [vmem:[%s5814_s3 + $0x98] sm:$0xff]   ;;  %v3195_v63 = vld [vmem:[%s5814_s3 + $0xa0] sm:$0xff]   ;;  %v3198_v3 = vld [vmem:[%s5814_s3 + $0xe8] sm:$0xff]  }
  0x2b   : > { %v234_v61 = vld [vmem:[%s3706_s6 + $0x38] sm:$0xff]  ;;  %v3199_v5 = vld [vmem:[%s5814_s3 + $0xa8] sm:$0xff]   ;;  %v3200_v6 = vld [vmem:[%s5814_s3 + $0x70] sm:$0xff]  }
  0x2c   : > { %500 = vmatpush1.bf16.msra.mxu0 %v3162_v23  ;;  %693 = vmatpush1.bf16.msra.mxu1 %v3163_v24  ;;  %v262_v4 = vpack.c.bf16 %v234_v61, %v233_v60  ;;  %v235_v7 = vld [vmem:[%s3706_s6 + $0x40] sm:$0xff]  ;;  %v236_v8 = vld [vmem:[%s3706_s6 + $0x48] sm:$0xff]  ;;  %v237_v10 = vld [vmem:[%s3706_s6 + $0x50] sm:$0xff] }
  0x2d   : > { %501 = vmatprep.subr.bf16.mxu0 %v3164_v25  ;;  %694 = vmatprep.subr.bf16.mxu1 %v3166_v26  ;;  %v263_v9 = vpack.c.bf16 %v236_v8, %v235_v7  ;;  %v238_v11 = vld [vmem:[%s3706_s6 + $0x58] sm:$0xff]  ;;  %v239_v13 = vld [vmem:[%s3706_s6 + $0x60] sm:$0xff]  ;;  %v240_v14 = vld [vmem:[%s3706_s6 + $0x68] sm:$0xff] }
  0x2e   : > { %v264_v12 = vpack.c.bf16 %v238_v11, %v237_v10  ;;  %v265_v15 = vpack.c.bf16 %v240_v14, %v239_v13  ;;  %v241_v16 = vld [vmem:[%s3706_s6 + $0x70] sm:$0xff]  ;;  %v242_v17 = vld [vmem:[%s3706_s6 + $0x78] sm:$0xff]  ;;  %v243_v19 = vld [vmem:[%s3706_s6 + $0x80] sm:$0xff] }
  0x2f   : > { %v266_v18 = vpack.c.bf16 %v242_v17, %v241_v16  ;;  %v244_v20 = vld [vmem:[%s3706_s6 + $0x88] sm:$0xff]  ;;  %v245_v22 = vld [vmem:[%s3706_s6 + $0x90] sm:$0xff]  ;;  %v246_v23 = vld [vmem:[%s3706_s6 + $0x98] sm:$0xff] }
  0x30   : > { %502 = vmatpush1.bf16.msra.mxu0 %v3168_v27  ;;  %695 = vmatpush1.bf16.msra.mxu1 %v3169_v28  ;;  %v267_v21 = vpack.c.bf16 %v244_v20, %v243_v19  ;;  %v268_v24 = vpack.c.bf16 %v246_v23, %v245_v22  ;;  %v247_v25 = vld [vmem:[%s3706_s6 + $0xa0] sm:$0xff]  ;;  %v248_v26 = vld [vmem:[%s3706_s6 + $0xa8] sm:$0xff]  ;;  %v249_v28 = vld [vmem:[%s3706_s6 + $0xb0] sm:$0xff] }
  0x31   : > { %503 = vmatprep.subr.bf16.mxu0 %v3170_v29  ;;  %696 = vmatprep.subr.bf16.mxu1 %v3172_v30  ;;  %v269_v27 = vpack.c.bf16 %v248_v26, %v247_v25  ;;  %v250_v29 = vld [vmem:[%s3706_s6 + $0xb8] sm:$0xff]  ;;  %v253_v34 = vld [vmem:[%s3706_s6 + $0xd0] sm:$0xff] }
  0x32   : > { %v270_v30 = vpack.c.bf16 %v250_v29, %v249_v28  ;;  %v3202_v39 = vld [vmem:[%s5814_s3 + $0xf0] sm:$0xff]  }
  0x33   : > { %v3201_v40 = vld [vmem:[%s5814_s3 + $0x30] sm:$0xff]  }
  0x34   : > { %504 = vmatpush1.bf16.msra.mxu0 %v3174_v31  ;;  %697 = vmatpush1.bf16.msra.mxu1 %v3175_v32  ;;  %v251_v31 = vld [vmem:[%s3706_s6 + $0xc0] sm:$0xff]  ;;  %v252_v32 = vld [vmem:[%s3706_s6 + $0xc8] sm:$0xff] }
  0x35   : > { %2862 = vmatprep.subr.bf16.mxu0 %v3176_v36  ;;  %2974 = vmatprep.subr.bf16.mxu1 %v3178_v38  ;;  %v271_v33 = vpack.c.bf16 %v252_v32, %v251_v31  ;;  %v256_v38 = vld [vmem:[%s3706_s6 + $0xe8] sm:$0xff] }
  0x37   : > { %522 = vmatmul.mubr.bf16.vlgmr.msra.gmra.mrb[0].mxu0 %v259_v35  ;;  %715 = vmatmul.mubr.bf16.vlgmr.msra.gmra.mrb[0].mxu1 %v259_v35  ;;  %v254_v35 = vld [vmem:[%s3706_s6 + $0xd8] sm:$0xff] }
  0x38   : > { %531 = vmatprep.mubr.bf16.mxu0 %v3528_v2  ;;  %724 = vmatprep.mubr.bf16.mxu1 %v3528_v2  ;;  %v272_v36 = vpack.c.bf16 %v254_v35, %v253_v34 }
  0x39   : > { %2863 = vmatpush3.bf16.msra.mxu0 %v3177_v37  ;;  %2975 = vmatpush3.bf16.msra.mxu1 %v3179_v41  ;;  %v255_v37 = vld [vmem:[%s3706_s6 + $0xe0] sm:$0xff] }
  0x3a   : > { %2864 = vmatprep.subr.bf16.mxu0 %v3180_v42  ;;  %2976 = vmatprep.subr.bf16.mxu1 %v3182_v44  ;;  %v273_v41 = vpack.c.bf16 %v256_v38, %v255_v37  ;;  %v3203_v42 = vld [vmem:[%s5814_s3 + $0xb0] sm:$0xff]   ;;  %v258_v44 = vld [vmem:[%s3706_s6 + $0xf8] sm:$0xff] }
  0x3d   : > { %2865 = vmatpush3.bf16.msra.mxu0 %v3181_v43  ;;  %2977 = vmatpush3.bf16.msra.mxu1 %v3183_v46  ;;  %v257_v43 = vld [vmem:[%s3706_s6 + $0xf0] sm:$0xff]  ;;  %v3204_v46 = vld [vmem:[%s5814_s3 + $0x78] sm:$0xff]   ;;  %s3468_s6 = sshll.u32 %s3529_s12, 4  ;;  %s3469_s6 = int_to_ptr.vmem [resolvable:$false] %s3468_s6 }
  0x3e   : > { %2866 = vmatprep.subr.bf16.mxu0 %v3184_v47  ;;  %2978 = vmatprep.subr.bf16.mxu1 %v3186_v51  ;;  %v3205_v47 = vld [vmem:[%s5814_s3 + $0x38] sm:$0xff]   ;;  %v311_v51 = vsub.s32 0, %v310_v50  ;;  %s3470_s13 = scalar_lea.vmem %s3469_s6, 8192  ;;  %p3471_p0 = scmp.lt.s32.totalorder %s5764_s7, %s3469_s6 }
  0x3f   : > { %532 = vmatmul.mubr.bf16.gmra.mrb[4].mxu0 %v260_v45  ;;  %725 = vmatmul.mubr.bf16.gmra.mrb[4].mxu1 %v260_v45  ;;  %v274_v45 = vpack.c.bf16 %v258_v44, %v257_v43  ;;  %p3472_p1 = scmp.lt.s32.totalorder %s3470_s13, %s3464_s11 }
  0x40   : > { %541 = vmatprep.mubr.bf16.mxu0 %v3528_v2  ;;  %734 = vmatprep.mubr.bf16.mxu1 %v3528_v2 }
  0x41   : > { %2867 = vmatpush3.bf16.msra.mxu0 %v3185_v48  ;;  %2979 = vmatpush3.bf16.msra.mxu1 %v3187_v52  ;;  %v3207_v48 = vld [vmem:[%s5814_s3 + $0xb8] sm:$0xff]   ;;  %v319_v52 = vsub.s32 2, %v310_v50  ;;  %p3473_p2 = por %p3472_p1, %p3471_p0 }
  0x42   : > { %2868 = vmatprep.subr.bf16.mxu0 %v3188_v53  ;;  %2980 = vmatprep.subr.bf16.mxu1 %v3190_v55  ;;  %v307_v53 = vld [vmem:[%s5813_s2] sm:$0xf]  ;;  %v323_v55 = vsub.s32 3, %v310_v50 }
  0x43   : > { %p3474_p3 = pnand %p3473_p2, %p3467_p13 }
  0x45   : > { %2869 = vmatpush3.bf16.msra.mxu0 %v3189_v54  ;;  %2981 = vmatpush3.bf16.msra.mxu1 %v3191_v57  ;;  %v315_v54 = vsub.s32 1, %v310_v50  ;;  %v3877_v57 = vrot.slane %v307_v53, %v319_v52 }
  0x46   : > { %2870 = vmatprep.subr.bf16.mxu0 %v3192_v58  ;;  %2982 = vmatprep.subr.bf16.mxu1 %v3194_v62 }
  0x47   : > { %542 = vmatmul.mubr.bf16.gmra.mrb[8].mxu0 %v261_v56  ;;  %735 = vmatmul.mubr.bf16.gmra.mrb[8].mxu1 %v261_v56  ;;  %v3875_v56 = vrot.slane %v307_v53, %v311_v51  ;;  %v3879_v58 = vrot.slane %v307_v53, %v315_v54 }
  0x48   : > { %551 = vmatprep.mubr.bf16.mxu0 %v3528_v2  ;;  %744 = vmatprep.mubr.bf16.mxu1 %v3528_v2 }
  0x49   : > { %2871 = vmatpush3.bf16.msra.mxu0 %v3193_v59  ;;  %2983 = vmatpush3.bf16.msra.mxu1 %v3195_v63  ;;  %v3881_v59 = vrot.slane %v307_v53, %v323_v55 }
  0x4a   : > { %2872 = vmatprep.subr.bf16.mxu0 %v3196_v0  ;;  %2984 = vmatprep.subr.bf16.mxu1 %v3198_v3 }
  0x4d   : > { %2873 = vmatpush3.bf16.msra.mxu0 %v3197_v1  ;;  %2985 = vmatpush3.bf16.msra.mxu1 %v3199_v5 }
  0x4e   : > { %2874 = vmatprep.subr.bf16.mxu0 %v3200_v6  ;;  %2986 = vmatprep.subr.bf16.mxu1 %v3202_v39 }
  0x4f   : > { %552 = vmatmul.mubr.bf16.gmra.mrb[12].mxu0 %v262_v4  ;;  %745 = vmatmul.mubr.bf16.gmra.mrb[12].mxu1 %v262_v4 }
  0x50   : > { %561 = vmatprep.mubr.bf16.mxu0 %v3528_v2  ;;  %754 = vmatprep.mubr.bf16.mxu1 %v3528_v2 }
  0x51   : > { %2875 = vmatpush3.bf16.msra.mxu0 %v3201_v40  ;;  %2987 = vmatpush3.bf16.msra.mxu1 %v3203_v42 }
  0x52   : > { %2876 = vmatprep.subr.bf16.mxu0 %v3204_v46 }
  0x55   : > { %2877 = vmatpush3.bf16.msra.mxu0 %v3205_v47 }
  0x57   : > { %562 = vmatmul.mubr.bf16.gmra.mrb[16].mxu0 %v263_v9  ;;  %755 = vmatmul.mubr.bf16.gmra.mrb[16].mxu1 %v263_v9 }
  0x58   : > { %571 = vmatprep.mubr.bf16.mxu0 %v3528_v2  ;;  %764 = vmatprep.mubr.bf16.mxu1 %v3528_v2 }
  0x5f   : > { %572 = vmatmul.mubr.bf16.gmra.mrb[20].mxu0 %v264_v12  ;;  %765 = vmatmul.mubr.bf16.gmra.mrb[20].mxu1 %v264_v12 }
  0x60   : > { %581 = vmatprep.mubr.bf16.mxu0 %v3528_v2  ;;  %774 = vmatprep.mubr.bf16.mxu1 %v3528_v2 }
  0x67   : > { %582 = vmatmul.mubr.bf16.gmra.mrb[24].mxu0 %v265_v15  ;;  %775 = vmatmul.mubr.bf16.gmra.mrb[24].mxu1 %v265_v15 }
  0x68   : > { %591 = vmatprep.mubr.bf16.mxu0 %v3528_v2  ;;  %784 = vmatprep.mubr.bf16.mxu1 %v3528_v2 }
  0x6f   : > { %592 = vmatmul.mubr.bf16.gmra.mrb[28].mxu0 %v266_v18  ;;  %785 = vmatmul.mubr.bf16.gmra.mrb[28].mxu1 %v266_v18 }
  0x70   : > { %601 = vmatprep.mubr.bf16.mxu0 %v3528_v2  ;;  %794 = vmatprep.mubr.bf16.mxu1 %v3528_v2 }
  0x77   : > { %602 = vmatmul.mubr.bf16.gmra.mrb[32].mxu0 %v267_v21  ;;  %795 = vmatmul.mubr.bf16.gmra.mrb[32].mxu1 %v267_v21 }
  0x78   : > { %611 = vmatprep.mubr.bf16.mxu0 %v3528_v2  ;;  %804 = vmatprep.mubr.bf16.mxu1 %v3528_v2 }
  0x7f   : > { %612 = vmatmul.mubr.bf16.gmra.mrb[36].mxu0 %v268_v24  ;;  %805 = vmatmul.mubr.bf16.gmra.mrb[36].mxu1 %v268_v24 }
  0x80   : > { %621 = vmatprep.mubr.bf16.mxu0 %v3528_v2  ;;  %814 = vmatprep.mubr.bf16.mxu1 %v3528_v2 }
  0x87   : > { %622 = vmatmul.mubr.bf16.gmra.mrb[40].mxu0 %v269_v27  ;;  %815 = vmatmul.mubr.bf16.gmra.mrb[40].mxu1 %v269_v27 }
  0x88   : > { %631 = vmatprep.mubr.bf16.mxu0 %v3528_v2  ;;  %824 = vmatprep.mubr.bf16.mxu1 %v3528_v2 }
  0x8f   : > { %632 = vmatmul.mubr.bf16.gmra.mrb[44].mxu0 %v270_v30  ;;  %825 = vmatmul.mubr.bf16.gmra.mrb[44].mxu1 %v270_v30 }
  0x90   : > { %641 = vmatprep.mubr.bf16.mxu0 %v3528_v2  ;;  %834 = vmatprep.mubr.bf16.mxu1 %v3528_v2 }
  0x97   : > { %642 = vmatmul.mubr.bf16.gmra.mrb[48].mxu0 %v271_v33  ;;  %835 = vmatmul.mubr.bf16.gmra.mrb[48].mxu1 %v271_v33 }
  0x98   : > { %651 = vmatprep.mubr.bf16.mxu0 %v3528_v2  ;;  %844 = vmatprep.mubr.bf16.mxu1 %v3528_v2 }
  0x9f   : > { %652 = vmatmul.mubr.bf16.gmra.mrb[52].mxu0 %v272_v36  ;;  %845 = vmatmul.mubr.bf16.gmra.mrb[52].mxu1 %v272_v36 }
  0xa0   : > { %661 = vmatprep.mubr.bf16.mxu0 %v3528_v2  ;;  %854 = vmatprep.mubr.bf16.mxu1 %v3528_v2 }
  0xa7   : > { %662 = vmatmul.mubr.bf16.gmra.mrb[56].mxu0 %v273_v41  ;;  %855 = vmatmul.mubr.bf16.gmra.mrb[56].mxu1 %v273_v41 }
  0xa8   : > { %671 = vmatprep.mubr.bf16.mxu0 %v3528_v2  ;;  %864 = vmatprep.mubr.bf16.mxu1 %v3528_v2  ;;  %v3206_v2 = vld [vmem:[%s5814_s3 + $0xf8] sm:$0xff]  }
  0xa9   : > { %2988 = vmatprep.subr.bf16.mxu1 %v3206_v2 }
  0xaa   : > { %2989 = vmatpush3.bf16.msra.mxu1 %v3207_v48 }
  0xaf   : > { %672 = vmatmul.mubr.bf16.gmra.mrb[60].mxu0 %v274_v45  ;;  %865 = vmatmul.mubr.bf16.gmra.mrb[60].mxu1 %v274_v45 }
 0x10a   : > { %v523_v60 = vpop.f32.mrb[0].mxu0  ;;  %v716_v61 = vpop.f32.mrb[0].mxu1 }
 0x10b   : > { %v524_v62 = vadd.f32 %v523_v60, %v3875_v56  ;;  %v717_v63 = vadd.f32 %v716_v61, %v3877_v57  ;;  %v525_v0 = vpop.f32.mrb[1].mxu0  ;;  %v718_v1 = vpop.f32.mrb[1].mxu1 }
 0x10c   : > { %v3886_v3 = vadd.f32 %v525_v0, %v3879_v58  ;;  %v3889_v4 = vadd.f32 %v718_v1, %v3881_v59  ;;  %v527_v5 = vpop.f32.mrb[2].mxu0  ;;  %v720_v6 = vpop.f32.mrb[2].mxu1 }
 0x10d   : > { %v1003_v7 = vmul.f32 0.044715, %v524_v62  ;;  %v875_v8 = vmul.f32 0.7978846, %v524_v62  ;;  %v1005_v9 = vmul.f32 0.044715, %v717_v63  ;;  %v528_v10 = vadd.f32 %v527_v5, %v3875_v56 }
 0x10e   : > { %v3892_v12 = vmul.f32 0.5, %v524_v62  ;;  %v1004_v13 = vmul.f32 0.044715, %v3886_v3  ;;  %v1006_v14 = vmul.f32 0.044715, %v3889_v4  ;;  %v3896_v17 = vmul.f32 0.5, %v717_v63 }
 0x10f   : > { %v1131_v11 = vmul.f32 %v1003_v7, %v524_v62  ;;  %v877_v15 = vmul.f32 0.7978846, %v717_v63  ;;  %v1133_v16 = vmul.f32 %v1005_v9, %v717_v63  ;;  %v1007_v18 = vmul.f32 0.044715, %v528_v10  ;;  %v529_v19 = vpop.f32.mrb[3].mxu0  ;;  %v722_v24 = vpop.f32.mrb[3].mxu1 }
 0x110   : > { %v1132_v21 = vmul.f32 %v1004_v13, %v3886_v3  ;;  %v1134_v22 = vmul.f32 %v1006_v14, %v3889_v4  ;;  %v721_v23 = vadd.f32 %v720_v6, %v3877_v57  ;;  %v876_v26 = vmul.f32 0.7978846, %v3886_v3 }
 0x111   : > { %v1259_v20 = vadd.f32 1.0, %v1131_v11  ;;  %v1261_v25 = vadd.f32 1.0, %v1133_v16  ;;  %v1135_v27 = vmul.f32 %v1007_v18, %v528_v10  ;;  %v3903_v28 = vadd.f32 %v529_v19, %v3879_v58 }
 0x112   : > { %v533_v29 = vpop.f32.mrb[4].mxu0  ;;  %v726_v30 = vpop.f32.mrb[4].mxu1  ;;  %v878_v32 = vmul.f32 0.7978846, %v3889_v4  ;;  %v879_v33 = vmul.f32 0.7978846, %v528_v10  ;;  %v3907_v34 = vadd.f32 %v722_v24, %v3881_v59 }
 0x113   : > { %v1387_v31 = vmul.f32 %v1259_v20, %v875_v8  ;;  %v535_v35 = vpop.f32.mrb[5].mxu0  ;;  %v728_v36 = vpop.f32.mrb[5].mxu1  ;;  %v1389_v37 = vmul.f32 %v1261_v25, %v877_v15  ;;  %v1263_v38 = vadd.f32 1.0, %v1135_v27  ;;  %v3909_v39 = vmul.f32 0.5, %v528_v10 }
 0x114   : > { %v1009_v40 = vmul.f32 0.044715, %v721_v23  ;;  %v537_v41 = vpop.f32.mrb[6].mxu0  ;;  %v730_v42 = vpop.f32.mrb[6].mxu1  ;;  %v1260_v43 = vadd.f32 1.0, %v1132_v21  ;;  %v1262_v44 = vadd.f32 1.0, %v1134_v22  ;;  %v3918_v52 = vadd.f32 %v533_v29, %v3875_v56 }
 0x115   : > { %3208 = vtanh.f32 %v1387_v31  ;;  %v881_v45 = vmul.f32 0.7978846, %v721_v23  ;;  %v539_v46 = vpop.f32.mrb[7].mxu0  ;;  %v3911_v47 = vpop.f32.mrb[7].mxu1  ;;  %v1391_v2 = vmul.f32 %v1263_v38, %v879_v33  ;;  %v1008_v49 = vmul.f32 0.044715, %v3903_v28 }
 0x116   : > { %3210 = vtanh.f32 %v1389_v37  ;;  %v1137_v48 = vmul.f32 %v1009_v40, %v721_v23  ;;  %v3914_v50 = vmul.f32 0.5, %v721_v23  ;;  %v1010_v51 = vmul.f32 0.044715, %v3907_v34  ;;  %5902 = vst [vmem:[#allocation5_spill] sm:$0xff] %v3918_v52 }
 0x117   : > { %v3921_v53 = vadd.f32 %v726_v30, %v3877_v57  ;;  %3212 = vtanh.f32 %v1391_v2  ;;  %v1136_v55 = vmul.f32 %v1008_v49, %v3903_v28  ;;  %v3925_v60 = vadd.f32 %v535_v35, %v3879_v58 }
 0x118   : > { %v1265_v54 = vadd.f32 1.0, %v1137_v48  ;;  %v3927_v61 = vmul.f32 %v1260_v43, %v876_v26  ;;  %v880_v62 = vmul.f32 0.7978846, %v3903_v28  ;;  %v1138_v63 = vmul.f32 %v1010_v51, %v3907_v34 }
 0x119   : > { %5903 = vst [vmem:[#allocation6_spill] sm:$0xff] %v3921_v53  ;;  %v1011_v0 = vmul.f32 0.044715, %v3918_v52  ;;  %v1264_v5 = vadd.f32 1.0, %v1136_v55  ;;  %v882_v6 = vmul.f32 0.7978846, %v3907_v34  ;;  %v3937_v13 = vadd.f32 %v728_v36, %v3881_v59 }
 0x11a   : > { %v1393_v1 = vmul.f32 %v1265_v54, %v881_v45  ;;  %v1013_v7 = vmul.f32 0.044715, %v3921_v53  ;;  %v543_v8 = vpop.f32.mrb[8].mxu0  ;;  %v1266_v9 = vadd.f32 1.0, %v1138_v63  ;;  %v1012_v11 = vmul.f32 0.044715, %v3925_v60 }
 0x11b   : > { %v1139_v10 = vmul.f32 %v1011_v0, %v3918_v52  ;;  %v736_v14 = vpop.f32.mrb[8].mxu1  ;;  %v545_v15 = vpop.f32.mrb[9].mxu0  ;;  %v883_v16 = vmul.f32 0.7978846, %v3918_v52  ;;  %v3942_v19 = vadd.f32 %v537_v41, %v3875_v56  ;;  %v3948_v22 = vmul.f32 %v1262_v44, %v878_v32 }
 0x11c   : > { %3214 = vtanh.f32 %v1393_v1  ;;  %v1141_v18 = vmul.f32 %v1013_v7, %v3921_v53  ;;  %v3944_v20 = vpop.f32.mrb[9].mxu1  ;;  %v3946_v21 = vpop.f32.mrb[10].mxu0  ;;  %v885_v24 = vmul.f32 0.7978846, %v3921_v53  ;;  %v1140_v25 = vmul.f32 %v1012_v11, %v3925_v60 }
 0x11d   : > { %5904 = vst [vmem:[#allocation7_spill] sm:$0xff] %v3942_v19  ;;  %v1267_v23 = vadd.f32 1.0, %v1139_v10  ;;  %v3952_v26 = vpop.f32.mrb[10].mxu1  ;;  %v3954_v27 = vpop.f32.mrb[11].mxu0  ;;  %v884_v30 = vmul.f32 0.7978846, %v3925_v60  ;;  %v3959_v33 = vadd.f32 %v730_v42, %v3877_v57  ;;  %v3963_v36 = vmul.f32 %v1264_v5, %v880_v62 }
 0x11e   : > { %v1269_v29 = vadd.f32 1.0, %v1141_v18  ;;  %v1014_v31 = vmul.f32 0.044715, %v3937_v13  ;;  %v3961_v35 = vpop.f32.mrb[11].mxu1  ;;  %v3965_v37 = vmul.f32 %v1266_v9, %v882_v6  ;;  %v1015_v38 = vmul.f32 0.044715, %v3942_v19 }
 0x11f   : > { %5905 = vst [vmem:[#allocation8_spill] sm:$0xff] %v3959_v33  ;;  %v3209_v32 = vpop.eup %3208  ;;  %v3969_v40 = vadd.f32 %v539_v46, %v3879_v58  ;;  %v1268_v43 = vadd.f32 1.0, %v1140_v25  ;;  %v886_v44 = vmul.f32 0.7978846, %v3937_v13  ;;  %v887_v42 = vmul.f32 0.7978846, %v3942_v19 }
 0x120   : > { %v3211_v41 = vpop.eup %3210  ;;  %v1142_v45 = vmul.f32 %v1014_v31, %v3937_v13  ;;  %v1771_v2 = vadd.f32 1.0, %v3209_v32  ;;  %v3974_v48 = vmul.f32 %v1267_v23, %v883_v16  ;;  %v1143_v49 = vmul.f32 %v1015_v38, %v3942_v19 }
 0x121   : > { %v1017_v51 = vmul.f32 0.044715, %v3959_v33  ;;  %v3213_v54 = vpop.eup %3212  ;;  %v1773_v55 = vadd.f32 1.0, %v3211_v41  ;;  %v3978_v62 = vmul.f32 %v1269_v29, %v885_v24  ;;  %v1016_v63 = vmul.f32 0.044715, %v3969_v40 }
 0x122   : > { %5906 = vst [vmem:[#allocation9_spill] sm:$0xff] %v3974_v48  ;;  %v1270_v46 = vadd.f32 1.0, %v1142_v45  ;;  %v3981_v0 = vpop.f32.mrb[12].mxu0  ;;  %v1775_v1 = vadd.f32 1.0, %v3213_v54  ;;  %v1271_v5 = vadd.f32 1.0, %v1143_v49  ;;  %v3985_v9 = vpop.f32.mrb[12].mxu1  ;;  %v3989_v11 = vmul.f32 %v1268_v43, %v884_v30 }
 0x123   : > { %5907 = vst [vmem:[#allocation10_spill] sm:$0xff] %v3978_v62  ;;  %v889_v6 = vmul.f32 0.7978846, %v3959_v33  ;;  %v1145_v7 = vmul.f32 %v1017_v51, %v3959_v33  ;;  %v3987_v10 = vpop.f32.mrb[13].mxu0  ;;  %v1144_v16 = vmul.f32 %v1016_v63, %v3969_v40  ;;  %v3994_v18 = vadd.f32 %v3911_v47, %v3881_v59  ;;  %v3999_v24 = vpop.f32.mrb[13].mxu1 }
 0x124   : > { %v3997_v23 = vadd.f32 %v543_v8, %v3875_v56  ;;  %v4001_v25 = vpop.f32.mrb[14].mxu0  ;;  %v4004_v29 = vmul.f32 %v1771_v2, %v3892_v12  ;;  %v888_v30 = vmul.f32 0.7978846, %v3969_v40  ;;  %v4008_v32 = vadd.f32 %v736_v14, %v3877_v57  ;;  %v4010_v38 = vpop.f32.mrb[14].mxu1 }
 0x125   : > { %v1273_v31 = vadd.f32 1.0, %v1145_v7  ;;  %v4012_v47 = vpop.f32.mrb[15].mxu0  ;;  %v4015_v8 = vmul.f32 %v1773_v55, %v3896_v17  ;;  %v4017_v43 = vmul.f32 %v1270_v46, %v886_v44  ;;  %v1018_v45 = vmul.f32 0.044715, %v3994_v18  ;;  %v4023_v2 = vpop.f32.mrb[15].mxu1 }
 0x126   : > { %5908 = vst [vmem:[#allocation11_spill] sm:$0xff] %v3997_v23  ;;  %5909 = vst [vmem:[#allocation12_spill] sm:$0xff] %v4008_v32  ;;  %v3215_v41 = vpop.eup %3214  ;;  %v4021_v12 = vadd.f32 %v545_v15, %v3879_v58  ;;  %v4026_v14 = vmul.f32 %v1775_v1, %v3909_v39  ;;  %v4028_v49 = vmul.f32 %v1271_v5, %v887_v42  ;;  %v1272_v51 = vadd.f32 1.0, %v1144_v16 }
 0x127   : > { %v1019_v54 = vmul.f32 0.044715, %v3997_v23  ;;  %v1777_v63 = vadd.f32 1.0, %v3215_v41  ;;  %v890_v17 = vmul.f32 0.7978846, %v3994_v18  ;;  %v1146_v44 = vmul.f32 %v1018_v45, %v3994_v18 }
 0x128   : > { %5910 = vst [vmem:[#allocation13_spill] sm:$0xff] %v4021_v12  ;;  %5911 = vst [vmem:[#allocation14_spill] sm:$0xff] %v4028_v49  ;;  %v1021_v55 = vmul.f32 0.044715, %v4008_v32  ;;  %v4034_v46 = vmul.f32 %v1273_v31, %v889_v6  ;;  %v891_v15 = vmul.f32 0.7978846, %v3997_v23  ;;  %v4042_v5 = vadd.f32 %v3944_v20, %v3881_v59 }
 0x129   : > { %v1147_v7 = vmul.f32 %v1019_v54, %v3997_v23  ;;  %v1020_v39 = vmul.f32 0.044715, %v4021_v12  ;;  %v1274_v42 = vadd.f32 1.0, %v1146_v44  ;;  %v4046_v16 = vadd.f32 %v3946_v21, %v3875_v56 }
 0x12a   : > { %5912 = vst [vmem:[#allocation15_spill] sm:$0xff] %v4034_v46  ;;  %v1149_v1 = vmul.f32 %v1021_v55, %v4008_v32  ;;  %5913 = vst [vmem:[#allocation16_spill] sm:$0xff] %v4042_v5  ;;  %v4048_v41 = vpop.f32.mrb[16].mxu0  ;;  %v4050_v6 = vpop.f32.mrb[16].mxu1  ;;  %v893_v31 = vmul.f32 0.7978846, %v4008_v32  ;;  %v4056_v54 = vadd.f32 %v3952_v26, %v3877_v57  ;;  %v4060_v20 = vadd.f32 %v3954_v27, %v3879_v58 }
 0x12b   : > { %5914 = vst [vmem:[#allocation17_spill] sm:$0xff] %v4046_v16  ;;  %v1148_v45 = vmul.f32 %v1020_v39, %v4021_v12  ;;  %v4062_v44 = vpop.f32.mrb[17].mxu0  ;;  %v4064_v21 = vpop.f32.mrb[17].mxu1  ;;  %v4067_v55 = vmul.f32 %v1777_v63, %v3914_v50  ;;  %v4069_v23 = vmul.f32 %v1272_v51, %v888_v30  ;;  %v892_v32 = vmul.f32 0.7978846, %v4021_v12 }
 0x12c   : > { %5915 = vst [vmem:[#allocation18_spill] sm:$0xff] %v4056_v54  ;;  %5916 = vst [vmem:[#allocation19_spill] sm:$0xff] %v4060_v20  ;;  %v1022_v39 = vmul.f32 0.044715, %v4042_v5  ;;  %v4073_v33 = vpop.f32.mrb[18].mxu0  ;;  %v4075_v26 = vmul.f32 %v1274_v42, %v890_v17  ;;  %v1275_v53 = vadd.f32 1.0, %v1147_v7  ;;  %3216 = vtanh.f32 %v3927_v61 }
 0x12d   : > { %v894_v27 = vmul.f32 0.7978846, %v4042_v5  ;;  %v1023_v19 = vmul.f32 0.044715, %v4046_v16  ;;  %v4079_v46 = vpop.f32.mrb[18].mxu1  ;;  %v1277_v62 = vadd.f32 1.0, %v1149_v1  ;;  %3218 = vtanh.f32 %v3963_v36 }
 0x12e   : > { %5917 = vst [vmem:[#allocation20_spill] sm:$0xff] %v4075_v26  ;;  %v1276_v50 = vadd.f32 1.0, %v1148_v45  ;;  %v1150_v30 = vmul.f32 %v1022_v39, %v4042_v5  ;;  %v1025_v51 = vmul.f32 0.044715, %v4056_v54  ;;  %v4083_v63 = vpop.f32.mrb[19].mxu0  ;;  %v4085_v12 = vpop.f32.mrb[19].mxu1  ;;  %v4094_v45 = vadd.f32 %v3961_v35, %v3881_v59 }
 0x12f   : > { %v895_v17 = vmul.f32 0.7978846, %v4046_v16  ;;  %v1151_v7 = vmul.f32 %v1023_v19, %v4046_v16  ;;  %v897_v42 = vmul.f32 0.7978846, %v4056_v54  ;;  %v1024_v49 = vmul.f32 0.044715, %v4060_v20 }
 0x130   : > { %v1278_v48 = vadd.f32 1.0, %v1150_v30  ;;  %v1153_v1 = vmul.f32 %v1025_v51, %v4056_v54  ;;  %5918 = vst [vmem:[#allocation21_spill] sm:$0xff] %v4094_v45  ;;  %v4098_v39 = vadd.f32 %v3981_v0, %v3875_v56  ;;  %v4103_v19 = vadd.f32 %v3985_v9, %v3877_v57 }
 0x131   : > { %v1279_v5 = vadd.f32 1.0, %v1151_v7  ;;  %v1152_v52 = vmul.f32 %v1024_v49, %v4060_v20  ;;  %v4107_v30 = vadd.f32 %v3987_v10, %v3879_v58  ;;  %v4109_v51 = vmul.f32 %v1275_v53, %v891_v15 }
 0x132   : > { %5919 = vst [vmem:[#allocation22_spill] sm:$0xff] %v4098_v39  ;;  %5920 = vst [vmem:[#allocation23_spill] sm:$0xff] %v4103_v19  ;;  %v4111_v54 = vmul.f32 %v1277_v62, %v893_v31  ;;  %v896_v35 = vmul.f32 0.7978846, %v4060_v20  ;;  %v1026_v0 = vmul.f32 0.044715, %v4094_v45  ;;  %v4117_v7 = vmul.f32 %v1276_v50, %v892_v32 }
 0x133   : > { %5921 = vst [vmem:[#allocation24_spill] sm:$0xff] %v4107_v30  ;;  %5922 = vst [vmem:[#allocation25_spill] sm:$0xff] %v4109_v51  ;;  %v4115_v16 = vpop.f32.mrb[20].mxu0  ;;  %v4119_v49 = vmul.f32 %v1278_v48, %v894_v27  ;;  %v898_v9 = vmul.f32 0.7978846, %v4094_v45  ;;  %v4123_v10 = vpop.f32.mrb[20].mxu1  ;;  %v4131_v32 = vmul.f32 %v1279_v5, %v895_v17  ;;  %v4147_v5 = vadd.f32 %v4001_v25, %v3875_v56 }
 0x134   : > { %5923 = vst [vmem:[#allocation26_spill] sm:$0xff] %v4111_v54  ;;  %5924 = vst [vmem:[#allocation27_spill] sm:$0xff] %v4117_v7  ;;  %v1027_v26 = vmul.f32 0.044715, %v4098_v39  ;;  %v1281_v53 = vadd.f32 1.0, %v1153_v1  ;;  %v1280_v15 = vadd.f32 1.0, %v1152_v52  ;;  %v1154_v62 = vmul.f32 %v1026_v0, %v4094_v45 }
 0x135   : > { %5925 = vst [vmem:[#allocation28_spill] sm:$0xff] %v4119_v49  ;;  %v1029_v31 = vmul.f32 0.044715, %v4103_v19  ;;  %v4127_v54 = vpop.f32.mrb[21].mxu0  ;;  %v4129_v51 = vpop.f32.mrb[21].mxu1  ;;  %5926 = vst [vmem:[#allocation29_spill] sm:$0xff] %v4131_v32  ;;  %v4143_v45 = vadd.f32 %v3999_v24, %v3881_v59  ;;  %3220 = vtanh.f32 %v3948_v22 }
 0x136   : > { %v899_v48 = vmul.f32 0.7978846, %v4098_v39  ;;  %v1155_v27 = vmul.f32 %v1027_v26, %v4098_v39  ;;  %v1028_v50 = vmul.f32 0.044715, %v4107_v30  ;;  %v4136_v20 = vpop.f32.mrb[22].mxu0  ;;  %v4138_v1 = vpop.f32.mrb[22].mxu1  ;;  %v4162_v24 = vmul.f32 %v1281_v53, %v897_v42 }
 0x137   : > { %5927 = vst [vmem:[#allocation30_spill] sm:$0xff] %v4138_v1  ;;  %v1282_v52 = vadd.f32 1.0, %v1154_v62  ;;  %v1157_v0 = vmul.f32 %v1029_v31, %v4103_v19  ;;  %5928 = vst [vmem:[#allocation31_spill] sm:$0xff] %v4143_v45  ;;  %v4149_v17 = vpop.f32.mrb[23].mxu0  ;;  %v4151_v26 = vpop.f32.mrb[23].mxu1  ;;  %v4156_v62 = vadd.f32 %v4010_v38, %v3877_v57  ;;  %v4160_v31 = vadd.f32 %v4012_v47, %v3879_v58 }
 0x138   : > { %5929 = vst [vmem:[#allocation32_spill] sm:$0xff] %v4147_v5  ;;  %5930 = vst [vmem:[#allocation33_spill] sm:$0xff] %v4149_v17  ;;  %v1283_v39 = vadd.f32 1.0, %v1155_v27  ;;  %v1156_v32 = vmul.f32 %v1028_v50, %v4107_v30  ;;  %v901_v25 = vmul.f32 0.7978846, %v4103_v19  ;;  %v4166_v17 = vmul.f32 %v1280_v15, %v896_v35 }
 0x139   : > { %5931 = vst [vmem:[#allocation34_spill] sm:$0xff] %v4151_v26  ;;  %5932 = vst [vmem:[#allocation35_spill] sm:$0xff] %v4156_v62  ;;  %v1285_v49 = vadd.f32 1.0, %v1157_v0  ;;  %v1030_v7 = vmul.f32 0.044715, %v4143_v45  ;;  %v4171_v26 = vmul.f32 %v1282_v52, %v898_v9  ;;  %3222 = vtanh.f32 %v3965_v37 }
 0x13a   : > { %5933 = vst [vmem:[#allocation36_spill] sm:$0xff] %v4160_v31  ;;  %5934 = vst [vmem:[#allocation37_spill] sm:$0xff] %v4162_v24  ;;  %v900_v27 = vmul.f32 0.7978846, %v4107_v30  ;;  %v902_v50 = vmul.f32 0.7978846, %v4143_v45  ;;  %v4179_v19 = vmul.f32 %v1283_v39, %v899_v48  ;;  %v4242_v37 = vadd.f32 %v4062_v44, %v3879_v58 }
 0x13b   : > { %v1031_v38 = vmul.f32 0.044715, %v4147_v5  ;;  %v1284_v1 = vadd.f32 1.0, %v1156_v32  ;;  %v1158_v47 = vmul.f32 %v1030_v7, %v4143_v45  ;;  %v1033_v42 = vmul.f32 0.044715, %v4156_v62  ;;  %v4175_v53 = vpop.f32.mrb[24].mxu0 }
 0x13c   : > { %v4177_v0 = vpop.f32.mrb[24].mxu1  ;;  %5935 = vst [vmem:[#allocation38_spill] sm:$0xff] %v4179_v19  ;;  %v903_v35 = vmul.f32 0.7978846, %v4147_v5  ;;  %v1032_v30 = vmul.f32 0.044715, %v4160_v31  ;;  %v4188_v32 = vmul.f32 %v1285_v49, %v901_v25  ;;  %v4193_v45 = vadd.f32 %v4023_v2, %v3881_v59 }
 0x13d   : > { %v1159_v15 = vmul.f32 %v1031_v38, %v4147_v5  ;;  %v4184_v24 = vpop.f32.mrb[25].mxu0  ;;  %v4186_v9 = vpop.f32.mrb[25].mxu1  ;;  %v1286_v7 = vadd.f32 1.0, %v1158_v47  ;;  %v1161_v52 = vmul.f32 %v1033_v42, %v4156_v62  ;;  %v905_v5 = vmul.f32 0.7978846, %v4156_v62  ;;  %5945 = vst [vmem:[#allocation48_spill] sm:$0xff] %v4242_v37 }
 0x13e   : > { %5936 = vst [vmem:[#allocation39_spill] sm:$0xff] %v4188_v32  ;;  %5937 = vst [vmem:[#allocation40_spill] sm:$0xff] %v4193_v45  ;;  %v4195_v39 = vpop.f32.mrb[26].mxu0  ;;  %v4197_v48 = vpop.f32.mrb[26].mxu1  ;;  %v1160_v19 = vmul.f32 %v1032_v30, %v4160_v31  ;;  %v4206_v47 = vmul.f32 %v1284_v1, %v900_v27  ;;  %v904_v2 = vmul.f32 0.7978846, %v4160_v31  ;;  %3224 = vtanh.f32 %v3989_v11 }
 0x13f   : > { %v1287_v38 = vadd.f32 1.0, %v1159_v15  ;;  %v4202_v49 = vpop.f32.mrb[27].mxu0  ;;  %v4204_v25 = vpop.f32.mrb[27].mxu1  ;;  %v1034_v42 = vmul.f32 0.044715, %v4193_v45  ;;  %v4211_v32 = vmul.f32 0.5, %v3886_v3  ;;  %v4213_v15 = vmul.f32 %v1286_v7, %v902_v50 }
 0x140   : > { %5938 = vst [vmem:[#allocation41_spill] sm:$0xff] %v4202_v49  ;;  %5939 = vst [vmem:[#allocation42_spill] sm:$0xff] %v4204_v25  ;;  %v1289_v62 = vadd.f32 1.0, %v1161_v52  ;;  %v4216_v30 = vmul.f32 0.5, %v3903_v28  ;;  %v1288_v61 = vadd.f32 1.0, %v1160_v19  ;;  %v4227_v3 = vadd.f32 %v4048_v41, %v3875_v56 }
 0x141   : > { %5940 = vst [vmem:[#allocation43_spill] sm:$0xff] %v4206_v47  ;;  %5941 = vst [vmem:[#allocation44_spill] sm:$0xff] %v4213_v15  ;;  %v906_v25 = vmul.f32 0.7978846, %v4193_v45  ;;  %v1162_v1 = vmul.f32 %v1034_v42, %v4193_v45  ;;  %v4222_v27 = vmul.f32 %v1287_v38, %v903_v35  ;;  %v4231_v28 = vadd.f32 %v4050_v6, %v3877_v57 }
 0x142   : > { %5943 = vst [vmem:[#allocation46_spill] sm:$0xff] %v4227_v3  ;;  %v4234_v36 = vmul.f32 0.5, %v3889_v4  ;;  %v4244_v50 = vpop.f32.mrb[28].mxu0  ;;  %v4246_v41 = vpop.f32.mrb[28].mxu1  ;;  %v4248_v35 = vmul.f32 %v1289_v62, %v905_v5  ;;  %v1522_v6 = vmul.f32 0.5, %v3907_v34  ;;  %v4254_v7 = vadd.f32 %v4064_v21, %v3881_v59 }
 0x143   : > { %5942 = vst [vmem:[#allocation45_spill] sm:$0xff] %v4222_v27  ;;  %5944 = vst [vmem:[#allocation47_spill] sm:$0xff] %v4231_v28  ;;  %v1035_v4 = vmul.f32 0.044715, %v4227_v3  ;;  %v4256_v52 = vmul.f32 %v1288_v61, %v904_v2  ;;  %v1290_v38 = vadd.f32 1.0, %v1162_v1  ;;  %v4265_v34 = vadd.f32 %v4073_v33, %v3875_v56  ;;  %v4267_v19 = vpop.f32.mrb[29].mxu0  ;;  %v3217_v33 = vpop.eup %3216 }
 0x144   : > { %5946 = vst [vmem:[#allocation49_spill] sm:$0xff] %v4244_v50  ;;  %5947 = vst [vmem:[#allocation50_spill] sm:$0xff] %v4246_v41  ;;  %v1037_v44 = vmul.f32 0.044715, %v4231_v28  ;;  %v1036_v42 = vmul.f32 0.044715, %v4242_v37  ;;  %3226 = vtanh.f32 %v4069_v23  ;;  %v4360_v11 = vadd.f32 %v4123_v10, %v3877_v57 }
 0x145   : > { %5948 = vst [vmem:[#allocation51_spill] sm:$0xff] %v4248_v35  ;;  %5949 = vst [vmem:[#allocation52_spill] sm:$0xff] %v4254_v7  ;;  %v907_v22 = vmul.f32 0.7978846, %v4227_v3  ;;  %v1163_v5 = vmul.f32 %v1035_v4, %v4227_v3  ;;  %v1038_v62 = vmul.f32 0.044715, %v4254_v7  ;;  %v4276_v35 = vadd.f32 %v4079_v46, %v3877_v57 }
 0x146   : > { %5950 = vst [vmem:[#allocation53_spill] sm:$0xff] %v4256_v52  ;;  %5951 = vst [vmem:[#allocation54_spill] sm:$0xff] %v4265_v34  ;;  %v4269_v21 = vpop.f32.mrb[29].mxu1  ;;  %v909_v2 = vmul.f32 0.7978846, %v4231_v28  ;;  %v1165_v61 = vmul.f32 %v1037_v44, %v4231_v28  ;;  %v1164_v1 = vmul.f32 %v1036_v42, %v4242_v37  ;;  %v4278_v4 = vpop.f32.mrb[30].mxu0  ;;  %v4291_v28 = vadd.f32 %v4083_v63, %v3879_v58 }
 0x147   : > { %5952 = vst [vmem:[#allocation55_spill] sm:$0xff] %v4267_v19  ;;  %5953 = vst [vmem:[#allocation56_spill] sm:$0xff] %v4269_v21  ;;  %v4280_v3 = vpop.f32.mrb[30].mxu1  ;;  %v1291_v27 = vadd.f32 1.0, %v1163_v5  ;;  %v908_v19 = vmul.f32 0.7978846, %v4242_v37  ;;  %v1166_v21 = vmul.f32 %v1038_v62, %v4254_v7  ;;  %v3219_v5 = vpop.eup %3218  ;;  %3228 = vtanh.f32 %v4017_v43 }
 0x148   : > { %5954 = vst [vmem:[#allocation57_spill] sm:$0xff] %v4276_v35  ;;  %5955 = vst [vmem:[#allocation58_spill] sm:$0xff] %v4278_v4  ;;  %v1039_v41 = vmul.f32 0.044715, %v4265_v34  ;;  %v4285_v45 = vpop.f32.mrb[31].mxu0  ;;  %v1772_v44 = vadd.f32 1.0, %v3217_v33  ;;  %v3221_v50 = vpop.eup %3220  ;;  %v5968_v23 = vpack.c.bf16 %v4067_v55, %v4015_v8 }
 0x149   : > { %5956 = vst [vmem:[#allocation59_spill] sm:$0xff] %v4280_v3  ;;  %5957 = vst [vmem:[#allocation60_spill] sm:$0xff] %v4285_v45  ;;  %v910_v42 = vmul.f32 0.7978846, %v4254_v7  ;;  %v911_v46 = vmul.f32 0.7978846, %v4265_v34  ;;  %v4297_v45 = vmul.f32 %v1290_v38, %v906_v25  ;;  %v4299_v7 = vmul.f32 %v1291_v27, %v907_v22 }
 0x14a   : > { %v4293_v3 = vpop.f32.mrb[31].mxu1  ;;  %v1293_v4 = vadd.f32 1.0, %v1165_v61  ;;  %v1292_v37 = vadd.f32 1.0, %v1164_v1  ;;  %v1167_v62 = vmul.f32 %v1039_v41, %v4265_v34  ;;  %v1041_v31 = vmul.f32 0.044715, %v4276_v35  ;;  %v4302_v52 = vpop.f32.mrb[32].mxu0 }
 0x14b   : > { %5958 = vst [vmem:[#allocation61_spill] sm:$0xff] %v4293_v3  ;;  %v1776_v33 = vadd.f32 1.0, %v3219_v5  ;;  %5959 = vst [vmem:[#allocation62_spill] sm:$0xff] %v4299_v7  ;;  %v913_v15 = vmul.f32 0.7978846, %v4276_v35  ;;  %v4304_v63 = vpop.f32.mrb[32].mxu1  ;;  %v3223_v3 = vpop.eup %3222  ;;  %v1900_v25 = vmul.f32 %v1772_v44, %v4211_v32 }
 0x14c   : > { %v1774_v47 = vadd.f32 1.0, %v3221_v50  ;;  %v1294_v61 = vadd.f32 1.0, %v1166_v21  ;;  %v1295_v1 = vadd.f32 1.0, %v1167_v62  ;;  %v1169_v41 = vmul.f32 %v1041_v31, %v4276_v35  ;;  %v4307_v34 = vpop.f32.mrb[33].mxu0  ;;  %v4309_v49 = vpop.f32.mrb[33].mxu1  ;;  %5965 = vst [vmem:[#allocation67_spill] sm:$0xff] %v4360_v11 }
 0x14d   : > { %v1904_v27 = vmul.f32 %v1776_v33, %v4216_v30  ;;  %v1778_v22 = vadd.f32 1.0, %v3223_v3  ;;  %v1040_v38 = vmul.f32 0.044715, %v4291_v28  ;;  %v4314_v5 = vpop.f32.mrb[34].mxu0  ;;  %v4316_v7 = vmul.f32 %v1293_v4, %v909_v2  ;;  %v4324_v62 = vpop.f32.mrb[34].mxu1  ;;  %v5972_v8 = vld [vmem:[#allocation9_spill] sm:$0xff] }
 0x14e   : > { %v4318_v50 = vmul.f32 %v1292_v37, %v908_v19  ;;  %v1297_v21 = vadd.f32 1.0, %v1169_v41  ;;  %v4322_v31 = vadd.f32 %v4085_v12, %v3881_v59  ;;  %v4326_v35 = vpop.f32.mrb[35].mxu0  ;;  %v1902_v30 = vmul.f32 %v1774_v47, %v4234_v36  ;;  %v4330_v33 = vpop.f32.mrb[35].mxu1 }
 0x14f   : > { %5960 = vst [vmem:[#allocation63_spill] sm:$0xff] %v4326_v35  ;;  %v2028_v32 = vpack.c.bf16 %v1904_v27, %v1900_v25  ;;  %v1906_v3 = vmul.f32 %v1778_v22, %v1522_v6  ;;  %v1168_v44 = vmul.f32 %v1040_v38, %v4291_v28  ;;  %5961 = vst [vmem:[#allocation64_spill] sm:$0xff] %v4330_v33  ;;  %v912_v37 = vmul.f32 0.7978846, %v4291_v28  ;;  %v5971_v27 = vld [vmem:[#allocation5_spill] sm:$0xff] }
 0x150   : > { %v4332_v2 = vmul.f32 %v1294_v61, %v910_v42  ;;  %v4334_v19 = vmul.f32 %v1295_v1, %v911_v46  ;;  %v1042_v12 = vmul.f32 0.044715, %v4322_v31  ;;  %v4339_v25 = vmul.f32 0.5, %v3925_v60 }
 0x151   : > { %2386 = vmatprep.mubr.bf16.mxu0 %v2028_v32  ;;  %v2030_v4 = vpack.c.bf16 %v1906_v3, %v1902_v30  ;;  %v1296_v41 = vadd.f32 1.0, %v1168_v44  ;;  %v5962_v47 = vpack.c.bf16 %v4026_v14, %v4004_v29  ;;  %v4345_v36 = vmul.f32 %v1297_v21, %v913_v15  ;;  %v5969_v15 = vld [vmem:[#allocation20_spill] sm:$0xff]  ;;  %v5974_v21 = vld [vmem:[#allocation14_spill] sm:$0xff] }
 0x152   : > { %v1170_v6 = vmul.f32 %v1042_v12, %v4322_v31  ;;  %v4351_v42 = vadd.f32 %v4115_v16, %v3875_v56  ;;  %v914_v60 = vmul.f32 0.7978846, %v4322_v31  ;;  %v4355_v46 = vmul.f32 0.5, %v3969_v40  ;;  %v4362_v29 = vpop.f32.mrb[36].mxu0  ;;  %v4364_v14 = vpop.f32.mrb[36].mxu1 }
 0x153   : > { %2387 = vmatmul.mubr.bf16.vlgmr.msra.gmra.mrb[64].mxu0 %v5962_v47  ;;  %5963 = vst [vmem:[#allocation65_spill] sm:$0xff] %v4345_v36  ;;  %2547 = vmatprep.mubr.bf16.mxu1 %v2030_v4  ;;  %5966 = vst [vmem:[#allocation68_spill] sm:$0xff] %v4362_v29  ;;  %v4370_v16 = vmul.f32 0.5, %v3937_v13  ;;  %v4373_v40 = vmul.f32 0.5, %v3994_v18  ;;  %3230 = vtanh.f32 %v5969_v15  ;;  %v4377_v10 = vpop.f32.mrb[37].mxu0  ;;  %v4379_v61 = vmul.f32 %v1296_v41, %v912_v37  ;;  %v4386_v13 = vpop.f32.mrb[37].mxu1 }
 0x154   : > { %5964 = vst [vmem:[#allocation66_spill] sm:$0xff] %v4351_v42  ;;  %5967 = vst [vmem:[#allocation69_spill] sm:$0xff] %v4364_v14  ;;  %2548 = vmatmul.mubr.bf16.vlgmr.msra.gmra.mrb[64].mxu1 %v5968_v23  ;;  %v1043_v43 = vmul.f32 0.044715, %v4351_v42  ;;  %v1045_v1 = vmul.f32 0.044715, %v4360_v11  ;;  %3232 = vtanh.f32 %v5972_v8  ;;  %v4400_v12 = vadd.f32 %v4127_v54, %v3879_v58 }
 0x155   : > { %5970 = vst [vmem:[#allocation20_spill] sm:$0xff] %v4377_v10  ;;  %v4383_v22 = vmul.f32 0.5, %v5971_v27  ;;  %5973 = vst [vmem:[#allocation5_spill] sm:$0xff] %v4386_v13  ;;  %v1298_v55 = vadd.f32 1.0, %v1170_v6  ;;  %v915_v18 = vmul.f32 0.7978846, %v4351_v42  ;;  %3234 = vtanh.f32 %v5974_v21 }
 0x156   : > { %v1171_v38 = vmul.f32 %v1043_v43, %v4351_v42  ;;  %v4391_v32 = vpop.f32.mrb[38].mxu0  ;;  %v4393_v30 = vpop.f32.mrb[38].mxu1  ;;  %v917_v3 = vmul.f32 0.7978846, %v4360_v11  ;;  %v1173_v44 = vmul.f32 %v1045_v1, %v4360_v11  ;;  %v5977_v37 = vld [vmem:[#allocation10_spill] sm:$0xff]  ;;  %v5981_v6 = vld [vmem:[#allocation15_spill] sm:$0xff]  ;;  %v4409_v23 = vadd.f32 %v4129_v51, %v3881_v59 }
 0x157   : > { %5975 = vst [vmem:[#allocation9_spill] sm:$0xff] %v4391_v32  ;;  %5976 = vst [vmem:[#allocation14_spill] sm:$0xff] %v4393_v30  ;;  %3236 = vtanh.f32 %v5977_v37  ;;  %v4402_v4 = vpop.f32.mrb[39].mxu0  ;;  %v4404_v41 = vpop.f32.mrb[39].mxu1  ;;  %v4413_v15 = vadd.f32 %v4136_v20, %v3875_v56  ;;  %v5984_v1 = vld [vmem:[#allocation7_spill] sm:$0xff]  ;;  %v5985_v8 = vld [vmem:[#allocation30_spill] sm:$0xff] }
 0x158   : > { %5978 = vst [vmem:[#allocation10_spill] sm:$0xff] %v4400_v12  ;;  %5979 = vst [vmem:[#allocation70_spill] sm:$0xff] %v4402_v4  ;;  %v1299_v47 = vadd.f32 1.0, %v1171_v38  ;;  %3238 = vtanh.f32 %v5981_v6  ;;  %v1301_v43 = vadd.f32 1.0, %v1173_v44  ;;  %v1527_v27 = vmul.f32 0.5, %v5984_v1  ;;  %v5987_v38 = vld [vmem:[#allocation6_spill] sm:$0xff]  ;;  %v3225_v4 = vpop.eup %3224 }
 0x159   : > { %5980 = vst [vmem:[#allocation71_spill] sm:$0xff] %v4404_v41  ;;  %5982 = vst [vmem:[#allocation15_spill] sm:$0xff] %v4409_v23  ;;  %v1044_v54 = vmul.f32 0.044715, %v4400_v12  ;;  %v4419_v21 = vadd.f32 %v5985_v8, %v3877_v57  ;;  %v4422_v37 = vmul.f32 0.5, %v5987_v38  ;;  %v5988_v6 = vld [vmem:[#allocation8_spill] sm:$0xff]  ;;  %v4429_v44 = vmul.f32 %v1298_v55, %v914_v60  ;;  %v3227_v32 = vpop.eup %3226 }
 0x15a   : > { %5983 = vst [vmem:[#allocation72_spill] sm:$0xff] %v4413_v15  ;;  %v4425_v41 = vmul.f32 0.5, %v5988_v6  ;;  %v916_v51 = vmul.f32 0.7978846, %v4400_v12  ;;  %v1046_v20 = vmul.f32 0.044715, %v4409_v23  ;;  %v4438_v13 = vmul.f32 %v1299_v47, %v915_v18 }
 0x15b   : > { %5986 = vst [vmem:[#allocation7_spill] sm:$0xff] %v4419_v21  ;;  %v1172_v1 = vmul.f32 %v1044_v54, %v4400_v12  ;;  %v918_v30 = vmul.f32 0.7978846, %v4409_v23  ;;  %v1047_v8 = vmul.f32 0.044715, %v4413_v15  ;;  %v4434_v11 = vpop.f32.mrb[40].mxu0  ;;  %v3229_v54 = vpop.eup %3228  ;;  %v4446_v29 = vmul.f32 %v1301_v43, %v917_v3 }
 0x15c   : > { %5989 = vst [vmem:[#allocation30_spill] sm:$0xff] %v4434_v11  ;;  %v4436_v38 = vpop.f32.mrb[40].mxu1  ;;  %v1780_v6 = vadd.f32 1.0, %v3225_v4  ;;  %5991 = vst [vmem:[#allocation8_spill] sm:$0xff] %v4438_v13  ;;  %v1174_v10 = vmul.f32 %v1046_v20, %v4409_v23  ;;  %v1049_v42 = vmul.f32 0.044715, %v4419_v21 }
 0x15d   : > { %5990 = vst [vmem:[#allocation6_spill] sm:$0xff] %v4436_v38  ;;  %v4442_v60 = vpop.f32.mrb[41].mxu0  ;;  %v4444_v55 = vpop.f32.mrb[41].mxu1  ;;  %v1784_v14 = vadd.f32 1.0, %v3227_v32  ;;  %5994 = vst [vmem:[#allocation75_spill] sm:$0xff] %v4446_v29  ;;  %v1175_v38 = vmul.f32 %v1047_v8, %v4413_v15  ;;  %v1782_v47 = vadd.f32 1.0, %v3229_v54 }
 0x15e   : > { %5992 = vst [vmem:[#allocation73_spill] sm:$0xff] %v4442_v60  ;;  %5993 = vst [vmem:[#allocation74_spill] sm:$0xff] %v4444_v55  ;;  %v919_v11 = vmul.f32 0.7978846, %v4413_v15  ;;  %v4450_v12 = vpop.f32.mrb[42].mxu0  ;;  %v4452_v18 = vpop.f32.mrb[42].mxu1  ;;  %v1177_v13 = vmul.f32 %v1049_v42, %v4419_v21  ;;  %v1908_v8 = vmul.f32 %v1780_v6, %v4339_v25 }
 0x15f   : > { %5995 = vst [vmem:[#allocation76_spill] sm:$0xff] %v4450_v12  ;;  %5996 = vst [vmem:[#allocation77_spill] sm:$0xff] %v4452_v18  ;;  %v3231_v4 = vpop.eup %3230  ;;  %v1300_v20 = vadd.f32 1.0, %v1172_v1  ;;  %v5997_v60 = vld [vmem:[#allocation33_spill] sm:$0xff]  ;;  %v4459_v32 = vpop.f32.mrb[43].mxu0  ;;  %v1912_v12 = vmul.f32 %v1784_v14, %v4355_v46  ;;  %v6000_v18 = vld [vmem:[#allocation34_spill] sm:$0xff] }
 0x160   : > { %v4457_v55 = vadd.f32 %v5997_v60, %v3879_v58  ;;  %5998 = vst [vmem:[#allocation33_spill] sm:$0xff] %v4459_v32  ;;  %v4461_v3 = vpop.f32.mrb[43].mxu1  ;;  %v3233_v43 = vpop.eup %3232  ;;  %v1786_v29 = vadd.f32 1.0, %v3231_v4  ;;  %v4467_v54 = vadd.f32 %v6000_v18, %v3881_v59  ;;  %v1302_v15 = vadd.f32 1.0, %v1174_v10 }
 0x161   : > { %5999 = vst [vmem:[#allocation78_spill] sm:$0xff] %v4461_v3  ;;  %v3235_v1 = vpop.eup %3234  ;;  %v1779_v42 = vadd.f32 1.0, %v3233_v43  ;;  %v1303_v23 = vadd.f32 1.0, %v1175_v38  ;;  %v1305_v60 = vadd.f32 1.0, %v1177_v13  ;;  %v2032_v35 = vpack.c.bf16 %v1912_v12, %v1908_v8  ;;  %v6010_v43 = vld [vmem:[#allocation13_spill] sm:$0xff] }
 0x162   : > { %6001 = vst [vmem:[#allocation34_spill] sm:$0xff] %v4467_v54  ;;  %v3237_v33 = vpop.eup %3236  ;;  %v1910_v32 = vmul.f32 %v1782_v47, %v4370_v16  ;;  %v1914_v3 = vmul.f32 %v1786_v29, %v4373_v40  ;;  %v1783_v36 = vadd.f32 1.0, %v3235_v1  ;;  %v4472_v6 = vmul.f32 %v1300_v20, %v916_v51  ;;  %v4476_v12 = vpop.f32.mrb[44].mxu0  ;;  %v6011_v1 = vld [vmem:[#allocation28_spill] sm:$0xff] }
 0x163   : > { %v3239_v25 = vpop.eup %3238  ;;  %v1907_v46 = vmul.f32 %v1779_v42, %v4383_v22  ;;  %v1781_v14 = vadd.f32 1.0, %v3237_v33  ;;  %v921_v18 = vmul.f32 0.7978846, %v4419_v21  ;;  %2394 = vmatprep.mubr.bf16.mxu0 %v2032_v35  ;;  %v1048_v13 = vmul.f32 0.044715, %v4457_v55  ;;  %6002 = vst [vmem:[#allocation79_spill] sm:$0xff] %v4476_v12 }
 0x164   : > { %v2034_v4 = vpack.c.bf16 %v1914_v3, %v1910_v32  ;;  %v1911_v10 = vmul.f32 %v1783_v36, %v1527_v27  ;;  %v1785_v38 = vadd.f32 1.0, %v3239_v25  ;;  %v4478_v16 = vpop.f32.mrb[44].mxu1  ;;  %v4480_v29 = vmul.f32 %v1302_v15, %v918_v30  ;;  %v6033_v12 = vld [vmem:[#allocation41_spill] sm:$0xff] }
 0x165   : > { %6003 = vst [vmem:[#allocation80_spill] sm:$0xff] %v4478_v16  ;;  %v4482_v40 = vmul.f32 %v1303_v23, %v919_v11  ;;  %v4484_v22 = vmul.f32 %v1305_v60, %v921_v18  ;;  %v1050_v33 = vmul.f32 0.044715, %v4467_v54  ;;  %v1909_v35 = vmul.f32 %v1781_v14, %v4422_v37  ;;  %v6006_v11 = vld [vmem:[#allocation27_spill] sm:$0xff]  ;;  %v4501_v32 = vpop.f32.mrb[45].mxu1 }
 0x166   : > { %2555 = vmatprep.mubr.bf16.mxu1 %v2034_v4  ;;  %v2031_v51 = vpack.c.bf16 %v1911_v10, %v1907_v46  ;;  %v1913_v36 = vmul.f32 %v1785_v38, %v4425_v41  ;;  %v1176_v27 = vmul.f32 %v1048_v13, %v4457_v55  ;;  %v920_v47 = vmul.f32 0.7978846, %v4457_v55  ;;  %v4499_v41 = vpop.f32.mrb[45].mxu0  ;;  %6009 = vst [vmem:[#allocation84_spill] sm:$0xff] %v4501_v32  ;;  %v6016_v46 = vld [vmem:[#allocation16_spill] sm:$0xff] }
 0x167   : > { %6004 = vst [vmem:[#allocation81_spill] sm:$0xff] %v4482_v40  ;;  %6005 = vst [vmem:[#allocation82_spill] sm:$0xff] %v4484_v22  ;;  %v922_v20 = vmul.f32 0.7978846, %v4467_v54  ;;  %v1178_v30 = vmul.f32 %v1050_v33, %v4467_v54  ;;  %3240 = vtanh.f32 %v6006_v11  ;;  %v4497_v37 = vadd.f32 %v4175_v53, %v3875_v56  ;;  %v4509_v60 = vpop.f32.mrb[46].mxu0  ;;  %v6015_v53 = vld [vmem:[#allocation19_spill] sm:$0xff] }
 0x168   : > { %2395 = vmatmul.mubr.bf16.gmra.mrb[68].mxu0 %v2031_v51  ;;  %v2033_v23 = vpack.c.bf16 %v1913_v36, %v1909_v35  ;;  %v1304_v15 = vadd.f32 1.0, %v1176_v27  ;;  %3242 = vtanh.f32 %v4166_v17  ;;  %6008 = vst [vmem:[#allocation83_spill] sm:$0xff] %v4499_v41  ;;  %v1532_v8 = vmul.f32 0.5, %v6010_v43  ;;  %6013 = vst [vmem:[#allocation28_spill] sm:$0xff] %v4509_v60  ;;  %v4511_v17 = vpop.f32.mrb[46].mxu1  ;;  %v4517_v4 = vpop.f32.mrb[47].mxu0 }
 0x169   : > { %6007 = vst [vmem:[#allocation27_spill] sm:$0xff] %v4497_v37  ;;  %v1306_v3 = vadd.f32 1.0, %v1178_v30  ;;  %3244 = vtanh.f32 %v6011_v1  ;;  %v4507_v42 = vadd.f32 %v4177_v0, %v3877_v57  ;;  %6014 = vst [vmem:[#allocation85_spill] sm:$0xff] %v4511_v17  ;;  %v1536_v25 = vmul.f32 0.5, %v6015_v53  ;;  %v4519_v10 = vpop.f32.mrb[47].mxu1  ;;  %v6019_v0 = vld [vmem:[#allocation21_spill] sm:$0xff] }
 0x16a   : > { %2556 = vmatmul.mubr.bf16.gmra.mrb[68].mxu1 %v2033_v23  ;;  %v1534_v14 = vmul.f32 0.5, %v6016_v46  ;;  %3246 = vtanh.f32 %v4171_v26  ;;  %v1051_v18 = vmul.f32 0.044715, %v4497_v37  ;;  %6017 = vst [vmem:[#allocation19_spill] sm:$0xff] %v4517_v4  ;;  %6018 = vst [vmem:[#allocation16_spill] sm:$0xff] %v4519_v10  ;;  %v4521_v38 = vmul.f32 %v1304_v15, %v920_v47  ;;  %v6020_v51 = vld [vmem:[#allocation11_spill] sm:$0xff] }
 0x16b   : > { %6012 = vst [vmem:[#allocation13_spill] sm:$0xff] %v4507_v42  ;;  %v1538_v13 = vmul.f32 0.5, %v6019_v0  ;;  %v1053_v33 = vmul.f32 0.044715, %v4507_v42  ;;  %v4526_v35 = vmul.f32 0.5, %v6020_v51  ;;  %v4528_v36 = vmul.f32 %v1306_v3, %v922_v20  ;;  %v6021_v30 = vld [vmem:[#allocation25_spill] sm:$0xff] }
 0x16c   : > { %v923_v27 = vmul.f32 0.7978846, %v4497_v37  ;;  %v1179_v26 = vmul.f32 %v1051_v18, %v4497_v37  ;;  %3248 = vtanh.f32 %v6021_v30  ;;  %v6022_v23 = vld [vmem:[#allocation29_spill] sm:$0xff]  ;;  %v4537_v47 = vadd.f32 %v4184_v24, %v3879_v58  ;;  %v6025_v3 = vld [vmem:[#allocation26_spill] sm:$0xff] }
 0x16d   : > { %v1181_v11 = vmul.f32 %v1053_v33, %v4507_v42  ;;  %3250 = vtanh.f32 %v6022_v23  ;;  %v4541_v15 = vadd.f32 %v4186_v9, %v3881_v59  ;;  %v4546_v43 = vadd.f32 %v4195_v39, %v3875_v56  ;;  %v6028_v46 = vld [vmem:[#allocation17_spill] sm:$0xff]  ;;  %v6030_v33 = vld [vmem:[#allocation12_spill] sm:$0xff] }
 0x16e   : > { %6023 = vst [vmem:[#allocation21_spill] sm:$0xff] %v4537_v47  ;;  %v1307_v20 = vadd.f32 1.0, %v1179_v26  ;;  %3252 = vtanh.f32 %v6025_v3  ;;  %v4550_v1 = vadd.f32 %v4197_v48, %v3877_v57  ;;  %v925_v53 = vmul.f32 0.7978846, %v4507_v42  ;;  %v6029_v18 = vld [vmem:[#allocation37_spill] sm:$0xff]  ;;  %v6031_v26 = vld [vmem:[#allocation18_spill] sm:$0xff] }
 0x16f   : > { %6024 = vst [vmem:[#allocation11_spill] sm:$0xff] %v4541_v15  ;;  %6026 = vst [vmem:[#allocation25_spill] sm:$0xff] %v4546_v43  ;;  %v1535_v24 = vmul.f32 0.5, %v6028_v46  ;;  %3254 = vtanh.f32 %v6029_v18  ;;  %v1052_v9 = vmul.f32 0.044715, %v4537_v47  ;;  %v1309_v0 = vadd.f32 1.0, %v1181_v11 }
 0x170   : > { %6027 = vst [vmem:[#allocation29_spill] sm:$0xff] %v4550_v1  ;;  %v1533_v51 = vmul.f32 0.5, %v6030_v33  ;;  %v1537_v30 = vmul.f32 0.5, %v6031_v26  ;;  %v1054_v39 = vmul.f32 0.044715, %v4541_v15  ;;  %v4559_v3 = vmul.f32 %v1307_v20, %v923_v27 }
 0x171   : > { %v3241_v23 = vpop.eup %3240  ;;  %v924_v48 = vmul.f32 0.7978846, %v4537_v47  ;;  %v1180_v10 = vmul.f32 %v1052_v9, %v4537_v47  ;;  %v1055_v46 = vmul.f32 0.044715, %v4546_v43  ;;  %v926_v17 = vmul.f32 0.7978846, %v4541_v15 }
 0x172   : > { %6032 = vst [vmem:[#allocation26_spill] sm:$0xff] %v4559_v3  ;;  %v3243_v4 = vpop.eup %3242  ;;  %v1788_v18 = vadd.f32 1.0, %v3241_v23  ;;  %v1182_v11 = vmul.f32 %v1054_v39, %v4541_v15  ;;  %v1057_v33 = vmul.f32 0.044715, %v4550_v1  ;;  %v927_v27 = vmul.f32 0.7978846, %v4546_v43 }
 0x173   : > { %v3245_v26 = vpop.eup %3244  ;;  %v1792_v60 = vadd.f32 1.0, %v3243_v4  ;;  %v1308_v32 = vadd.f32 1.0, %v1180_v10  ;;  %v1183_v20 = vmul.f32 %v1055_v46, %v4546_v43  ;;  %v4571_v42 = vadd.f32 %v6033_v12, %v3879_v58  ;;  %v6035_v23 = vld [vmem:[#allocation42_spill] sm:$0xff] }
 0x174   : > { %v3247_v41 = vpop.eup %3246  ;;  %v1790_v16 = vadd.f32 1.0, %v3245_v26  ;;  %v1310_v9 = vadd.f32 1.0, %v1182_v11  ;;  %v4575_v3 = vadd.f32 %v6035_v23, %v3881_v59  ;;  %v1916_v39 = vmul.f32 %v1788_v18, %v1532_v8  ;;  %v4588_v18 = vpop.f32.mrb[48].mxu0 }
 0x175   : > { %6034 = vst [vmem:[#allocation17_spill] sm:$0xff] %v4571_v42  ;;  %v1920_v37 = vmul.f32 %v1792_v60, %v1536_v25  ;;  %v1794_v15 = vadd.f32 1.0, %v3247_v41  ;;  %v1185_v4 = vmul.f32 %v1057_v33, %v4550_v1  ;;  %v4578_v47 = vmul.f32 %v1309_v0, %v925_v53  ;;  %6038 = vst [vmem:[#allocation18_spill] sm:$0xff] %v4588_v18 }
 0x176   : > { %6036 = vst [vmem:[#allocation37_spill] sm:$0xff] %v4575_v3  ;;  %v3249_v10 = vpop.eup %3248  ;;  %v4580_v46 = vmul.f32 %v1308_v32, %v924_v48  ;;  %v1311_v26 = vadd.f32 1.0, %v1183_v20  ;;  %v929_v11 = vmul.f32 0.7978846, %v4550_v1  ;;  %v1918_v21 = vmul.f32 %v1790_v16, %v1534_v14  ;;  %v4590_v16 = vpop.f32.mrb[48].mxu1 }
 0x177   : > { %6037 = vst [vmem:[#allocation12_spill] sm:$0xff] %v4578_v47  ;;  %v3251_v43 = vpop.eup %3250  ;;  %v2036_v12 = vpack.c.bf16 %v1920_v37, %v1916_v39  ;;  %v1922_v22 = vmul.f32 %v1794_v15, %v1538_v13  ;;  %v1787_v40 = vadd.f32 1.0, %v3249_v10  ;;  %v4583_v8 = vmul.f32 %v1310_v9, %v926_v17  ;;  %6039 = vst [vmem:[#allocation41_spill] sm:$0xff] %v4590_v16  ;;  %v6042_v39 = vld [vmem:[#allocation53_spill] sm:$0xff] }
 0x178   : > { %v3253_v23 = vpop.eup %3252  ;;  %v1791_v54 = vadd.f32 1.0, %v3251_v43  ;;  %v928_v41 = vmul.f32 0.7978846, %v4571_v42  ;;  %v1056_v60 = vmul.f32 0.044715, %v4571_v42  ;;  %v1313_v0 = vadd.f32 1.0, %v1185_v4 }
 0x179   : > { %v3255_v25 = vpop.eup %3254  ;;  %2402 = vmatprep.mubr.bf16.mxu0 %v2036_v12  ;;  %v2038_v32 = vpack.c.bf16 %v1922_v22, %v1918_v21  ;;  %v1789_v53 = vadd.f32 1.0, %v3253_v23  ;;  %v1058_v48 = vmul.f32 0.044715, %v4575_v3  ;;  %v1915_v37 = vmul.f32 %v1787_v40, %v4526_v35  ;;  %v6041_v22 = vld [vmem:[#allocation43_spill] sm:$0xff]  ;;  %v6044_v35 = vld [vmem:[#allocation44_spill] sm:$0xff]  ;;  %v6046_v10 = vld [vmem:[#allocation49_spill] sm:$0xff] }
 0x17a   : > { %v1919_v14 = vmul.f32 %v1791_v54, %v1535_v24  ;;  %v1793_v17 = vadd.f32 1.0, %v3255_v25  ;;  %v1184_v13 = vmul.f32 %v1056_v60, %v4571_v42  ;;  %v4594_v43 = vmul.f32 %v1311_v26, %v927_v27  ;;  %v4611_v12 = vpop.f32.mrb[49].mxu1  ;;  %v6051_v60 = vld [vmem:[#allocation31_spill] sm:$0xff] }
 0x17b   : > { %2563 = vmatprep.mubr.bf16.mxu1 %v2038_v32  ;;  %v1917_v15 = vmul.f32 %v1789_v53, %v1533_v51  ;;  %v1186_v21 = vmul.f32 %v1058_v48, %v4575_v3  ;;  %3256 = vtanh.f32 %v6041_v22  ;;  %v4599_v4 = vmul.f32 %v1313_v0, %v929_v11  ;;  %v6045_v51 = vld [vmem:[#allocation24_spill] sm:$0xff]  ;;  %v6053_v0 = vld [vmem:[#allocation50_spill] sm:$0xff] }
 0x17c   : > { %6040 = vst [vmem:[#allocation42_spill] sm:$0xff] %v4594_v43  ;;  %v2035_v33 = vpack.c.bf16 %v1919_v14, %v1915_v37  ;;  %v1921_v20 = vmul.f32 %v1793_v17, %v1537_v30  ;;  %v1312_v9 = vadd.f32 1.0, %v1184_v13  ;;  %3258 = vtanh.f32 %v6042_v39  ;;  %v4609_v30 = vpop.f32.mrb[49].mxu0  ;;  %6049 = vst [vmem:[#allocation24_spill] sm:$0xff] %v4611_v12  ;;  %v6050_v11 = vld [vmem:[#allocation36_spill] sm:$0xff] }
 0x17d   : > { %6043 = vst [vmem:[#allocation43_spill] sm:$0xff] %v4599_v4  ;;  %v930_v54 = vmul.f32 0.7978846, %v4575_v3  ;;  %v1314_v40 = vadd.f32 1.0, %v1186_v21  ;;  %3260 = vtanh.f32 %v6044_v35  ;;  %v1540_v27 = vmul.f32 0.5, %v6045_v51  ;;  %6048 = vst [vmem:[#allocation44_spill] sm:$0xff] %v4609_v30 }
 0x17e   : > { %2403 = vmatmul.mubr.bf16.gmra.mrb[72].mxu0 %v2035_v33  ;;  %v2037_v24 = vpack.c.bf16 %v1921_v20, %v1917_v15  ;;  %3262 = vtanh.f32 %v4297_v45  ;;  %v4607_v26 = vadd.f32 %v6046_v10, %v3875_v56  ;;  %v1544_v23 = vmul.f32 0.5, %v6050_v11  ;;  %v6052_v32 = vld [vmem:[#allocation40_spill] sm:$0xff]  ;;  %v4620_v37 = vpop.f32.mrb[50].mxu0  ;;  %v4622_v45 = vpop.f32.mrb[50].mxu1  ;;  %v6058_v15 = vld [vmem:[#allocation38_spill] sm:$0xff]  ;;  %v6062_v51 = vld [vmem:[#allocation45_spill] sm:$0xff] }
 0x17f   : > { %v1542_v25 = vmul.f32 0.5, %v6051_v60  ;;  %v1546_v53 = vmul.f32 0.5, %v6052_v32  ;;  %v4618_v48 = vadd.f32 %v6053_v0, %v3877_v57  ;;  %6055 = vst [vmem:[#allocation36_spill] sm:$0xff] %v4620_v37  ;;  %6056 = vst [vmem:[#allocation31_spill] sm:$0xff] %v4622_v45  ;;  %v4624_v14 = vmul.f32 %v1312_v9, %v928_v41  ;;  %v4630_v21 = vpop.f32.mrb[51].mxu0  ;;  %v6060_v33 = vld [vmem:[#allocation22_spill] sm:$0xff] }
 0x180   : > { %6047 = vst [vmem:[#allocation53_spill] sm:$0xff] %v4607_v26  ;;  %2564 = vmatmul.mubr.bf16.gmra.mrb[72].mxu1 %v2037_v24  ;;  %v4626_v17 = vmul.f32 %v1314_v40, %v930_v54  ;;  %v1059_v13 = vmul.f32 0.044715, %v4607_v26  ;;  %3264 = vtanh.f32 %v6058_v15  ;;  %6059 = vst [vmem:[#allocation50_spill] sm:$0xff] %v4630_v21  ;;  %v4634_v20 = vmul.f32 0.5, %v6060_v33  ;;  %v6061_v39 = vld [vmem:[#allocation32_spill] sm:$0xff] }
 0x181   : > { %6054 = vst [vmem:[#allocation49_spill] sm:$0xff] %v4618_v48  ;;  %v1061_v22 = vmul.f32 0.044715, %v4618_v48  ;;  %v4637_v35 = vmul.f32 0.5, %v6061_v39  ;;  %3266 = vtanh.f32 %v6062_v51  ;;  %v4640_v41 = vpop.f32.mrb[51].mxu1  ;;  %v6064_v54 = vld [vmem:[#allocation39_spill] sm:$0xff] }
 0x182   : > { %6057 = vst [vmem:[#allocation40_spill] sm:$0xff] %v4626_v17  ;;  %6063 = vst [vmem:[#allocation38_spill] sm:$0xff] %v4640_v41  ;;  %v1187_v9 = vmul.f32 %v1059_v13, %v4607_v26  ;;  %3268 = vtanh.f32 %v6064_v54  ;;  %v6065_v40 = vld [vmem:[#allocation55_spill] sm:$0xff]  ;;  %v6067_v10 = vld [vmem:[#allocation56_spill] sm:$0xff]  ;;  %v931_v60 = vmul.f32 0.7978846, %v4607_v26 }
 0x183   : > { %v4646_v24 = vadd.f32 %v6065_v40, %v3879_v58  ;;  %v4650_v11 = vadd.f32 %v6067_v10, %v3881_v59  ;;  %v1189_v32 = vmul.f32 %v1061_v22, %v4618_v48  ;;  %v6069_v0 = vld [vmem:[#allocation51_spill] sm:$0xff]  ;;  %v6070_v15 = vld [vmem:[#allocation58_spill] sm:$0xff]  ;;  %v933_v39 = vmul.f32 0.7978846, %v4618_v48 }
 0x184   : > { %3270 = vtanh.f32 %v6069_v0  ;;  %v4657_v33 = vadd.f32 %v6070_v15, %v3875_v56  ;;  %v1315_v13 = vadd.f32 1.0, %v1187_v9  ;;  %v6071_v51 = vld [vmem:[#allocation23_spill] sm:$0xff] }
 0x185   : > { %6066 = vst [vmem:[#allocation22_spill] sm:$0xff] %v4646_v24  ;;  %6068 = vst [vmem:[#allocation32_spill] sm:$0xff] %v4650_v11  ;;  %v1541_v54 = vmul.f32 0.5, %v6071_v51  ;;  %v1060_v40 = vmul.f32 0.044715, %v4646_v24  ;;  %v3257_v41 = vpop.eup %3256  ;;  %v6072_v10 = vld [vmem:[#allocation35_spill] sm:$0xff]  ;;  %3272 = vtanh.f32 %v4318_v50  ;;  %v4724_v50 = vadd.f32 %v4304_v63, %v3877_v57 }
 0x186   : > { %v1545_v21 = vmul.f32 0.5, %v6072_v10  ;;  %v932_v45 = vmul.f32 0.7978846, %v4646_v24  ;;  %v1062_v22 = vmul.f32 0.044715, %v4650_v11  ;;  %v6073_v0 = vld [vmem:[#allocation59_spill] sm:$0xff]  ;;  %v3259_v15 = vpop.eup %3258  ;;  %v4677_v43 = vmul.f32 %v1315_v13, %v931_v60 }
 0x187   : > { %v4667_v37 = vadd.f32 %v6073_v0, %v3877_v57  ;;  %v1796_v12 = vadd.f32 1.0, %v3257_v41  ;;  %v1317_v9 = vadd.f32 1.0, %v1189_v32  ;;  %v1188_v30 = vmul.f32 %v1060_v40, %v4646_v24  ;;  %v6074_v51 = vld [vmem:[#allocation60_spill] sm:$0xff]  ;;  %v3261_v18 = vpop.eup %3260  ;;  %v6076_v41 = vld [vmem:[#allocation61_spill] sm:$0xff]  ;;  %6084 = vst [vmem:[#allocation35_spill] sm:$0xff] %v4724_v50 }
 0x188   : > { %v4672_v16 = vadd.f32 %v6074_v51, %v3879_v58  ;;  %v1800_v48 = vadd.f32 1.0, %v3259_v15  ;;  %v934_v10 = vmul.f32 0.7978846, %v4650_v11  ;;  %v1190_v26 = vmul.f32 %v1062_v22, %v4650_v11  ;;  %v3263_v4 = vpop.eup %3262  ;;  %6075 = vst [vmem:[#allocation45_spill] sm:$0xff] %v4677_v43 }
 0x189   : > { %v1063_v1 = vmul.f32 0.044715, %v4657_v33  ;;  %v1924_v0 = vmul.f32 %v1796_v12, %v1540_v27  ;;  %v1798_v47 = vadd.f32 1.0, %v3261_v18  ;;  %v4681_v32 = vadd.f32 %v6076_v41, %v3881_v59 }
 0x18a   : > { %v1928_v40 = vmul.f32 %v1800_v48, %v1544_v23  ;;  %v1802_v51 = vadd.f32 1.0, %v3263_v4  ;;  %v1316_v24 = vadd.f32 1.0, %v1188_v30  ;;  %v3265_v3 = vpop.eup %3264  ;;  %v4684_v17 = vmul.f32 %v1317_v9, %v933_v39 }
 0x18b   : > { %v1191_v15 = vmul.f32 %v1063_v1, %v4657_v33  ;;  %v1318_v22 = vadd.f32 1.0, %v1190_v26  ;;  %v935_v11 = vmul.f32 0.7978846, %v4657_v33  ;;  %v1065_v27 = vmul.f32 0.044715, %v4667_v37  ;;  %v3267_v18 = vpop.eup %3266 }
 0x18c   : > { %6077 = vst [vmem:[#allocation39_spill] sm:$0xff] %v4684_v17  ;;  %v2040_v12 = vpack.c.bf16 %v1928_v40, %v1924_v0  ;;  %v1926_v60 = vmul.f32 %v1798_v47, %v1542_v25  ;;  %v1930_v13 = vmul.f32 %v1802_v51, %v1546_v53  ;;  %v1795_v43 = vadd.f32 1.0, %v3265_v3  ;;  %v3269_v41 = vpop.eup %3268  ;;  %v4693_v17 = vpop.f32.mrb[52].mxu0 }
 0x18d   : > { %v1799_v42 = vadd.f32 1.0, %v3267_v18  ;;  %v937_v4 = vmul.f32 0.7978846, %v4667_v37  ;;  %v1193_v30 = vmul.f32 %v1065_v27, %v4667_v37  ;;  %v1064_v1 = vmul.f32 0.044715, %v4672_v16  ;;  %6078 = vst [vmem:[#allocation55_spill] sm:$0xff] %v4693_v17 }
 0x18e   : > { %v3271_v23 = vpop.eup %3270  ;;  %2410 = vmatprep.mubr.bf16.mxu0 %v2040_v12  ;;  %v2042_v26 = vpack.c.bf16 %v1930_v13, %v1926_v60  ;;  %v1797_v48 = vadd.f32 1.0, %v3269_v41  ;;  %v4691_v39 = vmul.f32 %v1316_v24, %v932_v45  ;;  %v1319_v9 = vadd.f32 1.0, %v1191_v15  ;;  %v4695_v47 = vpop.f32.mrb[52].mxu1 }
 0x18f   : > { %6079 = vst [vmem:[#allocation56_spill] sm:$0xff] %v4695_v47  ;;  %v1923_v3 = vmul.f32 %v1795_v43, %v4634_v20  ;;  %v1927_v25 = vmul.f32 %v1799_v42, %v4637_v35  ;;  %v1801_v53 = vadd.f32 1.0, %v3271_v23  ;;  %v936_v0 = vmul.f32 0.7978846, %v4672_v16  ;;  %v6080_v35 = vld [vmem:[#allocation48_spill] sm:$0xff] }
 0x190   : > { %2571 = vmatprep.mubr.bf16.mxu1 %v2042_v26  ;;  %v4700_v40 = vmul.f32 %v1318_v22, %v934_v10  ;;  %v1321_v51 = vadd.f32 1.0, %v1193_v30  ;;  %v1192_v27 = vmul.f32 %v1064_v1, %v4672_v16  ;;  %v1066_v45 = vmul.f32 0.044715, %v4681_v32  ;;  %v6087_v30 = vld [vmem:[#allocation52_spill] sm:$0xff] }
 0x191   : > { %v2039_v24 = vpack.c.bf16 %v1927_v25, %v1923_v3  ;;  %v1925_v15 = vmul.f32 %v1797_v48, %v1541_v54  ;;  %v1929_v18 = vmul.f32 %v1801_v53, %v1545_v21  ;;  %v938_v12 = vmul.f32 0.7978846, %v4681_v32  ;;  %v4715_v21 = vpop.f32.mrb[53].mxu0  ;;  %v4717_v54 = vpop.f32.mrb[53].mxu1  ;;  %v6090_v25 = vld [vmem:[#allocation46_spill] sm:$0xff] }
 0x192   : > { %v4705_v60 = vmul.f32 %v1319_v9, %v935_v11  ;;  %v1320_v43 = vadd.f32 1.0, %v1192_v27  ;;  %v1194_v42 = vmul.f32 %v1066_v45, %v4681_v32  ;;  %v1548_v10 = vmul.f32 0.5, %v6080_v35  ;;  %6082 = vst [vmem:[#allocation58_spill] sm:$0xff] %v4715_v21  ;;  %6083 = vst [vmem:[#allocation23_spill] sm:$0xff] %v4717_v54  ;;  %v4726_v41 = vpop.f32.mrb[54].mxu0  ;;  %v6091_v53 = vld [vmem:[#allocation62_spill] sm:$0xff]  ;;  %v3273_v35 = vpop.eup %3272 }
 0x193   : > { %2411 = vmatmul.mubr.bf16.gmra.mrb[76].mxu0 %v2039_v24  ;;  %v2041_v20 = vpack.c.bf16 %v1929_v18, %v1925_v15  ;;  %3274 = vtanh.f32 %v4379_v61  ;;  %v4713_v22 = vadd.f32 %v4302_v52, %v3875_v56  ;;  %v4719_v11 = vmul.f32 %v1321_v51, %v937_v4  ;;  %6085 = vst [vmem:[#allocation59_spill] sm:$0xff] %v4726_v41  ;;  %v4728_v61 = vpop.f32.mrb[54].mxu1  ;;  %v4734_v23 = vpop.f32.mrb[55].mxu0  ;;  %v6094_v15 = vld [vmem:[#allocation54_spill] sm:$0xff]  ;;  %v6095_v18 = vld [vmem:[#allocation65_spill] sm:$0xff] }
 0x194   : > { %v1322_v13 = vadd.f32 1.0, %v1194_v42  ;;  %3276 = vtanh.f32 %v4332_v2  ;;  %6086 = vst [vmem:[#allocation60_spill] sm:$0xff] %v4728_v61  ;;  %v1552_v52 = vmul.f32 0.5, %v4291_v28  ;;  %v1550_v1 = vmul.f32 0.5, %v6087_v30  ;;  %6088 = vst [vmem:[#allocation61_spill] sm:$0xff] %v4734_v23  ;;  %v4741_v9 = vpop.f32.mrb[55].mxu1 }
 0x195   : > { %6081 = vst [vmem:[#allocation51_spill] sm:$0xff] %v4713_v22  ;;  %2572 = vmatmul.mubr.bf16.gmra.mrb[76].mxu1 %v2041_v20  ;;  %3278 = vtanh.f32 %v4429_v44  ;;  %v1067_v4 = vmul.f32 0.044715, %v4713_v22  ;;  %v4736_v2 = vmul.f32 %v1320_v43, %v936_v0  ;;  %v1554_v63 = vmul.f32 0.5, %v4322_v31  ;;  %6089 = vst [vmem:[#allocation48_spill] sm:$0xff] %v4741_v9  ;;  %v6096_v43 = vld [vmem:[#allocation47_spill] sm:$0xff] }
 0x196   : > { %v939_v26 = vmul.f32 0.7978846, %v4713_v22  ;;  %v1069_v48 = vmul.f32 0.044715, %v4724_v50  ;;  %v4743_v3 = vmul.f32 %v1322_v13, %v938_v12  ;;  %v4747_v44 = vmul.f32 0.5, %v6090_v25  ;;  %v6099_v23 = vld [vmem:[#allocation63_spill] sm:$0xff] }
 0x197   : > { %v1195_v28 = vmul.f32 %v1067_v4, %v4713_v22  ;;  %3280 = vtanh.f32 %v6091_v53  ;;  %v4754_v31 = vadd.f32 %v4307_v34, %v3879_v58  ;;  %v4758_v51 = vadd.f32 %v4309_v49, %v3881_v59 }
 0x198   : > { %v1197_v0 = vmul.f32 %v1069_v48, %v4724_v50  ;;  %3282 = vtanh.f32 %v4334_v19  ;;  %v4763_v45 = vadd.f32 %v4314_v5, %v3875_v56  ;;  %v4767_v24 = vadd.f32 %v4324_v62, %v3877_v57 }
 0x199   : > { %v1323_v27 = vadd.f32 1.0, %v1195_v28  ;;  %3284 = vtanh.f32 %v4316_v7  ;;  %v941_v19 = vmul.f32 0.7978846, %v4724_v50  ;;  %v1551_v34 = vmul.f32 0.5, %v6094_v15  ;;  %v6097_v7 = vld [vmem:[#allocation57_spill] sm:$0xff] }
 0x19a   : > { %6092 = vst [vmem:[#allocation52_spill] sm:$0xff] %v4763_v45  ;;  %6093 = vst [vmem:[#allocation46_spill] sm:$0xff] %v4767_v24  ;;  %3286 = vtanh.f32 %v6095_v18  ;;  %v1068_v49 = vmul.f32 0.044715, %v4754_v31  ;;  %v1325_v12 = vadd.f32 1.0, %v1197_v0  ;;  %v1549_v42 = vmul.f32 0.5, %v6096_v43 }
 0x19b   : > { %v1553_v20 = vmul.f32 0.5, %v6097_v7  ;;  %v1070_v5 = vmul.f32 0.044715, %v4758_v51  ;;  %v4776_v13 = vmul.f32 %v1323_v27, %v939_v26  ;;  %v940_v62 = vmul.f32 0.7978846, %v4754_v31 }
 0x19c   : > { %v1196_v30 = vmul.f32 %v1068_v49, %v4754_v31  ;;  %v1071_v4 = vmul.f32 0.044715, %v4763_v45  ;;  %v1804_v28 = vadd.f32 1.0, %v3273_v35  ;;  %v942_v25 = vmul.f32 0.7978846, %v4758_v51  ;;  %v6100_v35 = vld [vmem:[#allocation64_spill] sm:$0xff] }
 0x19d   : > { %6098 = vst [vmem:[#allocation62_spill] sm:$0xff] %v4776_v13  ;;  %v3275_v48 = vpop.eup %3274  ;;  %v1198_v53 = vmul.f32 %v1070_v5, %v4758_v51  ;;  %v1073_v0 = vmul.f32 0.044715, %v4767_v24  ;;  %v943_v26 = vmul.f32 0.7978846, %v4763_v45  ;;  %v4788_v61 = vadd.f32 %v6099_v23, %v3879_v58 }
 0x19e   : > { %v3277_v15 = vpop.eup %3276  ;;  %v1808_v18 = vadd.f32 1.0, %v3275_v48  ;;  %v1324_v43 = vadd.f32 1.0, %v1196_v30  ;;  %v1199_v27 = vmul.f32 %v1071_v4, %v4763_v45  ;;  %v4792_v41 = vadd.f32 %v6100_v35, %v3881_v59 }
 0x19f   : > { %v3279_v7 = vpop.eup %3278  ;;  %v1806_v9 = vadd.f32 1.0, %v3277_v15  ;;  %v1326_v49 = vadd.f32 1.0, %v1198_v53  ;;  %v1932_v5 = vmul.f32 %v1804_v28, %v1548_v10  ;;  %v1201_v30 = vmul.f32 %v1073_v0, %v4767_v24 }
 0x1a0   : > { %v1936_v54 = vmul.f32 %v1808_v18, %v1552_v52  ;;  %v1810_v21 = vadd.f32 1.0, %v3279_v7  ;;  %v4795_v47 = vmul.f32 %v1325_v12, %v941_v19  ;;  %v4797_v4 = vmul.f32 %v1324_v43, %v940_v62  ;;  %v4805_v43 = vpop.f32.mrb[56].mxu0 }
 0x1a1   : > { %v3281_v48 = vpop.eup %3280  ;;  %v1327_v15 = vadd.f32 1.0, %v1199_v27  ;;  %v945_v53 = vmul.f32 0.7978846, %v4767_v24  ;;  %v1934_v50 = vmul.f32 %v1806_v9, %v1550_v1  ;;  %v4800_v10 = vmul.f32 %v1326_v49, %v942_v25  ;;  %6102 = vst [vmem:[#allocation65_spill] sm:$0xff] %v4805_v43 }
 0x1a2   : > { %6101 = vst [vmem:[#allocation54_spill] sm:$0xff] %v4795_v47  ;;  %v3283_v17 = vpop.eup %3282  ;;  %v2044_v23 = vpack.c.bf16 %v1936_v54, %v1932_v5  ;;  %v1938_v45 = vmul.f32 %v1810_v21, %v1554_v63  ;;  %v1803_v13 = vadd.f32 1.0, %v3281_v48  ;;  %v944_v52 = vmul.f32 0.7978846, %v4788_v61  ;;  %v4807_v54 = vpop.f32.mrb[56].mxu1 }
 0x1a3   : > { %v3285_v35 = vpop.eup %3284  ;;  %v1807_v22 = vadd.f32 1.0, %v3283_v17  ;;  %v1072_v28 = vmul.f32 0.044715, %v4788_v61  ;;  %v1329_v0 = vadd.f32 1.0, %v1201_v30  ;;  %v1074_v18 = vmul.f32 0.044715, %v4792_v41 }
 0x1a4   : > { %v3287_v19 = vpop.eup %3286  ;;  %2418 = vmatprep.mubr.bf16.mxu0 %v2044_v23  ;;  %v2046_v12 = vpack.c.bf16 %v1938_v45, %v1934_v50  ;;  %v1805_v62 = vadd.f32 1.0, %v3285_v35  ;;  %6103 = vst [vmem:[#allocation47_spill] sm:$0xff] %v4807_v54  ;;  %v1931_v21 = vmul.f32 %v1803_v13, %v4747_v44  ;;  %v4811_v25 = vmul.f32 %v1327_v15, %v943_v26  ;;  %v6110_v30 = vld [vmem:[#allocation15_spill] sm:$0xff]  ;;  %v6111_v15 = vld [vmem:[#allocation34_spill] sm:$0xff] }
 0x1a5   : > { %v1935_v17 = vmul.f32 %v1807_v22, %v1551_v34  ;;  %v1809_v1 = vadd.f32 1.0, %v3287_v19  ;;  %v1200_v63 = vmul.f32 %v1072_v28, %v4788_v61  ;;  %v1202_v50 = vmul.f32 %v1074_v18, %v4792_v41  ;;  %v6118_v18 = vld [vmem:[#allocation66_spill] sm:$0xff] }
 0x1a6   : > { %2579 = vmatprep.mubr.bf16.mxu1 %v2046_v12  ;;  %v1933_v9 = vmul.f32 %v1805_v62, %v1549_v42  ;;  %3288 = vtanh.f32 %v4472_v6  ;;  %v4816_v49 = vmul.f32 %v1329_v0, %v945_v53  ;;  %v946_v22 = vmul.f32 0.7978846, %v4792_v41  ;;  %v6105_v42 = vld [vmem:[#allocation10_spill] sm:$0xff]  ;;  %v6106_v6 = vld [vmem:[#allocation68_spill] sm:$0xff]  ;;  %v6112_v53 = vld [vmem:[#allocation69_spill] sm:$0xff] }
 0x1a7   : > { %v2043_v45 = vpack.c.bf16 %v1935_v17, %v1931_v21  ;;  %v1937_v27 = vmul.f32 %v1809_v1, %v1553_v20  ;;  %v1328_v7 = vadd.f32 1.0, %v1200_v63  ;;  %3290 = vtanh.f32 %v4521_v38  ;;  %v4826_v20 = vpop.f32.mrb[57].mxu0  ;;  %v4828_v38 = vpop.f32.mrb[57].mxu1  ;;  %v6119_v17 = vld [vmem:[#allocation72_spill] sm:$0xff]  ;;  %v6120_v63 = vld [vmem:[#allocation81_spill] sm:$0xff] }
 0x1a8   : > { %6104 = vst [vmem:[#allocation57_spill] sm:$0xff] %v4816_v49  ;;  %v1330_v44 = vadd.f32 1.0, %v1202_v50  ;;  %3292 = vtanh.f32 %v4480_v29  ;;  %v1556_v13 = vmul.f32 0.5, %v6105_v42  ;;  %v4824_v26 = vadd.f32 %v6106_v6, %v3875_v56  ;;  %6108 = vst [vmem:[#allocation64_spill] sm:$0xff] %v4826_v20  ;;  %v4837_v35 = vpop.f32.mrb[58].mxu0  ;;  %v6122_v50 = vld [vmem:[#allocation75_spill] sm:$0xff] }
 0x1a9   : > { %2419 = vmatmul.mubr.bf16.gmra.mrb[80].mxu0 %v2043_v45  ;;  %v2045_v34 = vpack.c.bf16 %v1937_v27, %v1933_v9  ;;  %3294 = vtanh.f32 %v4528_v36  ;;  %6109 = vst [vmem:[#allocation10_spill] sm:$0xff] %v4828_v38  ;;  %v1560_v5 = vmul.f32 0.5, %v4457_v55  ;;  %v1558_v48 = vmul.f32 0.5, %v6110_v30  ;;  %6114 = vst [vmem:[#allocation15_spill] sm:$0xff] %v4837_v35  ;;  %v4839_v36 = vpop.f32.mrb[58].mxu1  ;;  %v6116_v55 = vld [vmem:[#allocation8_spill] sm:$0xff] }
 0x1aa   : > { %6107 = vst [vmem:[#allocation63_spill] sm:$0xff] %v4824_v26  ;;  %v1562_v29 = vmul.f32 0.5, %v6111_v15  ;;  %v4835_v23 = vadd.f32 %v6112_v53, %v3877_v57  ;;  %6115 = vst [vmem:[#allocation34_spill] sm:$0xff] %v4839_v36  ;;  %v4841_v28 = vmul.f32 %v1328_v7, %v944_v52  ;;  %v4843_v19 = vmul.f32 %v1330_v44, %v946_v22  ;;  %v4847_v62 = vpop.f32.mrb[59].mxu0  ;;  %v4857_v52 = vpop.f32.mrb[59].mxu1  ;;  %v6123_v45 = vld [vmem:[#allocation20_spill] sm:$0xff] }
 0x1ab   : > { %2580 = vmatmul.mubr.bf16.gmra.mrb[80].mxu1 %v2045_v34  ;;  %v1075_v12 = vmul.f32 0.044715, %v4824_v26  ;;  %3296 = vtanh.f32 %v6116_v55  ;;  %6117 = vst [vmem:[#allocation69_spill] sm:$0xff] %v4847_v62  ;;  %v4851_v21 = vmul.f32 0.5, %v6118_v18  ;;  %v4854_v1 = vmul.f32 0.5, %v6119_v17  ;;  %6121 = vst [vmem:[#allocation8_spill] sm:$0xff] %v4857_v52 }
 0x1ac   : > { %6113 = vst [vmem:[#allocation68_spill] sm:$0xff] %v4835_v23  ;;  %v1077_v0 = vmul.f32 0.044715, %v4835_v23  ;;  %3298 = vtanh.f32 %v6120_v63  ;;  %v4863_v27 = vadd.f32 %v6123_v45, %v3879_v58  ;;  %v6125_v7 = vld [vmem:[#allocation5_spill] sm:$0xff]  ;;  %v947_v44 = vmul.f32 0.7978846, %v4824_v26 }
 0x1ad   : > { %v1203_v9 = vmul.f32 %v1075_v12, %v4824_v26  ;;  %3300 = vtanh.f32 %v6122_v50  ;;  %v4867_v22 = vadd.f32 %v6125_v7, %v3881_v59  ;;  %v6127_v42 = vld [vmem:[#allocation82_spill] sm:$0xff]  ;;  %v6128_v6 = vld [vmem:[#allocation9_spill] sm:$0xff]  ;;  %v949_v53 = vmul.f32 0.7978846, %v4835_v23  ;;  %v6130_v12 = vld [vmem:[#allocation67_spill] sm:$0xff] }
 0x1ae   : > { %6124 = vst [vmem:[#allocation66_spill] sm:$0xff] %v4863_v27  ;;  %v1205_v34 = vmul.f32 %v1077_v0, %v4835_v23  ;;  %3302 = vtanh.f32 %v6127_v42  ;;  %v4874_v30 = vadd.f32 %v6128_v6, %v3875_v56  ;;  %v1557_v55 = vmul.f32 0.5, %v6130_v12  ;;  %v6131_v63 = vld [vmem:[#allocation7_spill] sm:$0xff]  ;;  %v6132_v7 = vld [vmem:[#allocation14_spill] sm:$0xff] }
 0x1af   : > { %6126 = vst [vmem:[#allocation72_spill] sm:$0xff] %v4867_v22  ;;  %v1331_v15 = vadd.f32 1.0, %v1203_v9  ;;  %v1076_v18 = vmul.f32 0.044715, %v4863_v27  ;;  %v1561_v50 = vmul.f32 0.5, %v6131_v63  ;;  %v4884_v42 = vadd.f32 %v6132_v7, %v3877_v57  ;;  %v6134_v12 = vld [vmem:[#allocation70_spill] sm:$0xff] }
 0x1b0   : > { %6129 = vst [vmem:[#allocation81_spill] sm:$0xff] %v4874_v30  ;;  %v3289_v17 = vpop.eup %3288  ;;  %v948_v45 = vmul.f32 0.7978846, %v4863_v27  ;;  %v1078_v0 = vmul.f32 0.044715, %v4867_v22  ;;  %v1333_v9 = vadd.f32 1.0, %v1205_v34  ;;  %v4889_v36 = vadd.f32 %v6134_v12, %v3879_v58 }
 0x1b1   : > { %6133 = vst [vmem:[#allocation75_spill] sm:$0xff] %v4884_v42  ;;  %v3291_v6 = vpop.eup %3290  ;;  %v1812_v52 = vadd.f32 1.0, %v3289_v17  ;;  %v1204_v62 = vmul.f32 %v1076_v18, %v4863_v27  ;;  %v950_v63 = vmul.f32 0.7978846, %v4867_v22  ;;  %v1079_v54 = vmul.f32 0.044715, %v4874_v30 }
 0x1b2   : > { %6135 = vst [vmem:[#allocation20_spill] sm:$0xff] %v4889_v36  ;;  %v3293_v35 = vpop.eup %3292  ;;  %v1816_v38 = vadd.f32 1.0, %v3291_v6  ;;  %v1206_v20 = vmul.f32 %v1078_v0, %v4867_v22  ;;  %v4894_v26 = vmul.f32 %v1331_v15, %v947_v44  ;;  %v6137_v34 = vld [vmem:[#allocation71_spill] sm:$0xff]  ;;  %v4901_v49 = vmul.f32 %v1333_v9, %v949_v53 }
 0x1b3   : > { %v3295_v43 = vpop.eup %3294  ;;  %v1940_v7 = vmul.f32 %v1812_v52, %v1556_v13  ;;  %v1814_v23 = vadd.f32 1.0, %v3293_v35  ;;  %v4898_v18 = vadd.f32 %v6137_v34, %v3881_v59  ;;  %v1332_v27 = vadd.f32 1.0, %v1204_v62 }
 0x1b4   : > { %6136 = vst [vmem:[#allocation5_spill] sm:$0xff] %v4894_v26  ;;  %v1944_v17 = vmul.f32 %v1816_v38, %v1560_v5  ;;  %v1818_v12 = vadd.f32 1.0, %v3295_v43  ;;  %v1207_v6 = vmul.f32 %v1079_v54, %v4874_v30  ;;  %6139 = vst [vmem:[#allocation9_spill] sm:$0xff] %v4901_v49  ;;  %v1334_v0 = vadd.f32 1.0, %v1206_v20  ;;  %v4910_v49 = vpop.f32.mrb[60].mxu0 }
 0x1b5   : > { %6138 = vst [vmem:[#allocation82_spill] sm:$0xff] %v4898_v18  ;;  %v3297_v24 = vpop.eup %3296  ;;  %v951_v22 = vmul.f32 0.7978846, %v4874_v30  ;;  %v1081_v13 = vmul.f32 0.044715, %v4884_v42  ;;  %v1942_v44 = vmul.f32 %v1814_v23, %v1558_v48  ;;  %v4908_v53 = vmul.f32 %v1332_v27, %v948_v45  ;;  %6140 = vst [vmem:[#allocation67_spill] sm:$0xff] %v4910_v49 }
 0x1b6   : > { %v3299_v35 = vpop.eup %3298  ;;  %v2048_v52 = vpack.c.bf16 %v1944_v17, %v1940_v7  ;;  %v1946_v15 = vmul.f32 %v1818_v12, %v1562_v29  ;;  %v1811_v26 = vadd.f32 1.0, %v3297_v24  ;;  %v953_v43 = vmul.f32 0.7978846, %v4884_v42  ;;  %v4912_v48 = vpop.f32.mrb[60].mxu1  ;;  %v6177_v30 = vld [vmem:[#allocation78_spill] sm:$0xff] }
 0x1b7   : > { %v3301_v34 = vpop.eup %3300  ;;  %v1815_v47 = vadd.f32 1.0, %v3299_v35  ;;  %v1209_v38 = vmul.f32 %v1081_v13, %v4884_v42  ;;  %v1080_v54 = vmul.f32 0.044715, %v4889_v36  ;;  %v1335_v9 = vadd.f32 1.0, %v1207_v6  ;;  %6141 = vst [vmem:[#allocation7_spill] sm:$0xff] %v4912_v48 }
 0x1b8   : > { %v3303_v5 = vpop.eup %3302  ;;  %2426 = vmatprep.mubr.bf16.mxu0 %v2048_v52  ;;  %v2050_v20 = vpack.c.bf16 %v1946_v15, %v1942_v44  ;;  %v1813_v62 = vadd.f32 1.0, %v3301_v34  ;;  %v1939_v24 = vmul.f32 %v1811_v26, %v4851_v21  ;;  %v952_v7 = vmul.f32 0.7978846, %v4889_v36 }
 0x1b9   : > { %v1943_v29 = vmul.f32 %v1815_v47, %v4854_v1  ;;  %v1817_v23 = vadd.f32 1.0, %v3303_v5  ;;  %v4917_v17 = vmul.f32 %v1334_v0, %v950_v63  ;;  %v1337_v12 = vadd.f32 1.0, %v1209_v38  ;;  %v6143_v1 = vld [vmem:[#allocation21_spill] sm:$0xff]  ;;  %v6144_v0 = vld [vmem:[#allocation30_spill] sm:$0xff] }
 0x1ba   : > { %2587 = vmatprep.mubr.bf16.mxu1 %v2050_v20  ;;  %v1208_v13 = vmul.f32 %v1080_v54, %v4889_v36  ;;  %v1082_v27 = vmul.f32 0.044715, %v4898_v18  ;;  %v1941_v6 = vmul.f32 %v1813_v62, %v1557_v55  ;;  %v954_v52 = vmul.f32 0.7978846, %v4898_v18  ;;  %v4932_v55 = vpop.f32.mrb[61].mxu0  ;;  %v6153_v5 = vld [vmem:[#allocation17_spill] sm:$0xff] }
 0x1bb   : > { %v2047_v45 = vpack.c.bf16 %v1943_v29, %v1939_v24  ;;  %v1945_v35 = vmul.f32 %v1817_v23, %v1561_v50  ;;  %v4922_v44 = vmul.f32 %v1335_v9, %v951_v22  ;;  %3304 = vtanh.f32 %v4580_v46  ;;  %6146 = vst [vmem:[#allocation71_spill] sm:$0xff] %v4932_v55  ;;  %v4934_v50 = vpop.f32.mrb[61].mxu1  ;;  %v6149_v46 = vld [vmem:[#allocation6_spill] sm:$0xff]  ;;  %v4943_v54 = vpop.f32.mrb[62].mxu0  ;;  %v6154_v62 = vld [vmem:[#allocation11_spill] sm:$0xff]  ;;  %v6155_v24 = vld [vmem:[#allocation40_spill] sm:$0xff] }
 0x1bc   : > { %v1336_v26 = vadd.f32 1.0, %v1208_v13  ;;  %v1210_v47 = vmul.f32 %v1082_v27, %v4898_v18  ;;  %v1564_v63 = vmul.f32 0.5, %v6143_v1  ;;  %3306 = vtanh.f32 %v4624_v14  ;;  %6147 = vst [vmem:[#allocation21_spill] sm:$0xff] %v4934_v50  ;;  %6151 = vst [vmem:[#allocation86_spill] sm:$0xff] %v4943_v54  ;;  %v4945_v14 = vpop.f32.mrb[62].mxu1  ;;  %v4951_v29 = vpop.f32.mrb[63].mxu0 }
 0x1bd   : > { %6142 = vst [vmem:[#allocation14_spill] sm:$0xff] %v4922_v44  ;;  %2427 = vmatmul.mubr.bf16.gmra.mrb[84].mxu0 %v2047_v45  ;;  %v2049_v21 = vpack.c.bf16 %v1945_v35, %v1941_v6  ;;  %v4930_v15 = vadd.f32 %v6144_v0, %v3875_v56  ;;  %v4936_v22 = vmul.f32 %v1337_v12, %v953_v43  ;;  %3308 = vtanh.f32 %v4583_v8  ;;  %v6157_v23 = vld [vmem:[#allocation37_spill] sm:$0xff]  ;;  %v4958_v45 = vpop.f32.mrb[63].mxu1  ;;  %v6161_v1 = vld [vmem:[#allocation26_spill] sm:$0xff] }
 0x1be   : > { %v1338_v34 = vadd.f32 1.0, %v1210_v47  ;;  %v4941_v38 = vadd.f32 %v6149_v46, %v3877_v57  ;;  %6152 = vst [vmem:[#allocation87_spill] sm:$0xff] %v4945_v14  ;;  %v1568_v20 = vmul.f32 0.5, %v6153_v5  ;;  %v1566_v9 = vmul.f32 0.5, %v6154_v62  ;;  %6156 = vst [vmem:[#allocation17_spill] sm:$0xff] %v4951_v29  ;;  %v6160_v47 = vld [vmem:[#allocation27_spill] sm:$0xff] }
 0x1bf   : > { %6145 = vst [vmem:[#allocation70_spill] sm:$0xff] %v4930_v15  ;;  %6148 = vst [vmem:[#allocation30_spill] sm:$0xff] %v4936_v22  ;;  %2588 = vmatmul.mubr.bf16.gmra.mrb[84].mxu1 %v2049_v21  ;;  %3310 = vtanh.f32 %v6155_v24  ;;  %v1083_v43 = vmul.f32 0.044715, %v4930_v15  ;;  %v4953_v8 = vmul.f32 %v1336_v26, %v952_v7  ;;  %v1570_v12 = vmul.f32 0.5, %v6157_v23  ;;  %v6162_v26 = vld [vmem:[#allocation42_spill] sm:$0xff] }
 0x1c0   : > { %6150 = vst [vmem:[#allocation6_spill] sm:$0xff] %v4941_v38  ;;  %v955_v13 = vmul.f32 0.7978846, %v4930_v15  ;;  %v1085_v27 = vmul.f32 0.044715, %v4941_v38  ;;  %6158 = vst [vmem:[#allocation11_spill] sm:$0xff] %v4958_v45  ;;  %v4960_v6 = vmul.f32 %v1338_v34, %v954_v52  ;;  %3312 = vtanh.f32 %v6161_v1 }
 0x1c1   : > { %v1211_v35 = vmul.f32 %v1083_v43, %v4930_v15  ;;  %v4964_v21 = vmul.f32 0.5, %v6160_v47  ;;  %3314 = vtanh.f32 %v6162_v26  ;;  %v6163_v0 = vld [vmem:[#allocation73_spill] sm:$0xff]  ;;  %v6165_v5 = vld [vmem:[#allocation74_spill] sm:$0xff]  ;;  %v6167_v34 = vld [vmem:[#allocation12_spill] sm:$0xff]  ;;  %v957_v47 = vmul.f32 0.7978846, %v4941_v38 }
 0x1c2   : > { %6159 = vst [vmem:[#allocation40_spill] sm:$0xff] %v4960_v6  ;;  %v1213_v7 = vmul.f32 %v1085_v27, %v4941_v38  ;;  %v4971_v46 = vadd.f32 %v6163_v0, %v3879_v58  ;;  %v4975_v62 = vadd.f32 %v6165_v5, %v3881_v59  ;;  %3316 = vtanh.f32 %v6167_v34  ;;  %v6168_v24 = vld [vmem:[#allocation76_spill] sm:$0xff]  ;;  %v6170_v23 = vld [vmem:[#allocation77_spill] sm:$0xff]  ;;  %v6172_v0 = vld [vmem:[#allocation43_spill] sm:$0xff] }
 0x1c3   : > { %v1339_v52 = vadd.f32 1.0, %v1211_v35  ;;  %v4980_v43 = vadd.f32 %v6168_v24, %v3875_v56  ;;  %v4984_v27 = vadd.f32 %v6170_v23, %v3877_v57  ;;  %v6171_v1 = vld [vmem:[#allocation25_spill] sm:$0xff]  ;;  %3318 = vtanh.f32 %v6172_v0 }
 0x1c4   : > { %6164 = vst [vmem:[#allocation37_spill] sm:$0xff] %v4971_v46  ;;  %6166 = vst [vmem:[#allocation27_spill] sm:$0xff] %v4975_v62  ;;  %v1567_v26 = vmul.f32 0.5, %v6171_v1  ;;  %v1084_v5 = vmul.f32 0.044715, %v4971_v46  ;;  %v1341_v45 = vadd.f32 1.0, %v1213_v7  ;;  %3320 = vtanh.f32 %v4691_v39 }
 0x1c5   : > { %6169 = vst [vmem:[#allocation26_spill] sm:$0xff] %v4980_v43  ;;  %v6173_v35 = vld [vmem:[#allocation13_spill] sm:$0xff]  ;;  %v1086_v24 = vmul.f32 0.044715, %v4975_v62  ;;  %v3305_v54 = vpop.eup %3304  ;;  %v4993_v50 = vmul.f32 %v1339_v52, %v955_v13  ;;  %v956_v23 = vmul.f32 0.7978846, %v4971_v46  ;;  %3322 = vtanh.f32 %v4736_v2 }
 0x1c6   : > { %v1565_v29 = vmul.f32 0.5, %v6173_v35  ;;  %v6174_v34 = vld [vmem:[#allocation29_spill] sm:$0xff]  ;;  %v1212_v55 = vmul.f32 %v1084_v5, %v4971_v46  ;;  %v1087_v1 = vmul.f32 0.044715, %v4980_v43  ;;  %v3307_v48 = vpop.eup %3306  ;;  %v1820_v0 = vadd.f32 1.0, %v3305_v54  ;;  %v6179_v39 = vld [vmem:[#allocation79_spill] sm:$0xff] }
 0x1c7   : > { %v1569_v14 = vmul.f32 0.5, %v6174_v34  ;;  %6175 = vst [vmem:[#allocation42_spill] sm:$0xff] %v4993_v50  ;;  %v958_v49 = vmul.f32 0.7978846, %v4975_v62  ;;  %v1214_v7 = vmul.f32 %v1086_v24, %v4975_v62  ;;  %v1089_v35 = vmul.f32 0.044715, %v4984_v27  ;;  %v3309_v34 = vpop.eup %3308 }
 0x1c8   : > { %v1824_v38 = vadd.f32 1.0, %v3307_v48  ;;  %v1340_v15 = vadd.f32 1.0, %v1212_v55  ;;  %v959_v13 = vmul.f32 0.7978846, %v4980_v43  ;;  %v1215_v52 = vmul.f32 %v1087_v1, %v4980_v43  ;;  %v6176_v54 = vld [vmem:[#allocation33_spill] sm:$0xff]  ;;  %v6181_v2 = vld [vmem:[#allocation32_spill] sm:$0xff] }
 0x1c9   : > { %v3311_v50 = vpop.eup %3310  ;;  %v1822_v42 = vadd.f32 1.0, %v3309_v34  ;;  %v1342_v5 = vadd.f32 1.0, %v1214_v7  ;;  %v1217_v46 = vmul.f32 %v1089_v35, %v4984_v27  ;;  %v5006_v22 = vadd.f32 %v6176_v54, %v3879_v58 }
 0x1ca   : > { %v1948_v44 = vmul.f32 %v1820_v0, %v1564_v63  ;;  %v1952_v24 = vmul.f32 %v1824_v38, %v1568_v20  ;;  %v1826_v62 = vadd.f32 1.0, %v3311_v50  ;;  %v5010_v48 = vadd.f32 %v6177_v30, %v3881_v59  ;;  %v3313_v55 = vpop.eup %3312 }
 0x1cb   : > { %v5012_v18 = vmul.f32 %v1341_v45, %v957_v47  ;;  %v5014_v1 = vmul.f32 %v1340_v15, %v956_v23  ;;  %v1343_v34 = vadd.f32 1.0, %v1215_v52  ;;  %v961_v7 = vmul.f32 0.7978846, %v4984_v27  ;;  %v3315_v35 = vpop.eup %3314 }
 0x1cc   : > { %v2052_v43 = vpack.c.bf16 %v1952_v24, %v1948_v44  ;;  %v1950_v36 = vmul.f32 %v1822_v42, %v1566_v9  ;;  %v1954_v54 = vmul.f32 %v1826_v62, %v1570_v12  ;;  %v1819_v6 = vadd.f32 1.0, %v3313_v55  ;;  %v3317_v63 = vpop.eup %3316 }
 0x1cd   : > { %v1823_v38 = vadd.f32 1.0, %v3315_v35  ;;  %v5017_v50 = vmul.f32 %v1342_v5, %v958_v49  ;;  %v1345_v20 = vadd.f32 1.0, %v1217_v46  ;;  %v1088_v30 = vmul.f32 0.044715, %v5006_v22  ;;  %v3319_v0 = vpop.eup %3318 }
 0x1ce   : > { %2434 = vmatprep.mubr.bf16.mxu0 %v2052_v43  ;;  %v2054_v45 = vpack.c.bf16 %v1954_v54, %v1950_v36  ;;  %v1821_v15 = vadd.f32 1.0, %v3317_v63  ;;  %v960_v47 = vmul.f32 0.7978846, %v5006_v22  ;;  %v1090_v23 = vmul.f32 0.044715, %v5010_v48  ;;  %v6184_v63 = vld [vmem:[#allocation45_spill] sm:$0xff] }
 0x1cf   : > { %v1947_v44 = vmul.f32 %v1819_v6, %v4964_v21  ;;  %v1951_v42 = vmul.f32 %v1823_v38, %v1567_v26  ;;  %v1825_v9 = vadd.f32 1.0, %v3319_v0  ;;  %v1216_v12 = vmul.f32 %v1088_v30, %v5006_v22  ;;  %v6178_v26 = vld [vmem:[#allocation22_spill] sm:$0xff]  ;;  %v6186_v0 = vld [vmem:[#allocation39_spill] sm:$0xff] }
 0x1d0   : > { %2595 = vmatprep.mubr.bf16.mxu1 %v2054_v45  ;;  %v1949_v49 = vmul.f32 %v1821_v15, %v1565_v29  ;;  %v5024_v62 = vmul.f32 %v1343_v34, %v959_v13  ;;  %v1218_v46 = vmul.f32 %v1090_v23, %v5010_v48  ;;  %v5029_v5 = vmul.f32 %v1345_v20, %v961_v7  ;;  %v6182_v7 = vld [vmem:[#allocation80_spill] sm:$0xff]  ;;  %v6187_v45 = vld [vmem:[#allocation83_spill] sm:$0xff] }
 0x1d1   : > { %v2051_v36 = vpack.c.bf16 %v1951_v42, %v1947_v44  ;;  %v1953_v43 = vmul.f32 %v1825_v9, %v1569_v14  ;;  %v1344_v52 = vadd.f32 1.0, %v1216_v12  ;;  %v962_v6 = vmul.f32 0.7978846, %v5010_v48 }
 0x1d2   : > { %v1346_v21 = vadd.f32 1.0, %v1218_v46  ;;  %3324 = vtanh.f32 %v4700_v40  ;;  %v1572_v13 = vmul.f32 0.5, %v6178_v26  ;;  %v5037_v24 = vadd.f32 %v6179_v39, %v3875_v56 }
 0x1d3   : > { %2435 = vmatmul.mubr.bf16.gmra.mrb[88].mxu0 %v2051_v36  ;;  %v2053_v29 = vpack.c.bf16 %v1953_v43, %v1949_v49  ;;  %3326 = vtanh.f32 %v4743_v3  ;;  %v1576_v14 = vmul.f32 0.5, %v4672_v16  ;;  %v1574_v55 = vmul.f32 0.5, %v6181_v2  ;;  %v6185_v16 = vld [vmem:[#allocation53_spill] sm:$0xff]  ;;  %v3321_v43 = vpop.eup %3320 }
 0x1d4   : > { %6180 = vst [vmem:[#allocation73_spill] sm:$0xff] %v5037_v24  ;;  %v1578_v34 = vmul.f32 0.5, %v4681_v32  ;;  %v5044_v35 = vadd.f32 %v6182_v7, %v3877_v57  ;;  %v5046_v40 = vmul.f32 %v1344_v52, %v960_v47  ;;  %v5048_v54 = vmul.f32 %v1346_v21, %v962_v6  ;;  %v6189_v47 = vld [vmem:[#allocation84_spill] sm:$0xff]  ;;  %v6192_v49 = vld [vmem:[#allocation49_spill] sm:$0xff]  ;;  %v3323_v26 = vpop.eup %3322 }
 0x1d5   : > { %2596 = vmatmul.mubr.bf16.gmra.mrb[88].mxu1 %v2053_v29  ;;  %v1091_v3 = vmul.f32 0.044715, %v5037_v24  ;;  %3328 = vtanh.f32 %v6184_v63  ;;  %v1571_v20 = vmul.f32 0.5, %v6185_v16  ;;  %v1575_v30 = vmul.f32 0.5, %v4657_v33  ;;  %v6191_v33 = vld [vmem:[#allocation28_spill] sm:$0xff] }
 0x1d6   : > { %6183 = vst [vmem:[#allocation74_spill] sm:$0xff] %v5044_v35  ;;  %v1093_v38 = vmul.f32 0.044715, %v5044_v35  ;;  %3330 = vtanh.f32 %v4705_v60  ;;  %v5060_v15 = vadd.f32 %v6187_v45, %v3879_v58  ;;  %v5064_v23 = vadd.f32 %v6189_v47, %v3881_v59 }
 0x1d7   : > { %v1219_v32 = vmul.f32 %v1091_v3, %v5037_v24  ;;  %3332 = vtanh.f32 %v6186_v0  ;;  %v963_v44 = vmul.f32 0.7978846, %v5037_v24  ;;  %v5071_v60 = vadd.f32 %v6191_v33, %v3875_v56  ;;  %v6195_v3 = vld [vmem:[#allocation19_spill] sm:$0xff] }
 0x1d8   : > { %6188 = vst [vmem:[#allocation12_spill] sm:$0xff] %v5060_v15  ;;  %6190 = vst [vmem:[#allocation76_spill] sm:$0xff] %v5064_v23  ;;  %v1221_v42 = vmul.f32 %v1093_v38, %v5044_v35  ;;  %3334 = vtanh.f32 %v4719_v11  ;;  %v965_v12 = vmul.f32 0.7978846, %v5044_v35  ;;  %v1573_v46 = vmul.f32 0.5, %v6192_v49  ;;  %v6193_v11 = vld [vmem:[#allocation85_spill] sm:$0xff] }
 0x1d9   : > { %v1347_v9 = vadd.f32 1.0, %v1219_v32  ;;  %v1092_v36 = vmul.f32 0.044715, %v5060_v15  ;;  %v1577_v52 = vmul.f32 0.5, %v4667_v37  ;;  %v964_v6 = vmul.f32 0.7978846, %v5060_v15 }
 0x1da   : > { %v1094_v21 = vmul.f32 0.044715, %v5064_v23  ;;  %v5081_v29 = vadd.f32 %v6193_v11, %v3877_v57  ;;  %v1828_v39 = vadd.f32 1.0, %v3321_v43  ;;  %v1349_v2 = vadd.f32 1.0, %v1221_v42  ;;  %v6197_v42 = vld [vmem:[#allocation16_spill] sm:$0xff] }
 0x1db   : > { %v1220_v7 = vmul.f32 %v1092_v36, %v5060_v15  ;;  %v5086_v63 = vadd.f32 %v6195_v3, %v3879_v58  ;;  %v1832_v16 = vadd.f32 1.0, %v3323_v26  ;;  %v966_v37 = vmul.f32 0.7978846, %v5064_v23 }
 0x1dc   : > { %6194 = vst [vmem:[#allocation77_spill] sm:$0xff] %v5081_v29  ;;  %v3325_v38 = vpop.eup %3324  ;;  %v1222_v32 = vmul.f32 %v1094_v21, %v5064_v23  ;;  %v1095_v0 = vmul.f32 0.044715, %v5071_v60  ;;  %v1956_v47 = vmul.f32 %v1828_v39, %v1572_v13  ;;  %v5091_v49 = vmul.f32 %v1347_v9, %v963_v44 }
 0x1dd   : > { %v3327_v45 = vpop.eup %3326  ;;  %v1830_v33 = vadd.f32 1.0, %v3325_v38  ;;  %v5095_v36 = vadd.f32 %v6197_v42, %v3881_v59  ;;  %v1960_v43 = vmul.f32 %v1832_v16, %v1576_v14  ;;  %v1348_v3 = vadd.f32 1.0, %v1220_v7 }
 0x1de   : > { %6196 = vst [vmem:[#allocation25_spill] sm:$0xff] %v5091_v49  ;;  %v1834_v11 = vadd.f32 1.0, %v3327_v45  ;;  %v1223_v26 = vmul.f32 %v1095_v0, %v5071_v60  ;;  %v5098_v24 = vmul.f32 %v1349_v2, %v965_v12  ;;  %v1350_v21 = vadd.f32 1.0, %v1222_v32 }
 0x1df   : > { %v3329_v35 = vpop.eup %3328  ;;  %v967_v23 = vmul.f32 0.7978846, %v5071_v60  ;;  %v1097_v13 = vmul.f32 0.044715, %v5081_v29  ;;  %v2056_v44 = vpack.c.bf16 %v1960_v43, %v1956_v47  ;;  %v1958_v9 = vmul.f32 %v1830_v33, %v1574_v55 }
 0x1e0   : > { %6198 = vst [vmem:[#allocation43_spill] sm:$0xff] %v5098_v24  ;;  %v3331_v39 = vpop.eup %3330  ;;  %v1962_v38 = vmul.f32 %v1834_v11, %v1578_v34  ;;  %v1827_v49 = vadd.f32 1.0, %v3329_v35  ;;  %v969_v14 = vmul.f32 0.7978846, %v5081_v29  ;;  %v1096_v16 = vmul.f32 0.044715, %v5086_v63 }
 0x1e1   : > { %v3333_v42 = vpop.eup %3332  ;;  %v1831_v15 = vadd.f32 1.0, %v3331_v39  ;;  %v1225_v7 = vmul.f32 %v1097_v13, %v5081_v29  ;;  %2442 = vmatprep.mubr.bf16.mxu0 %v2056_v44  ;;  %v5105_v0 = vmul.f32 %v1348_v3, %v964_v6  ;;  %v1351_v45 = vadd.f32 1.0, %v1223_v26 }
 0x1e2   : > { %v3335_v12 = vpop.eup %3334  ;;  %v2058_v2 = vpack.c.bf16 %v1962_v38, %v1958_v9  ;;  %v1829_v32 = vadd.f32 1.0, %v3333_v42  ;;  %v1955_v24 = vmul.f32 %v1827_v49, %v1571_v20  ;;  %v968_v34 = vmul.f32 0.7978846, %v5086_v63  ;;  %v6199_v49 = vld [vmem:[#allocation18_spill] sm:$0xff] }
 0x1e3   : > { %v1959_v47 = vmul.f32 %v1831_v15, %v1575_v30  ;;  %v1833_v55 = vadd.f32 1.0, %v3335_v12  ;;  %v5108_v35 = vmul.f32 %v1350_v21, %v966_v37  ;;  %v1353_v33 = vadd.f32 1.0, %v1225_v7  ;;  %v6203_v7 = vld [vmem:[#allocation51_spill] sm:$0xff]  ;;  %v6207_v12 = vld [vmem:[#allocation24_spill] sm:$0xff] }
 0x1e4   : > { %2603 = vmatprep.mubr.bf16.mxu1 %v2058_v2  ;;  %v1224_v43 = vmul.f32 %v1096_v16, %v5086_v63  ;;  %v1098_v11 = vmul.f32 0.044715, %v5095_v36  ;;  %v1957_v39 = vmul.f32 %v1829_v32, %v1573_v46  ;;  %v970_v6 = vmul.f32 0.7978846, %v5095_v36  ;;  %v6205_v16 = vld [vmem:[#allocation44_spill] sm:$0xff] }
 0x1e5   : > { %v2055_v13 = vpack.c.bf16 %v1959_v47, %v1955_v24  ;;  %v1961_v44 = vmul.f32 %v1833_v55, %v1577_v52  ;;  %v5113_v3 = vmul.f32 %v1351_v45, %v967_v23  ;;  %3336 = vtanh.f32 %v4797_v4  ;;  %v6201_v23 = vld [vmem:[#allocation41_spill] sm:$0xff]  ;;  %v6209_v45 = vld [vmem:[#allocation54_spill] sm:$0xff]  ;;  %v6210_v47 = vld [vmem:[#allocation36_spill] sm:$0xff] }
 0x1e6   : > { %v1352_v20 = vadd.f32 1.0, %v1224_v43  ;;  %v1226_v30 = vmul.f32 %v1098_v11, %v5095_v36  ;;  %v1580_v37 = vmul.f32 0.5, %v4754_v31  ;;  %3338 = vtanh.f32 %v4841_v28  ;;  %v6214_v43 = vld [vmem:[#allocation52_spill] sm:$0xff] }
 0x1e7   : > { %2443 = vmatmul.mubr.bf16.gmra.mrb[92].mxu0 %v2055_v13  ;;  %v2057_v15 = vpack.c.bf16 %v1961_v44, %v1957_v39  ;;  %v5121_v24 = vadd.f32 %v6199_v49, %v3875_v56  ;;  %v5123_v46 = vmul.f32 %v1353_v33, %v969_v14  ;;  %3340 = vtanh.f32 %v4800_v10  ;;  %v6215_v13 = vld [vmem:[#allocation57_spill] sm:$0xff] }
 0x1e8   : > { %v1354_v52 = vadd.f32 1.0, %v1226_v30  ;;  %v5128_v26 = vadd.f32 %v6201_v23, %v3877_v57  ;;  %v1584_v4 = vmul.f32 0.5, %v4788_v61  ;;  %v1582_v31 = vmul.f32 0.5, %v4758_v51  ;;  %v6204_v51 = vld [vmem:[#allocation62_spill] sm:$0xff] }
 0x1e9   : > { %6200 = vst [vmem:[#allocation13_spill] sm:$0xff] %v5121_v24  ;;  %2604 = vmatmul.mubr.bf16.gmra.mrb[92].mxu1 %v2057_v15  ;;  %3342 = vtanh.f32 %v4843_v19  ;;  %v1099_v28 = vmul.f32 0.044715, %v5121_v24  ;;  %v5134_v21 = vmul.f32 %v1352_v20, %v968_v34  ;;  %v1586_v9 = vmul.f32 0.5, %v4792_v41  ;;  %v6212_v34 = vld [vmem:[#allocation31_spill] sm:$0xff]  ;;  %v6217_v30 = vld [vmem:[#allocation46_spill] sm:$0xff] }
 0x1ea   : > { %6202 = vst [vmem:[#allocation29_spill] sm:$0xff] %v5128_v26  ;;  %v971_v38 = vmul.f32 0.7978846, %v5121_v24  ;;  %v1101_v10 = vmul.f32 0.044715, %v5128_v26  ;;  %v5139_v42 = vmul.f32 %v1354_v52, %v970_v6  ;;  %v5143_v61 = vmul.f32 0.5, %v6203_v7 }
 0x1eb   : > { %v1227_v14 = vmul.f32 %v1099_v28, %v5121_v24  ;;  %3344 = vtanh.f32 %v6204_v51  ;;  %v5150_v41 = vadd.f32 %v6205_v16, %v3879_v58  ;;  %v5154_v2 = vadd.f32 %v6207_v12, %v3881_v59  ;;  %v6216_v6 = vld [vmem:[#allocation35_spill] sm:$0xff]  ;;  %v6220_v24 = vld [vmem:[#allocation38_spill] sm:$0xff] }
 0x1ec   : > { %v1229_v19 = vmul.f32 %v1101_v10, %v5128_v26  ;;  %3346 = vtanh.f32 %v4811_v25  ;;  %v5159_v55 = vadd.f32 %v6210_v47, %v3875_v56  ;;  %v5163_v33 = vadd.f32 %v6212_v34, %v3877_v57 }
 0x1ed   : > { %6206 = vst [vmem:[#allocation33_spill] sm:$0xff] %v5150_v41  ;;  %6208 = vst [vmem:[#allocation78_spill] sm:$0xff] %v5154_v2  ;;  %v1355_v32 = vadd.f32 1.0, %v1227_v14  ;;  %3348 = vtanh.f32 %v6209_v45  ;;  %v973_v25 = vmul.f32 0.7978846, %v5128_v26  ;;  %v1583_v11 = vmul.f32 0.5, %v6214_v43 }
 0x1ee   : > { %6211 = vst [vmem:[#allocation22_spill] sm:$0xff] %v5159_v55  ;;  %6213 = vst [vmem:[#allocation79_spill] sm:$0xff] %v5163_v33  ;;  %3350 = vtanh.f32 %v6215_v13  ;;  %v1100_v39 = vmul.f32 0.044715, %v5150_v41  ;;  %v1357_v44 = vadd.f32 1.0, %v1229_v19  ;;  %v1581_v20 = vmul.f32 0.5, %v6216_v6 }
 0x1ef   : > { %v1585_v15 = vmul.f32 0.5, %v6217_v30  ;;  %v1102_v49 = vmul.f32 0.044715, %v5154_v2  ;;  %v3337_v52 = vpop.eup %3336  ;;  %v5172_v23 = vmul.f32 %v1355_v32, %v971_v38  ;;  %v972_v28 = vmul.f32 0.7978846, %v5150_v41  ;;  %v6219_v30 = vld [vmem:[#allocation50_spill] sm:$0xff] }
 0x1f0   : > { %v1228_v10 = vmul.f32 %v1100_v39, %v5150_v41  ;;  %v1103_v14 = vmul.f32 0.044715, %v5159_v55  ;;  %v3339_v7 = vpop.eup %3338  ;;  %v1836_v51 = vadd.f32 1.0, %v3337_v52  ;;  %v974_v16 = vmul.f32 0.7978846, %v5154_v2 }
 0x1f1   : > { %6218 = vst [vmem:[#allocation32_spill] sm:$0xff] %v5172_v23  ;;  %v1230_v19 = vmul.f32 %v1102_v49, %v5154_v2  ;;  %v1105_v12 = vmul.f32 0.044715, %v5163_v33  ;;  %v3341_v45 = vpop.eup %3340  ;;  %v1840_v47 = vadd.f32 1.0, %v3339_v7  ;;  %v975_v38 = vmul.f32 0.7978846, %v5159_v55 }
 0x1f2   : > { %v1356_v34 = vadd.f32 1.0, %v1228_v10  ;;  %v1231_v32 = vmul.f32 %v1103_v14, %v5159_v55  ;;  %v1838_v13 = vadd.f32 1.0, %v3341_v45  ;;  %v5185_v52 = vadd.f32 %v6219_v30, %v3879_v58 }
 0x1f3   : > { %v3343_v43 = vpop.eup %3342  ;;  %v1358_v39 = vadd.f32 1.0, %v1230_v19  ;;  %v1233_v6 = vmul.f32 %v1105_v12, %v5163_v33  ;;  %v1964_v26 = vmul.f32 %v1836_v51, %v1580_v37  ;;  %v1968_v49 = vmul.f32 %v1840_v47, %v1584_v4 }
 0x1f4   : > { %v1842_v23 = vadd.f32 1.0, %v3343_v43  ;;  %v5189_v7 = vadd.f32 %v6220_v24, %v3881_v59  ;;  %v5191_v2 = vmul.f32 %v1357_v44, %v973_v25  ;;  %v5193_v14 = vmul.f32 %v1356_v34, %v972_v28 }
 0x1f5   : > { %v3345_v10 = vpop.eup %3344  ;;  %v1359_v45 = vadd.f32 1.0, %v1231_v32  ;;  %v977_v19 = vmul.f32 0.7978846, %v5163_v33  ;;  %v2060_v55 = vpack.c.bf16 %v1968_v49, %v1964_v26  ;;  %v1966_v41 = vmul.f32 %v1838_v13, %v1582_v31  ;;  %v6227_v49 = vld [vmem:[#allocation40_spill] sm:$0xff] }
 0x1f6   : > { %6221 = vst [vmem:[#allocation80_spill] sm:$0xff] %v5189_v7  ;;  %6222 = vst [vmem:[#allocation45_spill] sm:$0xff] %v5191_v2  ;;  %v3347_v12 = vpop.eup %3346  ;;  %v1970_v30 = vmul.f32 %v1842_v23, %v1586_v9  ;;  %v1835_v29 = vadd.f32 1.0, %v3345_v10  ;;  %v5196_v51 = vmul.f32 %v1358_v39, %v974_v16  ;;  %v1361_v47 = vadd.f32 1.0, %v1233_v6 }
 0x1f7   : > { %v3349_v37 = vpop.eup %3348  ;;  %v1839_v4 = vadd.f32 1.0, %v3347_v12  ;;  %v1104_v24 = vmul.f32 0.044715, %v5185_v52  ;;  %2450 = vmatprep.mubr.bf16.mxu0 %v2060_v55  ;;  %v976_v28 = vmul.f32 0.7978846, %v5185_v52  ;;  %v5203_v32 = vmul.f32 %v1359_v45, %v975_v38  ;;  %v6232_v12 = vld [vmem:[#allocation82_spill] sm:$0xff] }
 0x1f8   : > { %6223 = vst [vmem:[#allocation53_spill] sm:$0xff] %v5196_v51  ;;  %v3351_v43 = vpop.eup %3350  ;;  %v2062_v25 = vpack.c.bf16 %v1970_v30, %v1966_v41  ;;  %v1837_v44 = vadd.f32 1.0, %v3349_v37  ;;  %v1106_v34 = vmul.f32 0.044715, %v5189_v7  ;;  %v1963_v26 = vmul.f32 %v1835_v29, %v5143_v61  ;;  %v6233_v37 = vld [vmem:[#allocation56_spill] sm:$0xff] }
 0x1f9   : > { %v1967_v31 = vmul.f32 %v1839_v4, %v1583_v11  ;;  %v1841_v9 = vadd.f32 1.0, %v3351_v43  ;;  %v1232_v23 = vmul.f32 %v1104_v24, %v5185_v52  ;;  %6224 = vst [vmem:[#allocation39_spill] sm:$0xff] %v5203_v32  ;;  %3352 = vtanh.f32 %v4908_v53  ;;  %v6228_v53 = vld [vmem:[#allocation55_spill] sm:$0xff]  ;;  %v6236_v43 = vld [vmem:[#allocation5_spill] sm:$0xff] }
 0x1fa   : > { %2611 = vmatprep.mubr.bf16.mxu1 %v2062_v25  ;;  %v1965_v16 = vmul.f32 %v1837_v44, %v1581_v20  ;;  %v1234_v13 = vmul.f32 %v1106_v34, %v5189_v7  ;;  %3354 = vtanh.f32 %v4953_v8  ;;  %v5208_v6 = vmul.f32 %v1361_v47, %v977_v19  ;;  %v6226_v20 = vld [vmem:[#allocation66_spill] sm:$0xff]  ;;  %v6231_v8 = vld [vmem:[#allocation72_spill] sm:$0xff]  ;;  %v6237_v44 = vld [vmem:[#allocation63_spill] sm:$0xff] }
 0x1fb   : > { %v2059_v41 = vpack.c.bf16 %v1967_v31, %v1963_v26  ;;  %v1969_v55 = vmul.f32 %v1841_v9, %v1585_v15  ;;  %v1360_v39 = vadd.f32 1.0, %v1232_v23  ;;  %v978_v29 = vmul.f32 0.7978846, %v5189_v7  ;;  %v6230_v15 = vld [vmem:[#allocation20_spill] sm:$0xff]  ;;  %v6238_v26 = vld [vmem:[#allocation81_spill] sm:$0xff]  ;;  %v6239_v9 = vld [vmem:[#allocation14_spill] sm:$0xff] }
 0x1fc   : > { %6225 = vst [vmem:[#allocation83_spill] sm:$0xff] %v5208_v6  ;;  %v1362_v61 = vadd.f32 1.0, %v1234_v13  ;;  %3356 = vtanh.f32 %v4917_v17  ;;  %v1588_v38 = vmul.f32 0.5, %v6226_v20  ;;  %v5216_v10 = vadd.f32 %v6228_v53, %v3875_v56 }
 0x1fd   : > { %2451 = vmatmul.mubr.bf16.gmra.mrb[96].mxu0 %v2059_v41  ;;  %v2061_v11 = vpack.c.bf16 %v1969_v55, %v1965_v16  ;;  %3358 = vtanh.f32 %v6227_v49  ;;  %v1592_v45 = vmul.f32 0.5, %v6230_v15  ;;  %v1590_v19 = vmul.f32 0.5, %v6231_v8  ;;  %v6240_v16 = vld [vmem:[#allocation9_spill] sm:$0xff]  ;;  %v6243_v41 = vld [vmem:[#allocation23_spill] sm:$0xff]  ;;  %v6247_v15 = vld [vmem:[#allocation68_spill] sm:$0xff] }
 0x1fe   : > { %6229 = vst [vmem:[#allocation84_spill] sm:$0xff] %v5216_v10  ;;  %v1594_v30 = vmul.f32 0.5, %v6232_v12  ;;  %v5223_v4 = vadd.f32 %v6233_v37, %v3877_v57  ;;  %v5225_v17 = vmul.f32 %v1360_v39, %v976_v28  ;;  %v5227_v47 = vmul.f32 %v1362_v61, %v978_v29  ;;  %v6241_v28 = vld [vmem:[#allocation58_spill] sm:$0xff] }
 0x1ff   : > { %2612 = vmatmul.mubr.bf16.gmra.mrb[96].mxu1 %v2061_v11  ;;  %v1107_v24 = vmul.f32 0.044715, %v5216_v10  ;;  %3360 = vtanh.f32 %v6236_v43  ;;  %v1587_v34 = vmul.f32 0.5, %v6237_v44  ;;  %v1591_v31 = vmul.f32 0.5, %v6238_v26  ;;  %v6245_v61 = vld [vmem:[#allocation30_spill] sm:$0xff]  ;;  %v6246_v11 = vld [vmem:[#allocation59_spill] sm:$0xff] }
 0x200   : > { %6234 = vst [vmem:[#allocation28_spill] sm:$0xff] %v5223_v4  ;;  %6235 = vst [vmem:[#allocation49_spill] sm:$0xff] %v5227_v47  ;;  %v1109_v25 = vmul.f32 0.044715, %v5223_v4  ;;  %3362 = vtanh.f32 %v6239_v9  ;;  %v5239_v13 = vadd.f32 %v6241_v28, %v3879_v58  ;;  %v5243_v55 = vadd.f32 %v6243_v41, %v3881_v59  ;;  %v6249_v26 = vld [vmem:[#allocation60_spill] sm:$0xff] }
 0x201   : > { %v1235_v23 = vmul.f32 %v1107_v24, %v5216_v10  ;;  %3364 = vtanh.f32 %v6240_v16  ;;  %v979_v39 = vmul.f32 0.7978846, %v5216_v10  ;;  %v5250_v20 = vadd.f32 %v6246_v11, %v3875_v56  ;;  %v6248_v24 = vld [vmem:[#allocation75_spill] sm:$0xff] }
 0x202   : > { %6242 = vst [vmem:[#allocation85_spill] sm:$0xff] %v5239_v13  ;;  %6244 = vst [vmem:[#allocation19_spill] sm:$0xff] %v5243_v55  ;;  %v1237_v29 = vmul.f32 %v1109_v25, %v5223_v4  ;;  %3366 = vtanh.f32 %v6245_v61  ;;  %v981_v53 = vmul.f32 0.7978846, %v5223_v4  ;;  %v1589_v8 = vmul.f32 0.5, %v6247_v15  ;;  %v6250_v61 = vld [vmem:[#allocation61_spill] sm:$0xff] }
 0x203   : > { %v1363_v49 = vadd.f32 1.0, %v1235_v23  ;;  %v1108_v12 = vmul.f32 0.044715, %v5239_v13  ;;  %v3353_v37 = vpop.eup %3352  ;;  %v1593_v43 = vmul.f32 0.5, %v6248_v24  ;;  %v980_v44 = vmul.f32 0.7978846, %v5239_v13 }
 0x204   : > { %v1110_v25 = vmul.f32 0.044715, %v5243_v55  ;;  %v5260_v9 = vadd.f32 %v6249_v26, %v3877_v57  ;;  %v3355_v16 = vpop.eup %3354  ;;  %v1844_v28 = vadd.f32 1.0, %v3353_v37  ;;  %v1365_v23 = vadd.f32 1.0, %v1237_v29  ;;  %v6252_v29 = vld [vmem:[#allocation48_spill] sm:$0xff] }
 0x205   : > { %v1236_v41 = vmul.f32 %v1108_v12, %v5239_v13  ;;  %v5265_v11 = vadd.f32 %v6250_v61, %v3879_v58  ;;  %v1848_v4 = vadd.f32 1.0, %v3355_v16  ;;  %v982_v24 = vmul.f32 0.7978846, %v5243_v55 }
 0x206   : > { %v3357_v15 = vpop.eup %3356  ;;  %v1238_v6 = vmul.f32 %v1110_v25, %v5243_v55  ;;  %v1111_v10 = vmul.f32 0.044715, %v5250_v20  ;;  %v1972_v26 = vmul.f32 %v1844_v28, %v1588_v38  ;;  %v5270_v33 = vmul.f32 %v1363_v49, %v979_v39 }
 0x207   : > { %v3359_v2 = vpop.eup %3358  ;;  %v1846_v32 = vadd.f32 1.0, %v3357_v15  ;;  %v5274_v12 = vadd.f32 %v6252_v29, %v3881_v59  ;;  %v1976_v37 = vmul.f32 %v1848_v4, %v1592_v45  ;;  %v1364_v13 = vadd.f32 1.0, %v1236_v41 }
 0x208   : > { %6251 = vst [vmem:[#allocation16_spill] sm:$0xff] %v5270_v33  ;;  %v1850_v61 = vadd.f32 1.0, %v3359_v2  ;;  %v1239_v16 = vmul.f32 %v1111_v10, %v5250_v20  ;;  %v5277_v7 = vmul.f32 %v1365_v23, %v981_v53  ;;  %v1366_v25 = vadd.f32 1.0, %v1238_v6 }
 0x209   : > { %v3361_v47 = vpop.eup %3360  ;;  %v983_v55 = vmul.f32 0.7978846, %v5250_v20  ;;  %v1113_v38 = vmul.f32 0.044715, %v5260_v9  ;;  %v2064_v39 = vpack.c.bf16 %v1976_v37, %v1972_v26  ;;  %v1974_v49 = vmul.f32 %v1846_v32, %v1590_v19 }
 0x20a   : > { %6253 = vst [vmem:[#allocation18_spill] sm:$0xff] %v5277_v7  ;;  %v3363_v28 = vpop.eup %3362  ;;  %v1978_v15 = vmul.f32 %v1850_v61, %v1594_v30  ;;  %v1843_v33 = vadd.f32 1.0, %v3361_v47  ;;  %v985_v2 = vmul.f32 0.7978846, %v5260_v9  ;;  %v1112_v10 = vmul.f32 0.044715, %v5265_v11 }
 0x20b   : > { %v3365_v29 = vpop.eup %3364  ;;  %v1847_v51 = vadd.f32 1.0, %v3363_v28  ;;  %v1241_v45 = vmul.f32 %v1113_v38, %v5260_v9  ;;  %2458 = vmatprep.mubr.bf16.mxu0 %v2064_v39  ;;  %v5284_v23 = vmul.f32 %v1364_v13, %v980_v44  ;;  %v1367_v41 = vadd.f32 1.0, %v1239_v16  ;;  %v6257_v16 = vld [vmem:[#allocation65_spill] sm:$0xff] }
 0x20c   : > { %v3367_v4 = vpop.eup %3366  ;;  %v2066_v6 = vpack.c.bf16 %v1978_v15, %v1974_v49  ;;  %v1845_v53 = vadd.f32 1.0, %v3365_v29  ;;  %v1971_v7 = vmul.f32 %v1843_v33, %v1587_v34  ;;  %v984_v19 = vmul.f32 0.7978846, %v5265_v11  ;;  %v6261_v49 = vld [vmem:[#allocation27_spill] sm:$0xff] }
 0x20d   : > { %v1975_v26 = vmul.f32 %v1847_v51, %v1591_v31  ;;  %v1849_v32 = vadd.f32 1.0, %v3367_v4  ;;  %v5287_v30 = vmul.f32 %v1366_v25, %v982_v24  ;;  %v1369_v47 = vadd.f32 1.0, %v1241_v45  ;;  %v6256_v31 = vld [vmem:[#allocation37_spill] sm:$0xff] }
 0x20e   : > { %2619 = vmatprep.mubr.bf16.mxu1 %v2066_v6  ;;  %v1240_v37 = vmul.f32 %v1112_v10, %v5265_v11  ;;  %v1114_v61 = vmul.f32 0.044715, %v5274_v12  ;;  %v1973_v28 = vmul.f32 %v1845_v53, %v1589_v8  ;;  %v986_v13 = vmul.f32 0.7978846, %v5274_v12  ;;  %v6263_v6 = vld [vmem:[#allocation70_spill] sm:$0xff] }
 0x20f   : > { %6254 = vst [vmem:[#allocation41_spill] sm:$0xff] %v5287_v30  ;;  %v2063_v38 = vpack.c.bf16 %v1975_v26, %v1971_v7  ;;  %v1977_v39 = vmul.f32 %v1849_v32, %v1593_v43  ;;  %v5292_v44 = vmul.f32 %v1367_v41, %v983_v55  ;;  %3368 = vtanh.f32 %v5014_v1  ;;  %v6259_v55 = vld [vmem:[#allocation47_spill] sm:$0xff]  ;;  %v6264_v53 = vld [vmem:[#allocation42_spill] sm:$0xff]  ;;  %v6265_v41 = vld [vmem:[#allocation64_spill] sm:$0xff] }
 0x210   : > { %v1368_v33 = vadd.f32 1.0, %v1240_v37  ;;  %v1242_v51 = vmul.f32 %v1114_v61, %v5274_v12  ;;  %v1596_v24 = vmul.f32 0.5, %v6256_v31  ;;  %3370 = vtanh.f32 %v5046_v40  ;;  %v6266_v26 = vld [vmem:[#allocation10_spill] sm:$0xff] }
 0x211   : > { %6255 = vst [vmem:[#allocation51_spill] sm:$0xff] %v5292_v44  ;;  %2459 = vmatmul.mubr.bf16.gmra.mrb[100].mxu0 %v2063_v38  ;;  %v2065_v34 = vpack.c.bf16 %v1977_v39, %v1973_v28  ;;  %v5300_v7 = vadd.f32 %v6257_v16, %v3875_v56  ;;  %v5302_v8 = vmul.f32 %v1369_v47, %v985_v2  ;;  %3372 = vtanh.f32 %v5017_v50  ;;  %v6267_v47 = vld [vmem:[#allocation15_spill] sm:$0xff]  ;;  %v6268_v61 = vld [vmem:[#allocation34_spill] sm:$0xff] }
 0x212   : > { %v1370_v43 = vadd.f32 1.0, %v1242_v51  ;;  %v5307_v25 = vadd.f32 %v6259_v55, %v3877_v57  ;;  %v1600_v1 = vmul.f32 0.5, %v5006_v22  ;;  %v1598_v15 = vmul.f32 0.5, %v6261_v49  ;;  %v6269_v28 = vld [vmem:[#allocation26_spill] sm:$0xff] }
 0x213   : > { %6258 = vst [vmem:[#allocation62_spill] sm:$0xff] %v5302_v8  ;;  %2620 = vmatmul.mubr.bf16.gmra.mrb[100].mxu1 %v2065_v34  ;;  %3374 = vtanh.f32 %v5048_v54  ;;  %v1115_v40 = vmul.f32 0.044715, %v5300_v7  ;;  %v5313_v29 = vmul.f32 %v1368_v33, %v984_v19  ;;  %v1602_v2 = vmul.f32 0.5, %v5010_v48  ;;  %v6270_v51 = vld [vmem:[#allocation6_spill] sm:$0xff]  ;;  %v6273_v8 = vld [vmem:[#allocation8_spill] sm:$0xff] }
 0x214   : > { %6260 = vst [vmem:[#allocation44_spill] sm:$0xff] %v5307_v25  ;;  %v987_v45 = vmul.f32 0.7978846, %v5300_v7  ;;  %v1117_v50 = vmul.f32 0.044715, %v5307_v25  ;;  %v5318_v10 = vmul.f32 %v1370_v43, %v986_v13  ;;  %v5322_v22 = vmul.f32 0.5, %v6263_v6 }
 0x215   : > { %v1243_v4 = vmul.f32 %v1115_v40, %v5300_v7  ;;  %3376 = vtanh.f32 %v6264_v53  ;;  %v5329_v48 = vadd.f32 %v6265_v41, %v3879_v58  ;;  %v5333_v32 = vadd.f32 %v6266_v26, %v3881_v59 }
 0x216   : > { %6262 = vst [vmem:[#allocation24_spill] sm:$0xff] %v5318_v10  ;;  %v1245_v54 = vmul.f32 %v1117_v50, %v5307_v25  ;;  %3378 = vtanh.f32 %v5024_v62  ;;  %v5338_v37 = vadd.f32 %v6267_v47, %v3875_v56  ;;  %v5342_v38 = vadd.f32 %v6268_v61, %v3877_v57 }
 0x217   : > { %v1371_v19 = vadd.f32 1.0, %v1243_v4  ;;  %3380 = vtanh.f32 %v5012_v18  ;;  %v989_v62 = vmul.f32 0.7978846, %v5307_v25  ;;  %v1599_v39 = vmul.f32 0.5, %v6269_v28 }
 0x218   : > { %3382 = vtanh.f32 %v5029_v5  ;;  %v1116_v13 = vmul.f32 0.044715, %v5329_v48  ;;  %v1373_v33 = vadd.f32 1.0, %v1245_v54  ;;  %v1597_v34 = vmul.f32 0.5, %v6270_v51 }
 0x219   : > { %v1601_v18 = vmul.f32 0.5, %v4984_v27  ;;  %v1118_v31 = vmul.f32 0.044715, %v5333_v32  ;;  %v3369_v16 = vpop.eup %3368  ;;  %v5351_v43 = vmul.f32 %v1371_v19, %v987_v45  ;;  %v988_v55 = vmul.f32 0.7978846, %v5329_v48 }
 0x21a   : > { %v1244_v49 = vmul.f32 %v1116_v13, %v5329_v48  ;;  %v1119_v40 = vmul.f32 0.044715, %v5338_v37  ;;  %v3371_v50 = vpop.eup %3370  ;;  %v1852_v5 = vadd.f32 1.0, %v3369_v16  ;;  %v990_v4 = vmul.f32 0.7978846, %v5333_v32  ;;  %v6272_v13 = vld [vmem:[#allocation69_spill] sm:$0xff] }
 0x21b   : > { %6271 = vst [vmem:[#allocation54_spill] sm:$0xff] %v5351_v43  ;;  %v1246_v6 = vmul.f32 %v1118_v31, %v5333_v32  ;;  %v1121_v53 = vmul.f32 0.044715, %v5342_v38  ;;  %v3373_v27 = vpop.eup %3372  ;;  %v1856_v54 = vadd.f32 1.0, %v3371_v50  ;;  %v991_v45 = vmul.f32 0.7978846, %v5338_v37 }
 0x21c   : > { %v1372_v41 = vadd.f32 1.0, %v1244_v49  ;;  %v1247_v26 = vmul.f32 %v1119_v40, %v5338_v37  ;;  %v1854_v47 = vadd.f32 1.0, %v3373_v27  ;;  %v5364_v51 = vadd.f32 %v6272_v13, %v3879_v58 }
 0x21d   : > { %v3375_v19 = vpop.eup %3374  ;;  %v1374_v61 = vadd.f32 1.0, %v1246_v6  ;;  %v1249_v28 = vmul.f32 %v1121_v53, %v5342_v38  ;;  %v1980_v16 = vmul.f32 %v1852_v5, %v1596_v24  ;;  %v1984_v31 = vmul.f32 %v1856_v54, %v1600_v1 }
 0x21e   : > { %v1858_v43 = vadd.f32 1.0, %v3375_v19  ;;  %v5368_v50 = vadd.f32 %v6273_v8, %v3881_v59  ;;  %v5370_v44 = vmul.f32 %v1373_v33, %v989_v62  ;;  %v5372_v40 = vmul.f32 %v1372_v41, %v988_v55 }
 0x21f   : > { %v3377_v49 = vpop.eup %3376  ;;  %v1375_v27 = vadd.f32 1.0, %v1247_v26  ;;  %v993_v6 = vmul.f32 0.7978846, %v5342_v38  ;;  %v2068_v10 = vpack.c.bf16 %v1984_v31, %v1980_v16  ;;  %v1982_v25 = vmul.f32 %v1854_v47, %v1598_v15 }
 0x220   : > { %6274 = vst [vmem:[#allocation36_spill] sm:$0xff] %v5370_v44  ;;  %v3379_v53 = vpop.eup %3378  ;;  %v1986_v13 = vmul.f32 %v1858_v43, %v1602_v2  ;;  %v1851_v30 = vadd.f32 1.0, %v3377_v49  ;;  %v5375_v5 = vmul.f32 %v1374_v61, %v990_v4  ;;  %v1377_v54 = vadd.f32 1.0, %v1249_v28  ;;  %v6281_v49 = vld [vmem:[#allocation76_spill] sm:$0xff] }
 0x221   : > { %v3381_v24 = vpop.eup %3380  ;;  %v1855_v1 = vadd.f32 1.0, %v3379_v53  ;;  %v1120_v8 = vmul.f32 0.044715, %v5364_v51  ;;  %2466 = vmatprep.mubr.bf16.mxu0 %v2068_v10  ;;  %v992_v55 = vmul.f32 0.7978846, %v5364_v51  ;;  %v5382_v47 = vmul.f32 %v1375_v27, %v991_v45 }
 0x222   : > { %6275 = vst [vmem:[#allocation31_spill] sm:$0xff] %v5375_v5  ;;  %v3383_v19 = vpop.eup %3382  ;;  %v2070_v62 = vpack.c.bf16 %v1986_v13, %v1982_v25  ;;  %v1853_v33 = vadd.f32 1.0, %v3381_v24  ;;  %v1122_v41 = vmul.f32 0.044715, %v5368_v50  ;;  %v1979_v26 = vmul.f32 %v1851_v30, %v5322_v22 }
 0x223   : > { %v1983_v15 = vmul.f32 %v1855_v1, %v1599_v39  ;;  %v1857_v2 = vadd.f32 1.0, %v3383_v19  ;;  %v1248_v43 = vmul.f32 %v1120_v8, %v5364_v51  ;;  %6276 = vst [vmem:[#allocation52_spill] sm:$0xff] %v5382_v47  ;;  %3384 = vtanh.f32 %v5105_v0  ;;  %v6279_v0 = vld [vmem:[#allocation67_spill] sm:$0xff] }
 0x224   : > { %2627 = vmatprep.mubr.bf16.mxu1 %v2070_v62  ;;  %v1981_v4 = vmul.f32 %v1853_v33, %v1597_v34  ;;  %v1250_v61 = vmul.f32 %v1122_v41, %v5368_v50  ;;  %3386 = vtanh.f32 %v5134_v21  ;;  %v5387_v16 = vmul.f32 %v1377_v54, %v993_v6  ;;  %v6278_v34 = vld [vmem:[#allocation12_spill] sm:$0xff]  ;;  %v6285_v54 = vld [vmem:[#allocation25_spill] sm:$0xff]  ;;  %v6287_v41 = vld [vmem:[#allocation43_spill] sm:$0xff] }
 0x225   : > { %v2067_v25 = vpack.c.bf16 %v1983_v15, %v1979_v26  ;;  %v1985_v10 = vmul.f32 %v1857_v2, %v1601_v18  ;;  %v1376_v28 = vadd.f32 1.0, %v1248_v43  ;;  %v994_v30 = vmul.f32 0.7978846, %v5368_v50  ;;  %v6288_v26 = vld [vmem:[#allocation71_spill] sm:$0xff]  ;;  %v6289_v2 = vld [vmem:[#allocation21_spill] sm:$0xff] }
 0x226   : > { %6277 = vst [vmem:[#allocation57_spill] sm:$0xff] %v5387_v16  ;;  %v1378_v22 = vadd.f32 1.0, %v1250_v61  ;;  %3388 = vtanh.f32 %v5108_v35  ;;  %v1604_v45 = vmul.f32 0.5, %v6278_v34  ;;  %v5395_v31 = vadd.f32 %v6279_v0, %v3875_v56  ;;  %v5397_v18 = vpop.f32.mrb[64].mxu0  ;;  %v6282_v35 = vld [vmem:[#allocation7_spill] sm:$0xff]  ;;  %v6294_v34 = vld [vmem:[#allocation74_spill] sm:$0xff] }
 0x227   : > { %2467 = vmatmul.mubr.bf16.gmra.mrb[104].mxu0 %v2067_v25  ;;  %v2069_v39 = vpack.c.bf16 %v1985_v10, %v1981_v4  ;;  %3390 = vtanh.f32 %v5139_v42  ;;  %v1608_v21 = vmul.f32 0.5, %v5086_v63  ;;  %v1606_v27 = vmul.f32 0.5, %v6281_v49  ;;  %v5406_v13 = vpop.f32.mrb[65].mxu0  ;;  %v5414_v63 = vpop.f32.mrb[64].mxu1  ;;  %v6291_v25 = vld [vmem:[#allocation86_spill] sm:$0xff] }
 0x228   : > { %6280 = vst [vmem:[#allocation35_spill] sm:$0xff] %v5395_v31  ;;  %v1610_v6 = vmul.f32 0.5, %v5095_v36  ;;  %v5404_v53 = vadd.f32 %v6282_v35, %v3877_v57  ;;  %v5408_v42 = vmul.f32 %v1376_v28, %v992_v55  ;;  %v5410_v24 = vmul.f32 %v1378_v22, %v994_v30  ;;  %v6286_v36 = vld [vmem:[#allocation73_spill] sm:$0xff]  ;;  %v5424_v33 = vpop.f32.mrb[65].mxu1  ;;  %v5436_v4 = vpop.f32.mrb[66].mxu0 }
 0x229   : > { %2628 = vmatmul.mubr.bf16.gmra.mrb[104].mxu1 %v2069_v39  ;;  %v1123_v1 = vmul.f32 0.044715, %v5395_v31  ;;  %3392 = vtanh.f32 %v6285_v54  ;;  %v5418_v19 = vmul.f32 0.5, %v6286_v36  ;;  %v5421_v62 = vmul.f32 0.5, %v5071_v60  ;;  %v5438_v60 = vpop.f32.mrb[66].mxu1  ;;  %v5447_v28 = vpop.f32.mrb[67].mxu0 }
 0x22a   : > { %6283 = vst [vmem:[#allocation46_spill] sm:$0xff] %v5404_v53  ;;  %6284 = vst [vmem:[#allocation50_spill] sm:$0xff] %v5410_v24  ;;  %v1125_v8 = vmul.f32 0.044715, %v5404_v53  ;;  %3394 = vtanh.f32 %v5113_v3  ;;  %v5430_v15 = vadd.f32 %v6288_v26, %v3879_v58  ;;  %v5434_v43 = vadd.f32 %v6289_v2, %v3881_v59  ;;  %v5449_v30 = vpop.f32.mrb[67].mxu1 }
 0x22b   : > { %v1251_v55 = vmul.f32 %v1123_v1, %v5395_v31  ;;  %3396 = vtanh.f32 %v6287_v41  ;;  %6290 = vst [vmem:[#allocation38_spill] sm:$0xff] %v5438_v60  ;;  %v995_v3 = vmul.f32 0.7978846, %v5395_v31  ;;  %v5445_v10 = vadd.f32 %v6291_v25, %v3875_v56  ;;  %6293 = vst [vmem:[#allocation40_spill] sm:$0xff] %v5449_v30  ;;  %v6295_v1 = vld [vmem:[#allocation77_spill] sm:$0xff]  ;;  %v6296_v56 = vld [vmem:[#allocation87_spill] sm:$0xff] }
 0x22c   : > { %v1253_v61 = vmul.f32 %v1125_v8, %v5404_v53  ;;  %3398 = vtanh.f32 %v5123_v46  ;;  %v997_v39 = vmul.f32 0.7978846, %v5404_v53  ;;  %v1605_v0 = vmul.f32 0.5, %v6294_v34  ;;  %v6298_v25 = vld [vmem:[#allocation17_spill] sm:$0xff] }
 0x22d   : > { %6292 = vst [vmem:[#allocation66_spill] sm:$0xff] %v5445_v10  ;;  %v1379_v22 = vadd.f32 1.0, %v1251_v55  ;;  %v1124_v49 = vmul.f32 0.044715, %v5430_v15  ;;  %v3385_v35 = vpop.eup %3384  ;;  %v1609_v54 = vmul.f32 0.5, %v6295_v1  ;;  %v5459_v36 = vadd.f32 %v6296_v56, %v3877_v57 }
 0x22e   : > { %v996_v46 = vmul.f32 0.7978846, %v5430_v15  ;;  %v1126_v8 = vmul.f32 0.044715, %v5434_v43  ;;  %v3387_v41 = vpop.eup %3386  ;;  %v1860_v26 = vadd.f32 1.0, %v3385_v35  ;;  %v1381_v55 = vadd.f32 1.0, %v1253_v61 }
 0x22f   : > { %6297 = vst [vmem:[#allocation55_spill] sm:$0xff] %v5459_v36  ;;  %v1252_v2 = vmul.f32 %v1124_v49, %v5430_v15  ;;  %v5464_v34 = vadd.f32 %v6298_v25, %v3879_v58  ;;  %v1864_v31 = vadd.f32 1.0, %v3387_v41  ;;  %v998_v1 = vmul.f32 0.7978846, %v5434_v43  ;;  %v6300_v61 = vld [vmem:[#allocation11_spill] sm:$0xff] }
 0x230   : > { %v3389_v53 = vpop.eup %3388  ;;  %v1254_v16 = vmul.f32 %v1126_v8, %v5434_v43  ;;  %v1127_v44 = vmul.f32 0.044715, %v5445_v10  ;;  %v1988_v57 = vmul.f32 %v1860_v26, %v1604_v45  ;;  %v5469_v60 = vmul.f32 %v1379_v22, %v995_v3 }
 0x231   : > { %v3391_v30 = vpop.eup %3390  ;;  %v1862_v56 = vadd.f32 1.0, %v3389_v53  ;;  %v5473_v49 = vadd.f32 %v6300_v61, %v3881_v59  ;;  %v1992_v35 = vmul.f32 %v1864_v31, %v1608_v21  ;;  %v1380_v25 = vadd.f32 1.0, %v1252_v2 }
 0x232   : > { %6299 = vst [vmem:[#allocation20_spill] sm:$0xff] %v5469_v60  ;;  %v1866_v58 = vadd.f32 1.0, %v3391_v30  ;;  %v1255_v41 = vmul.f32 %v1127_v44, %v5445_v10  ;;  %v5476_v24 = vmul.f32 %v1381_v55, %v997_v39  ;;  %v1382_v8 = vadd.f32 1.0, %v1254_v16 }
 0x233   : > { %v3393_v47 = vpop.eup %3392  ;;  %v999_v5 = vmul.f32 0.7978846, %v5445_v10  ;;  %v1129_v45 = vmul.f32 0.044715, %v5459_v36  ;;  %v2072_v3 = vpack.c.bf16 %v1992_v35, %v1988_v57  ;;  %v1990_v22 = vmul.f32 %v1862_v56, %v1606_v27 }
 0x234   : > { %v3395_v53 = vpop.eup %3394  ;;  %v1994_v26 = vmul.f32 %v1866_v58, %v1610_v6  ;;  %v1859_v60 = vadd.f32 1.0, %v3393_v47  ;;  %v1001_v31 = vmul.f32 0.7978846, %v5459_v36  ;;  %v1128_v44 = vmul.f32 0.044715, %v5464_v34 }
 0x235   : > { %v3397_v59 = vpop.eup %3396  ;;  %v1863_v61 = vadd.f32 1.0, %v3395_v53  ;;  %v1257_v21 = vmul.f32 %v1129_v45, %v5459_v36  ;;  %2474 = vmatprep.mubr.bf16.mxu0 %v2072_v3  ;;  %v5483_v55 = vmul.f32 %v1380_v25, %v996_v46  ;;  %v1383_v2 = vadd.f32 1.0, %v1255_v41 }
 0x236   : > { %v3399_v30 = vpop.eup %3398  ;;  %v2074_v16 = vpack.c.bf16 %v1994_v26, %v1990_v22  ;;  %v1861_v39 = vadd.f32 1.0, %v3397_v59  ;;  %v1987_v57 = vmul.f32 %v1859_v60, %v5418_v19  ;;  %v5487_v56 = vmul.f32 %v1382_v8, %v998_v1  ;;  %v6301_v8 = vld [vmem:[#allocation33_spill] sm:$0xff] }
 0x237   : > { %v1991_v27 = vmul.f32 %v1863_v61, %v5421_v62  ;;  %v1865_v47 = vadd.f32 1.0, %v3399_v30  ;;  %v1385_v6 = vadd.f32 1.0, %v1257_v21  ;;  %v1000_v35 = vmul.f32 0.7978846, %v5464_v34  ;;  %v6303_v59 = vld [vmem:[#allocation53_spill] sm:$0xff] }
 0x238   : > { %2635 = vmatprep.mubr.bf16.mxu1 %v2074_v16  ;;  %v1256_v58 = vmul.f32 %v1128_v44, %v5464_v34  ;;  %v1130_v45 = vmul.f32 0.044715, %v5473_v49  ;;  %v1989_v3 = vmul.f32 %v1861_v39, %v1605_v0  ;;  %v1002_v25 = vmul.f32 0.7978846, %v5473_v49  ;;  %v6305_v44 = vld [vmem:[#allocation49_spill] sm:$0xff]  ;;  %v6307_v16 = vld [vmem:[#allocation22_spill] sm:$0xff] }
 0x239   : > { %v2071_v53 = vpack.c.bf16 %v1991_v27, %v1987_v57  ;;  %v1993_v46 = vmul.f32 %v1865_v47, %v1609_v54  ;;  %v5493_v41 = vmul.f32 %v1383_v2, %v999_v5  ;;  %3400 = vtanh.f32 %v5193_v14  ;;  %v6302_v54 = vld [vmem:[#allocation78_spill] sm:$0xff]  ;;  %v6308_v2 = vld [vmem:[#allocation32_spill] sm:$0xff]  ;;  %v6309_v57 = vld [vmem:[#allocation29_spill] sm:$0xff] }
 0x23a   : > { %v1384_v19 = vadd.f32 1.0, %v1256_v58  ;;  %v1258_v62 = vmul.f32 %v1130_v45, %v5473_v49  ;;  %v5497_v1 = vmul.f32 %v1385_v6, %v1001_v31  ;;  %v1612_v22 = vmul.f32 0.5, %v6301_v8  ;;  %v6304_v31 = vld [vmem:[#allocation80_spill] sm:$0xff]  ;;  %v6310_v47 = vld [vmem:[#allocation79_spill] sm:$0xff]  ;;  %v6313_v8 = vld [vmem:[#allocation45_spill] sm:$0xff] }
 0x23b   : > { %2475 = vmatmul.mubr.bf16.gmra.mrb[108].mxu0 %v2071_v53  ;;  %v2073_v60 = vpack.c.bf16 %v1993_v46, %v1989_v3  ;;  %3402 = vtanh.f32 %v5225_v17  ;;  %v5502_v0 = vmul.f32 0.5, %v5185_v52  ;;  %v5505_v5 = vmul.f32 0.5, %v6302_v54  ;;  %v5508_v61 = vpop.f32.mrb[68].mxu0  ;;  %v6306_v17 = vld [vmem:[#allocation13_spill] sm:$0xff]  ;;  %v6311_v53 = vld [vmem:[#allocation39_spill] sm:$0xff] }
 0x23c   : > { %v1386_v26 = vadd.f32 1.0, %v1258_v62  ;;  %3404 = vtanh.f32 %v6303_v59  ;;  %v5510_v14 = vmul.f32 %v1384_v19, %v1000_v35  ;;  %v5513_v21 = vmul.f32 0.5, %v6304_v31  ;;  %v5519_v52 = vpop.f32.mrb[69].mxu0  ;;  %v6312_v3 = vld [vmem:[#allocation85_spill] sm:$0xff]  ;;  %v6314_v54 = vld [vmem:[#allocation19_spill] sm:$0xff] }
 0x23d   : > { %2636 = vmatmul.mubr.bf16.gmra.mrb[108].mxu1 %v2073_v60  ;;  %3406 = vtanh.f32 %v6305_v44  ;;  %v5517_v30 = vmul.f32 0.5, %v6306_v17  ;;  %v5522_v39 = vmul.f32 0.5, %v6307_v16  ;;  %v5526_v27 = vmul.f32 0.5, %v6309_v57  ;;  %v5531_v35 = vpop.f32.mrb[68].mxu1  ;;  %v5533_v58 = vpop.f32.mrb[70].mxu0  ;;  %v6316_v17 = vld [vmem:[#allocation83_spill] sm:$0xff] }
 0x23e   : > { %3408 = vtanh.f32 %v6308_v2  ;;  %v5529_v6 = vmul.f32 0.5, %v6310_v47  ;;  %v5535_v45 = vmul.f32 %v1386_v26, %v1002_v25  ;;  %v5539_v46 = vmul.f32 0.5, %v6312_v3  ;;  %v5544_v62 = vpop.f32.mrb[69].mxu1  ;;  %v5546_v60 = vpop.f32.mrb[71].mxu0  ;;  %v6315_v26 = vld [vmem:[#allocation84_spill] sm:$0xff] }
 0x23f   : > { %3410 = vtanh.f32 %v6311_v53  ;;  %v5542_v19 = vmul.f32 0.5, %v5265_v11  ;;  %v5550_v59 = vmul.f32 0.5, %v6314_v54  ;;  %v5553_v25 = vmul.f32 0.5, %v5274_v12  ;;  %v5558_v44 = vpop.f32.mrb[70].mxu1  ;;  %v6317_v16 = vld [vmem:[#allocation28_spill] sm:$0xff] }
 0x240   : > { %3412 = vtanh.f32 %v6313_v8  ;;  %v5556_v31 = vmul.f32 0.5, %v6315_v26  ;;  %v5562_v11 = vmul.f32 0.5, %v5250_v20  ;;  %v5565_v2 = vmul.f32 0.5, %v6317_v16  ;;  %v5570_v47 = vpop.f32.mrb[71].mxu1  ;;  %v6319_v54 = vld [vmem:[#allocation44_spill] sm:$0xff] }
 0x241   : > { %3414 = vtanh.f32 %v6316_v17  ;;  %v5568_v57 = vmul.f32 0.5, %v5260_v9  ;;  %v5574_v12 = vmul.f32 0.5, %v5329_v48  ;;  %v5577_v53 = vmul.f32 0.5, %v5364_v51  ;;  %v6318_v48 = vld [vmem:[#allocation41_spill] sm:$0xff]  ;;  %v6320_v26 = vld [vmem:[#allocation24_spill] sm:$0xff] }
 0x242   : > { %3416 = vtanh.f32 %v5284_v23  ;;  %v5580_v20 = vmul.f32 0.5, %v5333_v32  ;;  %v5584_v3 = vmul.f32 0.5, %v5368_v50  ;;  %v5587_v9 = vmul.f32 0.5, %v5300_v7 }
 0x243   : > { %3418 = vtanh.f32 %v5313_v29  ;;  %v5590_v8 = vmul.f32 0.5, %v5338_v37  ;;  %v3401_v23 = vpop.eup %3400  ;;  %v5594_v51 = vmul.f32 0.5, %v6319_v54  ;;  %v5597_v32 = vmul.f32 0.5, %v5342_v38  ;;  %v5613_v38 = vld [vmem:[%s5815_s4] ss:$0 sm:$0xff] }
 0x244   : > { %3420 = vtanh.f32 %v6318_v48  ;;  %v5600_v29 = vmul.f32 0.5, %v5430_v15  ;;  %v1868_v7 = vadd.f32 1.0, %v3401_v23  ;;  %v5605_v37 = vmul.f32 0.5, %v5464_v34  ;;  %v6323_v48 = vld [vmem:[#allocation16_spill] sm:$0xff] }
 0x245   : > { %v3403_v50 = vpop.eup %3402  ;;  %3422 = vtanh.f32 %v6320_v26  ;;  %v5608_v17 = vmul.f32 0.5, %v5434_v43  ;;  %v5617_v54 = vmul.f32 0.5, %v5473_v49  ;;  %v2880_v23 = vadd.f32 %v5406_v13, %v5397_v18  ;;  %v6325_v43 = vld [vmem:[#allocation51_spill] sm:$0xff]  ;;  %v6326_v49 = vld [vmem:[#allocation18_spill] sm:$0xff] }
 0x246   : > { %6321 = vst [vmem:[#allocation72_spill] sm:$0xff] %v5605_v37  ;;  %v3405_v16 = vpop.eup %3404  ;;  %v1872_v15 = vadd.f32 1.0, %v3403_v50  ;;  %3424 = vtanh.f32 %v6323_v48  ;;  %v1996_v26 = vmul.f32 %v1868_v7, %v1612_v22  ;;  %v6327_v7 = vld [vmem:[#allocation62_spill] sm:$0xff] }
 0x247   : > { %6322 = vst [vmem:[#allocation82_spill] sm:$0xff] %v5608_v17  ;;  %6324 = vst [vmem:[#allocation56_spill] sm:$0xff] %v5617_v54  ;;  %v3407_v34 = vpop.eup %3406  ;;  %v1870_v36 = vadd.f32 1.0, %v3405_v16  ;;  %3426 = vtanh.f32 %v6325_v43  ;;  %v2992_v17 = vadd.f32 %v5424_v33, %v5414_v63  ;;  %v2389_v54 = vadd.f32 %v2880_v23, %v5613_v38 }
 0x248   : > { %v3409_v50 = vpop.eup %3408  ;;  %v2000_v48 = vmul.f32 %v1872_v15, %v5502_v0  ;;  %v1874_v10 = vadd.f32 1.0, %v3407_v34  ;;  %3428 = vtanh.f32 %v6326_v49  ;;  %v2883_v16 = vadd.f32 %v5447_v28, %v5436_v4 }
 0x249   : > { %v3411_v18 = vpop.eup %3410  ;;  %v1998_v13 = vmul.f32 %v1870_v36, %v5505_v5  ;;  %v1867_v22 = vadd.f32 1.0, %v3409_v50  ;;  %3430 = vtanh.f32 %v6327_v7  ;;  %v2550_v36 = vadd.f32 %v2992_v17, %v2389_v54  ;;  %v6329_v50 = vld [vmem:[#allocation50_spill] sm:$0xff] }
 0x24a   : > { %v3413_v43 = vpop.eup %3412  ;;  %v2076_v37 = vpack.c.bf16 %v2000_v48, %v1996_v26  ;;  %v2002_v63 = vmul.f32 %v1874_v10, %v5513_v21  ;;  %v1871_v33 = vadd.f32 1.0, %v3411_v18  ;;  %3432 = vtanh.f32 %v5372_v40  ;;  %v6328_v26 = vld [vmem:[#allocation31_spill] sm:$0xff]  ;;  %v6330_v54 = vld [vmem:[#allocation54_spill] sm:$0xff]  ;;  %v6331_v18 = vld [vmem:[#allocation52_spill] sm:$0xff] }
 0x24b   : > { %v3415_v0 = vpop.eup %3414  ;;  %v1995_v15 = vmul.f32 %v1867_v22, %v5517_v30  ;;  %v1869_v23 = vadd.f32 1.0, %v3413_v43  ;;  %3434 = vtanh.f32 %v5408_v42  ;;  %2676 = vst [vmem:[%s5644_s25] sm:$0xff] %v2550_v36  ;;  %v2392_v42 = vadd.f32 %v2883_v16, %v5613_v38  ;;  %v6333_v22 = vld [vmem:[#allocation40_spill] sm:$0xff] }
 0x24c   : > { %v3417_v5 = vpop.eup %3416  ;;  %2482 = vmatprep.mubr.bf16.mxu0 %v2076_v37  ;;  %v2078_v34 = vpack.c.bf16 %v2002_v63, %v1998_v13  ;;  %v1999_v4 = vmul.f32 %v1871_v33, %v5522_v39  ;;  %v1873_v28 = vadd.f32 1.0, %v3415_v0  ;;  %3436 = vtanh.f32 %v6328_v26  ;;  %v6332_v13 = vld [vmem:[#allocation38_spill] sm:$0xff]  ;;  %v6334_v0 = vld [vmem:[#allocation36_spill] sm:$0xff] }
 0x24d   : > { %v3419_v10 = vpop.eup %3418  ;;  %v1997_v21 = vmul.f32 %v1869_v23, %v5526_v27  ;;  %v1876_v40 = vadd.f32 1.0, %v3417_v5  ;;  %3438 = vtanh.f32 %v6329_v50  ;;  %v2995_v7 = vadd.f32 %v6333_v22, %v6332_v13 }
 0x24e   : > { %v3421_v30 = vpop.eup %3420  ;;  %2643 = vmatprep.mubr.bf16.mxu1 %v2078_v34  ;;  %v2075_v37 = vpack.c.bf16 %v1999_v4, %v1995_v15  ;;  %v2001_v39 = vmul.f32 %v1873_v28, %v5529_v6  ;;  %v1880_v17 = vadd.f32 1.0, %v3419_v10  ;;  %3440 = vtanh.f32 %v6330_v54 }
 0x24f   : > { %v3423_v48 = vpop.eup %3422  ;;  %v2004_v27 = vmul.f32 %v1876_v40, %v5539_v46  ;;  %v1878_v49 = vadd.f32 1.0, %v3421_v30  ;;  %3442 = vtanh.f32 %v6331_v18  ;;  %v6335_v46 = vld [vmem:[#allocation57_spill] sm:$0xff]  ;;  %v2553_v36 = vadd.f32 %v2995_v7, %v2392_v42 }
 0x250   : > { %v3425_v43 = vpop.eup %3424  ;;  %2483 = vmatmul.mubr.bf16.gmra.mrb[112].mxu0 %v2075_v37  ;;  %v2077_v16 = vpack.c.bf16 %v2001_v39, %v1997_v21  ;;  %v2008_v63 = vmul.f32 %v1880_v17, %v5542_v19  ;;  %v1882_v33 = vadd.f32 1.0, %v3423_v48  ;;  %3444 = vtanh.f32 %v6334_v0 }
 0x251   : > { %v3427_v6 = vpop.eup %3426  ;;  %v2006_v15 = vmul.f32 %v1878_v49, %v5550_v59  ;;  %v1875_v23 = vadd.f32 1.0, %v3425_v43  ;;  %3446 = vtanh.f32 %v6335_v46  ;;  %v2890_v19 = vpop.f32.mrb[72].mxu0  ;;  %2677 = vst [vmem:[%s5644_s25 + $0x8] sm:$0xff] %v2553_v36  ;;  %v2886_v59 = vadd.f32 %v5519_v52, %v5508_v61 }
 0x252   : > { %v3429_v5 = vpop.eup %3428  ;;  %2644 = vmatmul.mubr.bf16.gmra.mrb[112].mxu1 %v2077_v16  ;;  %v2080_v34 = vpack.c.bf16 %v2008_v63, %v2004_v27  ;;  %v2010_v4 = vmul.f32 %v1882_v33, %v5553_v25  ;;  %v1879_v28 = vadd.f32 1.0, %v3427_v6  ;;  %3448 = vtanh.f32 %v5483_v55  ;;  %v2891_v40 = vpop.f32.mrb[73].mxu0 }
 0x253   : > { %v3431_v26 = vpop.eup %3430  ;;  %v2003_v10 = vmul.f32 %v1875_v23, %v5556_v31  ;;  %v1877_v21 = vadd.f32 1.0, %v3429_v5  ;;  %3450 = vtanh.f32 %v5510_v14  ;;  %v3002_v55 = vpop.f32.mrb[72].mxu1  ;;  %v2397_v61 = vadd.f32 %v2886_v59, %v5613_v38 }
 0x254   : > { %v3433_v50 = vpop.eup %3432  ;;  %2490 = vmatprep.mubr.bf16.mxu0 %v2080_v34  ;;  %v2082_v42 = vpack.c.bf16 %v2010_v4, %v2006_v15  ;;  %v2007_v25 = vmul.f32 %v1879_v28, %v5562_v11  ;;  %v1881_v30 = vadd.f32 1.0, %v3431_v26  ;;  %3452 = vtanh.f32 %v5487_v56  ;;  %v5667_v37 = vpop.f32.mrb[74].mxu0  ;;  %v6336_v56 = vld [vmem:[#allocation20_spill] sm:$0xff] }
 0x255   : > { %v3435_v31 = vpop.eup %3434  ;;  %v2005_v39 = vmul.f32 %v1877_v21, %v5565_v2  ;;  %v1884_v14 = vadd.f32 1.0, %v3433_v50  ;;  %3454 = vtanh.f32 %v5535_v45  ;;  %v3003_v52 = vpop.f32.mrb[73].mxu1  ;;  %v2998_v45 = vadd.f32 %v5544_v62, %v5531_v35 }
 0x256   : > { %v2894_v17 = vpop.f32.mrb[75].mxu0  ;;  %v3437_v54 = vpop.eup %3436  ;;  %2651 = vmatprep.mubr.bf16.mxu1 %v2082_v42  ;;  %v2079_v48 = vpack.c.bf16 %v2007_v25, %v2003_v10  ;;  %v2009_v11 = vmul.f32 %v1881_v30, %v5568_v57  ;;  %v1888_v27 = vadd.f32 1.0, %v3435_v31  ;;  %3456 = vtanh.f32 %v6336_v56  ;;  %v6337_v25 = vld [vmem:[#allocation72_spill] sm:$0xff] }
 0x257   : > { %v3005_v49 = vpop.f32.mrb[74].mxu1  ;;  %v3439_v18 = vpop.eup %3438  ;;  %v2012_v13 = vmul.f32 %v1884_v14, %v5574_v12  ;;  %v1886_v2 = vadd.f32 1.0, %v3437_v54  ;;  %3458 = vtanh.f32 %v5493_v41  ;;  %v2558_v41 = vadd.f32 %v2998_v45, %v2397_v61  ;;  %v6339_v61 = vld [vmem:[#allocation66_spill] sm:$0xff]  ;;  %v6343_v45 = vld [vmem:[#allocation55_spill] sm:$0xff] }
 0x258   : > { %v3006_v22 = vpop.f32.mrb[75].mxu1  ;;  %v3441_v7 = vpop.eup %3440  ;;  %2491 = vmatmul.mubr.bf16.gmra.mrb[116].mxu0 %v2079_v48  ;;  %v2081_v43 = vpack.c.bf16 %v2009_v11, %v2005_v39  ;;  %v2016_v16 = vmul.f32 %v1888_v27, %v5577_v53  ;;  %v1890_v57 = vadd.f32 1.0, %v3439_v18  ;;  %3460 = vtanh.f32 %v5476_v24  ;;  %v6341_v27 = vld [vmem:[#allocation56_spill] sm:$0xff] }
 0x259   : > { %v3443_v63 = vpop.eup %3442  ;;  %v2014_v33 = vmul.f32 %v1886_v2, %v5580_v20  ;;  %v1883_v12 = vadd.f32 1.0, %v3441_v7  ;;  %3462 = vtanh.f32 %v5497_v1  ;;  %v2889_v53 = vadd.f32 %v5546_v60, %v5533_v58  ;;  %2678 = vst [vmem:[%s5644_s25 + $0x10] sm:$0xff] %v2558_v41 }
 0x25a   : > { %v3445_v0 = vpop.eup %3444  ;;  %2652 = vmatmul.mubr.bf16.gmra.mrb[116].mxu1 %v2081_v43  ;;  %v2084_v35 = vpack.c.bf16 %v2016_v16, %v2012_v13  ;;  %v2018_v62 = vmul.f32 %v1890_v57, %v5584_v3  ;;  %v1887_v6 = vadd.f32 1.0, %v3443_v63  ;;  %v3001_v20 = vadd.f32 %v5570_v47, %v5558_v44 }
 0x25b   : > { %v3447_v15 = vpop.eup %3446  ;;  %v2011_v23 = vmul.f32 %v1883_v12, %v5587_v9  ;;  %v1885_v24 = vadd.f32 1.0, %v3445_v0  ;;  %v2892_v46 = vadd.f32 %v2891_v40, %v2890_v19  ;;  %v2400_v3 = vadd.f32 %v2889_v53, %v5613_v38 }
 0x25c   : > { %v3449_v1 = vpop.eup %3448  ;;  %2498 = vmatprep.mubr.bf16.mxu0 %v2084_v35  ;;  %v2086_v36 = vpack.c.bf16 %v2018_v62, %v2014_v33  ;;  %v2015_v5 = vmul.f32 %v1887_v6, %v5590_v8  ;;  %v1889_v34 = vadd.f32 1.0, %v3447_v15  ;;  %v3004_v28 = vadd.f32 %v3003_v52, %v3002_v55 }
 0x25d   : > { %v3451_v4 = vpop.eup %3450  ;;  %v2013_v58 = vmul.f32 %v1885_v24, %v5594_v51  ;;  %v1892_v60 = vadd.f32 1.0, %v3449_v1  ;;  %v2405_v9 = vadd.f32 %v2892_v46, %v5613_v38  ;;  %v2561_v10 = vadd.f32 %v3001_v20, %v2400_v3 }
 0x25e   : > { %v3453_v26 = vpop.eup %3452  ;;  %2659 = vmatprep.mubr.bf16.mxu1 %v2086_v36  ;;  %v2083_v44 = vpack.c.bf16 %v2015_v5, %v2011_v23  ;;  %v2017_v47 = vmul.f32 %v1889_v34, %v5597_v32  ;;  %v1896_v19 = vadd.f32 1.0, %v3451_v4  ;;  %v2895_v51 = vadd.f32 %v2894_v17, %v5667_v37  ;;  %v6338_v32 = vld [vmem:[#allocation35_spill] sm:$0xff]  ;;  %v6340_v17 = vld [vmem:[#allocation82_spill] sm:$0xff] }
 0x25f   : > { %v3455_v21 = vpop.eup %3454  ;;  %v2020_v8 = vmul.f32 %v1892_v60, %v5600_v29  ;;  %v1894_v59 = vadd.f32 1.0, %v3453_v26  ;;  %v2566_v40 = vadd.f32 %v3004_v28, %v2405_v9  ;;  %2679 = vst [vmem:[%s5644_s25 + $0x18] sm:$0xff] %v2561_v10  ;;  %v3007_v31 = vadd.f32 %v3006_v22, %v3005_v49  ;;  %v6342_v49 = vld [vmem:[#allocation46_spill] sm:$0xff] }
 0x260   : > { %v3457_v50 = vpop.eup %3456  ;;  %2499 = vmatmul.mubr.bf16.gmra.mrb[120].mxu0 %v2083_v44  ;;  %v2085_v42 = vpack.c.bf16 %v2017_v47, %v2013_v58  ;;  %v2024_v30 = vmul.f32 %v1896_v19, %v6337_v25  ;;  %v1898_v55 = vadd.f32 1.0, %v3455_v21  ;;  %v1635_v14 = vmul.f32 0.5, %v6338_v32 }
 0x261   : > { %v3459_v39 = vpop.eup %3458  ;;  %v1639_v52 = vmul.f32 0.5, %v6339_v61  ;;  %v1891_v54 = vadd.f32 1.0, %v3457_v50  ;;  %2680 = vst [vmem:[%s5644_s25 + $0x20] sm:$0xff] %v2566_v40  ;;  %v2408_v29 = vadd.f32 %v2895_v51, %v5613_v38  ;;  %v2022_v11 = vmul.f32 %v1894_v59, %v6340_v17 }
 0x262   : > { %v3461_v48 = vpop.eup %3460  ;;  %2660 = vmatmul.mubr.bf16.gmra.mrb[120].mxu1 %v2085_v42  ;;  %v2088_v37 = vpack.c.bf16 %v2024_v30, %v2020_v8  ;;  %v2026_v56 = vmul.f32 %v1898_v55, %v6341_v27  ;;  %v1895_v18 = vadd.f32 1.0, %v3459_v39  ;;  %v1637_v2 = vmul.f32 0.5, %v6342_v49 }
 0x263   : > { %v3463_v13 = vpop.eup %3462  ;;  %v1641_v22 = vmul.f32 0.5, %v6343_v45  ;;  %v1893_v7 = vadd.f32 1.0, %v3461_v48  ;;  %v2569_v43 = vadd.f32 %v3007_v31, %v2408_v29  ;;  %v2019_v57 = vmul.f32 %v1891_v54, %v1635_v14 }
 0x264   : > { %2506 = vmatprep.mubr.bf16.mxu0 %v2088_v37  ;;  %v2090_v16 = vpack.c.bf16 %v2026_v56, %v2022_v11  ;;  %v2023_v63 = vmul.f32 %v1895_v18, %v1639_v52  ;;  %v1897_v33 = vadd.f32 1.0, %v3463_v13 }
 0x265   : > { %2681 = vst [vmem:[%s5644_s25 + $0x28] sm:$0xff] %v2569_v43  ;;  %v2021_v41 = vmul.f32 %v1893_v7, %v1637_v2 }
 0x266   : > { %2667 = vmatprep.mubr.bf16.mxu1 %v2090_v16  ;;  %v2087_v12 = vpack.c.bf16 %v2023_v63, %v2019_v57  ;;  %v2025_v0 = vmul.f32 %v1897_v33, %v1641_v22  ;;  %v2896_v35 = vpop.f32.mrb[76].mxu0 }
 0x267   : > { %v2897_v62 = vpop.f32.mrb[77].mxu0 }
 0x268   : > { %2507 = vmatmul.mubr.bf16.gmra.mrb[124].mxu0 %v2087_v12  ;;  %v2089_v6 = vpack.c.bf16 %v2025_v0, %v2021_v41  ;;  %v3008_v53 = vpop.f32.mrb[76].mxu1  ;;  %v2898_v15 = vadd.f32 %v2897_v62, %v2896_v35  ;;  %v2899_v23 = vpop.f32.mrb[78].mxu0 }
 0x269   : > { %v3009_v24 = vpop.f32.mrb[77].mxu1  ;;  %v2900_v20 = vpop.f32.mrb[79].mxu0 }
 0x26a   : > { %2668 = vmatmul.mubr.bf16.gmra.mrb[124].mxu1 %v2089_v6  ;;  %v2413_v46 = vadd.f32 %v2898_v15, %v5613_v38  ;;  %v3010_v1 = vadd.f32 %v3009_v24, %v3008_v53  ;;  %v3011_v36 = vpop.f32.mrb[78].mxu1  ;;  %v2901_v5 = vadd.f32 %v2900_v20, %v2899_v23 }
 0x26b   : > { %v3012_v34 = vpop.f32.mrb[79].mxu1 }
 0x26c   : > { %v2574_v3 = vadd.f32 %v3010_v1, %v2413_v46  ;;  %v2416_v4 = vadd.f32 %v2901_v5, %v5613_v38  ;;  %v3013_v58 = vadd.f32 %v3012_v34, %v3011_v36 }
 0x26e   : > { %2682 = vst [vmem:[%s5644_s25 + $0x30] sm:$0xff] %v2574_v3  ;;  %v2577_v60 = vadd.f32 %v3013_v58, %v2416_v4 }
 0x270   : > { %2683 = vst [vmem:[%s5644_s25 + $0x38] sm:$0xff] %v2577_v60 }
 0x27c   : > { %v2902_v9 = vpop.f32.mrb[80].mxu0 }
 0x27d   : > { %v2903_v28 = vpop.f32.mrb[81].mxu0 }
 0x27e   : > { %v3014_v26 = vpop.f32.mrb[80].mxu1  ;;  %v2904_v44 = vadd.f32 %v2903_v28, %v2902_v9  ;;  %v2905_v47 = vpop.f32.mrb[82].mxu0 }
 0x27f   : > { %v3015_v19 = vpop.f32.mrb[81].mxu1  ;;  %v2906_v10 = vpop.f32.mrb[83].mxu0 }
 0x280   : > { %v2421_v21 = vadd.f32 %v2904_v44, %v5613_v38  ;;  %v3016_v8 = vadd.f32 %v3015_v19, %v3014_v26  ;;  %v3017_v59 = vpop.f32.mrb[82].mxu1  ;;  %v2907_v40 = vadd.f32 %v2906_v10, %v2905_v47 }
 0x281   : > { %v3018_v51 = vpop.f32.mrb[83].mxu1 }
 0x282   : > { %v2582_v50 = vadd.f32 %v3016_v8, %v2421_v21  ;;  %v2424_v42 = vadd.f32 %v2907_v40, %v5613_v38  ;;  %v3019_v25 = vadd.f32 %v3018_v51, %v3017_v59 }
 0x284   : > { %2684 = vst [vmem:[%s5644_s25 + $0x40] sm:$0xff] %v2582_v50  ;;  %v2585_v30 = vadd.f32 %v3019_v25, %v2424_v42 }
 0x286   : > { %2685 = vst [vmem:[%s5644_s25 + $0x48] sm:$0xff] %v2585_v30 }
 0x290   : > { %v2908_v55 = vpop.f32.mrb[84].mxu0 }
 0x291   : > { %v2909_v31 = vpop.f32.mrb[85].mxu0 }
 0x292   : > { %v3020_v39 = vpop.f32.mrb[84].mxu1  ;;  %v2910_v32 = vadd.f32 %v2909_v31, %v2908_v55  ;;  %v2911_v14 = vpop.f32.mrb[86].mxu0 }
 0x293   : > { %v3021_v61 = vpop.f32.mrb[85].mxu1  ;;  %v2912_v52 = vpop.f32.mrb[87].mxu0 }
 0x294   : > { %v2429_v54 = vadd.f32 %v2910_v32, %v5613_v38  ;;  %v3022_v29 = vadd.f32 %v3021_v61, %v3020_v39  ;;  %v3023_v48 = vpop.f32.mrb[86].mxu1  ;;  %v2913_v37 = vadd.f32 %v2912_v52, %v2911_v14 }
 0x295   : > { %v3024_v17 = vpop.f32.mrb[87].mxu1 }
 0x296   : > { %v2590_v11 = vadd.f32 %v3022_v29, %v2429_v54  ;;  %v2432_v27 = vadd.f32 %v2913_v37, %v5613_v38  ;;  %v3025_v56 = vadd.f32 %v3024_v17, %v3023_v48 }
 0x298   : > { %2686 = vst [vmem:[%s5644_s25 + $0x50] sm:$0xff] %v2590_v11  ;;  %v2593_v18 = vadd.f32 %v3025_v56, %v2432_v27 }
 0x29a   : > { %2687 = vst [vmem:[%s5644_s25 + $0x58] sm:$0xff] %v2593_v18 }
 0x2a6   : > { %v2914_v13 = vpop.f32.mrb[88].mxu0 }
 0x2a7   : > { %v2915_v49 = vpop.f32.mrb[89].mxu0 }
 0x2a8   : > { %v3026_v2 = vpop.f32.mrb[88].mxu1  ;;  %v2916_v45 = vadd.f32 %v2915_v49, %v2914_v13  ;;  %v2917_v22 = vpop.f32.mrb[90].mxu0 }
 0x2a9   : > { %v3027_v7 = vpop.f32.mrb[89].mxu1  ;;  %v2918_v43 = vpop.f32.mrb[91].mxu0 }
 0x2aa   : > { %v2437_v16 = vadd.f32 %v2916_v45, %v5613_v38  ;;  %v3028_v57 = vadd.f32 %v3027_v7, %v3026_v2  ;;  %v3029_v63 = vpop.f32.mrb[90].mxu1  ;;  %v2919_v33 = vadd.f32 %v2918_v43, %v2917_v22 }
 0x2ab   : > { %v3030_v12 = vpop.f32.mrb[91].mxu1 }
 0x2ac   : > { %v2598_v41 = vadd.f32 %v3028_v57, %v2437_v16  ;;  %v2440_v0 = vadd.f32 %v2919_v33, %v5613_v38  ;;  %v3031_v35 = vadd.f32 %v3030_v12, %v3029_v63 }
 0x2ae   : > { %2688 = vst [vmem:[%s5644_s25 + $0x60] sm:$0xff] %v2598_v41  ;;  %v2601_v62 = vadd.f32 %v3031_v35, %v2440_v0 }
 0x2b0   : > { %2689 = vst [vmem:[%s5644_s25 + $0x68] sm:$0xff] %v2601_v62 }
 0x2ba   : > { %v2920_v6 = vpop.f32.mrb[92].mxu0 }
 0x2bb   : > { %v2921_v53 = vpop.f32.mrb[93].mxu0 }
 0x2bc   : > { %v3032_v15 = vpop.f32.mrb[92].mxu1  ;;  %v2922_v23 = vadd.f32 %v2921_v53, %v2920_v6  ;;  %v2923_v24 = vpop.f32.mrb[94].mxu0 }
 0x2bd   : > { %v3033_v20 = vpop.f32.mrb[93].mxu1  ;;  %v2924_v46 = vpop.f32.mrb[95].mxu0 }
 0x2be   : > { %v2445_v1 = vadd.f32 %v2922_v23, %v5613_v38  ;;  %v3034_v36 = vadd.f32 %v3033_v20, %v3032_v15  ;;  %v3035_v5 = vpop.f32.mrb[94].mxu1  ;;  %v2925_v34 = vadd.f32 %v2924_v46, %v2923_v24 }
 0x2bf   : > { %v3036_v3 = vpop.f32.mrb[95].mxu1 }
 0x2c0   : > { %v2606_v4 = vadd.f32 %v3034_v36, %v2445_v1  ;;  %v2448_v58 = vadd.f32 %v2925_v34, %v5613_v38  ;;  %v3037_v60 = vadd.f32 %v3036_v3, %v3035_v5 }
 0x2c2   : > { %2690 = vst [vmem:[%s5644_s25 + $0x70] sm:$0xff] %v2606_v4  ;;  %v2609_v9 = vadd.f32 %v3037_v60, %v2448_v58 }
 0x2c4   : > { %2691 = vst [vmem:[%s5644_s25 + $0x78] sm:$0xff] %v2609_v9 }
 0x2d0   : > { %v2926_v28 = vpop.f32.mrb[96].mxu0 }
 0x2d1   : > { %v2927_v26 = vpop.f32.mrb[97].mxu0 }
 0x2d2   : > { %v3038_v44 = vpop.f32.mrb[96].mxu1  ;;  %v2928_v47 = vadd.f32 %v2927_v26, %v2926_v28  ;;  %v2929_v19 = vpop.f32.mrb[98].mxu0 }
 0x2d3   : > { %v3039_v10 = vpop.f32.mrb[97].mxu1  ;;  %v2930_v21 = vpop.f32.mrb[99].mxu0 }
 0x2d4   : > { %v2453_v8 = vadd.f32 %v2928_v47, %v5613_v38  ;;  %v3040_v59 = vadd.f32 %v3039_v10, %v3038_v44  ;;  %v3041_v40 = vpop.f32.mrb[98].mxu1  ;;  %v2931_v51 = vadd.f32 %v2930_v21, %v2929_v19 }
 0x2d5   : > { %v3042_v50 = vpop.f32.mrb[99].mxu1 }
 0x2d6   : > { %v2614_v42 = vadd.f32 %v3040_v59, %v2453_v8  ;;  %v2456_v25 = vadd.f32 %v2931_v51, %v5613_v38  ;;  %v3043_v30 = vadd.f32 %v3042_v50, %v3041_v40 }
 0x2d8   : > { %2692 = vst [vmem:[%s5644_s25 + $0x80] sm:$0xff] %v2614_v42  ;;  %v2617_v55 = vadd.f32 %v3043_v30, %v2456_v25 }
 0x2da   : > { %2693 = vst [vmem:[%s5644_s25 + $0x88] sm:$0xff] %v2617_v55 }
 0x2e4   : > { %v2932_v31 = vpop.f32.mrb[100].mxu0 }
 0x2e5   : > { %v2933_v39 = vpop.f32.mrb[101].mxu0 }
 0x2e6   : > { %v3044_v32 = vpop.f32.mrb[100].mxu1  ;;  %v2934_v14 = vadd.f32 %v2933_v39, %v2932_v31  ;;  %v2935_v61 = vpop.f32.mrb[102].mxu0 }
 0x2e7   : > { %v3045_v52 = vpop.f32.mrb[101].mxu1  ;;  %v2936_v54 = vpop.f32.mrb[103].mxu0 }
 0x2e8   : > { %v2461_v29 = vadd.f32 %v2934_v14, %v5613_v38  ;;  %v3046_v48 = vadd.f32 %v3045_v52, %v3044_v32  ;;  %v3047_v37 = vpop.f32.mrb[102].mxu1  ;;  %v2937_v17 = vadd.f32 %v2936_v54, %v2935_v61 }
 0x2e9   : > { %v3048_v11 = vpop.f32.mrb[103].mxu1 }
 0x2ea   : > { %v2622_v27 = vadd.f32 %v3046_v48, %v2461_v29  ;;  %v2464_v56 = vadd.f32 %v2937_v17, %v5613_v38  ;;  %v3049_v18 = vadd.f32 %v3048_v11, %v3047_v37 }
 0x2ec   : > { %2694 = vst [vmem:[%s5644_s25 + $0x90] sm:$0xff] %v2622_v27  ;;  %v2625_v13 = vadd.f32 %v3049_v18, %v2464_v56 }
 0x2ee   : > { %2695 = vst [vmem:[%s5644_s25 + $0x98] sm:$0xff] %v2625_v13 }
 0x2fa   : > { %v2938_v49 = vpop.f32.mrb[104].mxu0 }
 0x2fb   : > { %v2939_v2 = vpop.f32.mrb[105].mxu0 }
 0x2fc   : > { %v3050_v45 = vpop.f32.mrb[104].mxu1  ;;  %v2940_v22 = vadd.f32 %v2939_v2, %v2938_v49  ;;  %v2941_v7 = vpop.f32.mrb[106].mxu0 }
 0x2fd   : > { %v3051_v43 = vpop.f32.mrb[105].mxu1  ;;  %v2942_v16 = vpop.f32.mrb[107].mxu0 }
 0x2fe   : > { %v2469_v57 = vadd.f32 %v2940_v22, %v5613_v38  ;;  %v3052_v63 = vadd.f32 %v3051_v43, %v3050_v45  ;;  %v3053_v33 = vpop.f32.mrb[106].mxu1  ;;  %v2943_v12 = vadd.f32 %v2942_v16, %v2941_v7 }
 0x2ff   : > { %v3054_v41 = vpop.f32.mrb[107].mxu1 }
 0x300   : > { %v2630_v0 = vadd.f32 %v3052_v63, %v2469_v57  ;;  %v2472_v35 = vadd.f32 %v2943_v12, %v5613_v38  ;;  %v3055_v62 = vadd.f32 %v3054_v41, %v3053_v33 }
 0x302   : > { %2696 = vst [vmem:[%s5644_s25 + $0xa0] sm:$0xff] %v2630_v0  ;;  %v2633_v6 = vadd.f32 %v3055_v62, %v2472_v35 }
 0x304   : > { %2697 = vst [vmem:[%s5644_s25 + $0xa8] sm:$0xff] %v2633_v6 }
 0x30e   : > { %v2944_v53 = vpop.f32.mrb[108].mxu0 }
 0x30f   : > { %v2945_v15 = vpop.f32.mrb[109].mxu0 }
 0x310   : > { %v3056_v23 = vpop.f32.mrb[108].mxu1  ;;  %v2946_v24 = vadd.f32 %v2945_v15, %v2944_v53  ;;  %v2947_v20 = vpop.f32.mrb[110].mxu0 }
 0x311   : > { %v3057_v46 = vpop.f32.mrb[109].mxu1  ;;  %v2948_v1 = vpop.f32.mrb[111].mxu0 }
 0x312   : > { %v2477_v36 = vadd.f32 %v2946_v24, %v5613_v38  ;;  %v3058_v5 = vadd.f32 %v3057_v46, %v3056_v23  ;;  %v3059_v34 = vpop.f32.mrb[110].mxu1  ;;  %v2949_v3 = vadd.f32 %v2948_v1, %v2947_v20 }
 0x313   : > { %v3060_v4 = vpop.f32.mrb[111].mxu1 }
 0x314   : > { %v2638_v58 = vadd.f32 %v3058_v5, %v2477_v36  ;;  %v2480_v60 = vadd.f32 %v2949_v3, %v5613_v38  ;;  %v3061_v9 = vadd.f32 %v3060_v4, %v3059_v34 }
 0x316   : > { %2698 = vst [vmem:[%s5644_s25 + $0xb0] sm:$0xff] %v2638_v58  ;;  %v2641_v28 = vadd.f32 %v3061_v9, %v2480_v60 }
 0x318   : > { %2699 = vst [vmem:[%s5644_s25 + $0xb8] sm:$0xff] %v2641_v28 }
 0x323   : > { %v2950_v26 = vpop.f32.mrb[112].mxu0 }
 0x324   : > { %v2951_v44 = vpop.f32.mrb[113].mxu0 }
 0x325   : > { %v3062_v47 = vpop.f32.mrb[112].mxu1  ;;  %v2952_v19 = vadd.f32 %v2951_v44, %v2950_v26  ;;  %v2953_v10 = vpop.f32.mrb[114].mxu0 }
 0x326   : > { %v3063_v21 = vpop.f32.mrb[113].mxu1  ;;  %v2954_v8 = vpop.f32.mrb[115].mxu0 }
 0x327   : > { %v2485_v59 = vadd.f32 %v2952_v19, %v5613_v38  ;;  %v3064_v40 = vadd.f32 %v3063_v21, %v3062_v47  ;;  %v3065_v51 = vpop.f32.mrb[114].mxu1  ;;  %v2955_v50 = vadd.f32 %v2954_v8, %v2953_v10 }
 0x328   : > { %v3066_v42 = vpop.f32.mrb[115].mxu1 }
 0x329   : > { %v2646_v25 = vadd.f32 %v3064_v40, %v2485_v59  ;;  %v2488_v30 = vadd.f32 %v2955_v50, %v5613_v38  ;;  %v3067_v55 = vadd.f32 %v3066_v42, %v3065_v51 }
 0x32b   : > { %2700 = vst [vmem:[%s5644_s25 + $0xc0] sm:$0xff] %v2646_v25  ;;  %v2649_v31 = vadd.f32 %v3067_v55, %v2488_v30  ;;  %v2956_v39 = vpop.f32.mrb[116].mxu0 }
 0x32c   : > { %v2957_v32 = vpop.f32.mrb[117].mxu0 }
 0x32d   : > { %2701 = vst [vmem:[%s5644_s25 + $0xc8] sm:$0xff] %v2649_v31  ;;  %v3068_v14 = vpop.f32.mrb[116].mxu1  ;;  %v2958_v61 = vadd.f32 %v2957_v32, %v2956_v39  ;;  %v2959_v52 = vpop.f32.mrb[118].mxu0 }
 0x32e   : > { %v3069_v54 = vpop.f32.mrb[117].mxu1  ;;  %v2960_v29 = vpop.f32.mrb[119].mxu0 }
 0x32f   : > { %v2493_v48 = vadd.f32 %v2958_v61, %v5613_v38  ;;  %v3070_v37 = vadd.f32 %v3069_v54, %v3068_v14  ;;  %v3071_v17 = vpop.f32.mrb[118].mxu1  ;;  %v2961_v11 = vadd.f32 %v2960_v29, %v2959_v52 }
 0x330   : > { %v3072_v27 = vpop.f32.mrb[119].mxu1 }
 0x331   : > { %v2654_v56 = vadd.f32 %v3070_v37, %v2493_v48  ;;  %v2496_v18 = vadd.f32 %v2961_v11, %v5613_v38  ;;  %v3073_v13 = vadd.f32 %v3072_v27, %v3071_v17 }
 0x333   : > { %2702 = vst [vmem:[%s5644_s25 + $0xd0] sm:$0xff] %v2654_v56  ;;  %v2657_v49 = vadd.f32 %v3073_v13, %v2496_v18  ;;  %v2962_v2 = vpop.f32.mrb[120].mxu0 }
 0x334   : > { %v2963_v45 = vpop.f32.mrb[121].mxu0 }
 0x335   : > { %2703 = vst [vmem:[%s5644_s25 + $0xd8] sm:$0xff] %v2657_v49  ;;  %v3074_v22 = vpop.f32.mrb[120].mxu1  ;;  %v2964_v7 = vadd.f32 %v2963_v45, %v2962_v2  ;;  %v2965_v43 = vpop.f32.mrb[122].mxu0 }
 0x336   : > { %v3075_v16 = vpop.f32.mrb[121].mxu1  ;;  %v2966_v57 = vpop.f32.mrb[123].mxu0 }
 0x337   : > { %v2501_v63 = vadd.f32 %v2964_v7, %v5613_v38  ;;  %v3076_v33 = vadd.f32 %v3075_v16, %v3074_v22  ;;  %v3077_v12 = vpop.f32.mrb[122].mxu1  ;;  %v2967_v41 = vadd.f32 %v2966_v57, %v2965_v43 }
 0x338   : > { %v3078_v0 = vpop.f32.mrb[123].mxu1 }
 0x339   : > { %v2662_v35 = vadd.f32 %v3076_v33, %v2501_v63  ;;  %v2504_v62 = vadd.f32 %v2967_v41, %v5613_v38  ;;  %v3079_v6 = vadd.f32 %v3078_v0, %v3077_v12 }
 0x33b   : > { %2704 = vst [vmem:[%s5644_s25 + $0xe0] sm:$0xff] %v2662_v35  ;;  %v2665_v53 = vadd.f32 %v3079_v6, %v2504_v62  ;;  %v2968_v15 = vpop.f32.mrb[124].mxu0 }
 0x33c   : > { %v2969_v23 = vpop.f32.mrb[125].mxu0 }
 0x33d   : > { %2705 = vst [vmem:[%s5644_s25 + $0xe8] sm:$0xff] %v2665_v53  ;;  %v3080_v24 = vpop.f32.mrb[124].mxu1  ;;  %v2970_v20 = vadd.f32 %v2969_v23, %v2968_v15  ;;  %v2971_v46 = vpop.f32.mrb[126].mxu0 }
 0x33e   : > { %v3081_v1 = vpop.f32.mrb[125].mxu1  ;;  %v2972_v36 = vpop.f32.mrb[127].mxu0 }
 0x33f   : > { %v2509_v5 = vadd.f32 %v2970_v20, %v5613_v38  ;;  %v3082_v34 = vadd.f32 %v3081_v1, %v3080_v24  ;;  %v3083_v3 = vpop.f32.mrb[126].mxu1  ;;  %v2973_v4 = vadd.f32 %v2972_v36, %v2971_v46 }
 0x340   : > { %v3084_v58 = vpop.f32.mrb[127].mxu1 }
 0x341   : > { %v2670_v60 = vadd.f32 %v3082_v34, %v2509_v5  ;;  %v2512_v9 = vadd.f32 %v2973_v4, %v5613_v38  ;;  %v3085_v28 = vadd.f32 %v3084_v58, %v3083_v3 }
 0x343   : > { %2706 = vst [vmem:[%s5644_s25 + $0xf0] sm:$0xff] %v2670_v60  ;;  %v2673_v26 = vadd.f32 %v3085_v28, %v2512_v9 }
 0x345   : > { %2707 = vst [vmem:[%s5644_s25 + $0xf8] sm:$0xff] %v2673_v26 }
 0x346   : > { %3477 = shalt.err (!%p3474_p3)
}
 0x347   : > { %s3478_s14 = scalar_lea.hbm %s5762_s10, 4096  ;;  %s3482_s17 = scalar_lea.hbm %s5816_s5, 8192 }
 0x348   : > { %p3479_p4 = scmp.ne.s32.totalorder %s5762_s10, %s3478_s14  ;;  %p3483_p9 = scmp.lt.u32.totalorder %s5762_s10, %s5816_s5 }
 0x349   : > { %p3484_p10 = scmp.lt.u32.totalorder %s3482_s17, %s3478_s14  ;;  %p3486_p12 = scmp.lt.u32.totalorder %s3478_s14, %s5762_s10 }
 0x34a   : > { %p3480_p7 = pnand %p3479_p4, %p3600_p5 }
 0x34b   : > { %p3485_p11 = por %p3484_p10, %p3483_p9 }
 0x34c   : > { %p3481_p8 = pneg %p3480_p7 }
 0x34d   : > { %p3487_p13 = por %p3486_p12, %p3485_p11 }
 0x34f   : > { %p3488_p0 = pnand %p3487_p13, %p3481_p8 }
 0x351   : > { %3491 = shalt.err (!%p3488_p0)
}
 0x352   : > { %s3530_s25 = smov 128   ;;  %s3531_s30 = smov 8  }
 0x353   : > { %3086 = dma.vmem_to_hbm [thread:$0]  (%p3600_p5), %s5764_s7, 4096, %s5762_s10, %s5770_s22, %s3530_s25, %s3530_s25, %s3531_s30  }
 0x354 PF: > { %p3092_p1 = scmp.ge.s32.totalorder %s3526_s21, 2  ;;  %s2737_s8 = sand.u32 1, %s3514_s18  }
 0x355   : > { %s2738_s9 = scalar_lea.sflag [#allocation3], %s2737_s8 }
 0x356   : > { %p3089_p2 = pnand %p3092_p1, %p3604_p6 }
 0x358   : > { %3509 = dma.done.wait (!%p3089_p2), %s2738_s9, 4096  }
 0x359   : > { %3511 = vsyncadd (!%p3089_p2), %s2738_s9, 4294963200  ;;  %p15_p3 = scmp.ge.s32.totalorder %s3587_s24, 4   ;;  %s6344_s18 = smov %s3518_s19 }
 0x35a   : > { %s6345_s19 = smov %s3522_s20  ;;  %s6346_s20 = smov %s3598_s27 }
 0x35b   : > { %s6347_s21 = smov %s3587_s24  ;;  %17 = sbr.rel (!%p15_p3) target bundleno = 3 (0x3), region = 75 }
 0x362   :  { %2743 = vsyncpa [#allocation3], 1 }
 0x363   :  { %2745 = vsyncpa [#allocation3 + $0x1], 1 }

</bundles_post_ra>
